<compile_context>
chip_gen: v6e
topology: v6e:2x2x1
jax: 0.10.0
libtpu: 0.0.40
codegen_flags: <defaults>
</compile_context>

<pallas_src>
import jax
import jax.numpy as jnp
from jax.experimental import pallas as pl
from jax.experimental.pallas import tpu as pltpu

HID = 64           # hidden width of scale_net / translate_net
HID2 = 2 * HID     # fused hidden width ([scale | translate]) == 128 (one sublane tile)
NCH = 8            # fused output channels, padded 2 -> 8 (row 0 = scale, row 1 = translate)
LANES = 128        # lane width; batch elements per sublane-row of the lane-dense layout


def nf_forward_kernel(x_ref, w1b_ref, b1b_ref, w2_ref, sb2_ref, tb2_ref,
                      x_out_ref, ldj_ref):
    """One batch tile: applies every coupling layer sequentially, accumulates log|det J|.

    Layouts:
      x_ref / x_out_ref / ldj_ref : (TILE_R, 128) f32, batch on lanes
      w1b_ref / b1b_ref           : (F, HID2, 128) f32, hidden on sublanes, lane-replicated
      w2_ref                      : (F, NCH, HID2) f32, row 0 = scale col, row 1 = translate col
      sb2_ref / tb2_ref           : (F,) f32 in SMEM (final-layer biases)
    """
    x = x_ref[...]                                    # (R, 128)
    ldj = jnp.zeros_like(x)
    tile_r = x.shape[0]
    num_flows = w1b_ref.shape[0]

    for f in range(num_flows):                        # small & static -> fully unrolled
        w1b = w1b_ref[f]                              # (HID2, 128)
        b1b = b1b_ref[f]                              # (HID2, 128)
        w2 = w2_ref[f]                                # (NCH, HID2)

        # Fused first Linear(1, 64)+ReLU for both nets (VPU broadcast multiply):
        #   h[r, j, l] = relu(x[r, l] * w1[j] + b1[j]); hidden j on sublanes, batch l on lanes.
        h = jnp.maximum(x[:, None, :] * w1b[None, :, :] + b1b[None, :, :], 0.0)  # (R, HID2, 128)

        # Fused second Linear(64 -> 1) for both nets on the MXU:
        #   batched (NCH, HID2) @ (HID2, 128) matmul per sublane-row r; the contraction
        #   axis (hidden) already sits on LHS lanes / RHS sublanes, so no relayout.
        w2b = jnp.broadcast_to(w2[None, :, :], (tile_r, NCH, HID2))
        st = jnp.einsum('rch,rhl->rcl', w2b, h,
                        preferred_element_type=jnp.float32)   # (R, NCH, 128)

        scale = jnp.tanh(st[:, 0, :] + sb2_ref[f])    # (R, 128), lane-dense -> EUP friendly
        trans = st[:, 1, :] + tb2_ref[f]              # (R, 128)
        x = x * jnp.exp(scale) + trans                # affine coupling update
        ldj = ldj + scale

    x_out_ref[...] = x                                # unmasked lane-dense stores
    ldj_ref[...] = ldj


def pack_params(params):
    """Repack per-flow weights into the fused kernel layout (wrapper-side, once)."""
    f = params["sW1"].shape[0]
    w1 = jnp.concatenate([params["sW1"].reshape(f, HID),
                          params["tW1"].reshape(f, HID)], axis=1)        # (F, HID2)
    b1 = jnp.concatenate([params["sb1"].reshape(f, HID),
                          params["tb1"].reshape(f, HID)], axis=1)        # (F, HID2)
    # Lane-replicated so the kernel never does per-flow (128,1)->(128,128) broadcasts.
    w1b = jnp.broadcast_to(w1[:, :, None], (f, HID2, LANES)).astype(jnp.float32)
    b1b = jnp.broadcast_to(b1[:, :, None], (f, HID2, LANES)).astype(jnp.float32)
    # Fused layer-2 weight, channel-padded to NCH=8 rows (clean MXU LHS):
    #   row 0 contracts only the scale hidden units, row 1 only the translate hidden units.
    w2 = jnp.zeros((f, NCH, HID2), jnp.float32)
    w2 = w2.at[:, 0, :HID].set(params["sW2"].reshape(f, HID))
    w2 = w2.at[:, 1, HID:].set(params["tW2"].reshape(f, HID))
    sb2 = params["sb2"].reshape(f).astype(jnp.float32)
    tb2 = params["tb2"].reshape(f).astype(jnp.float32)
    return w1b, b1b, w2, sb2, tb2


def _round_up(a, b):
    return ((a + b - 1) // b) * b


def _resident_spec(shape):
    zeros = (0,) * len(shape)
    return pl.BlockSpec(shape, lambda i: zeros)


def normalizing_flow_forward(x, params, *, tile_rows=32):
    """x: (N, 1) f32. Returns (x_out, log_det_jacobians), each (N, 1)."""
    n = x.shape[0]
    w1b, b1b, w2c, sb2, tb2 = pack_params(params)
    num_flows = w1b.shape[0]

    # Lane-dense batch layout: batch on lanes, padded to whole (tile_rows, 128) tiles.
    rows_needed = _round_up(max(pl.cdiv(n, LANES), 1), 8)
    tile_rows = max(8, min(_round_up(tile_rows, 8), rows_needed))
    # Prefer >= 2 grid steps so dimension_semantics=("parallel",) can shard the batch
    # across both TensorCores on v7x (only possible once batch spans > 8 sublane-rows).
    if rows_needed >= 16 and rows_needed // tile_rows < 2:
        tile_rows = max(8, _round_up(rows_needed // 2, 8))
    rows = _round_up(rows_needed, tile_rows)
    n_pad = rows * LANES

    xf = jnp.pad(x.reshape(-1).astype(jnp.float32), (0, n_pad - n))
    xg = xf.reshape(rows, LANES)

    grid = (rows // tile_rows,)
    tile_spec = lambda: pl.BlockSpec((tile_rows, LANES), lambda i: (i, 0))
    smem_spec = pl.BlockSpec(memory_space=pltpu.MemorySpace.SMEM)

    flops = int(n_pad) * num_flows * (3 * HID2 + 2 * NCH * HID2 + 8)
    transcendentals = int(n_pad) * num_flows * 2      # tanh + exp per flow per element
    bytes_accessed = int(3 * xg.size * 4
                         + (w1b.size + b1b.size + w2c.size + sb2.size + tb2.size) * 4)
    cost = pl.CostEstimate(flops=flops, transcendentals=transcendentals,
                           bytes_accessed=bytes_accessed)

    x_out, ldj = pl.pallas_call(
        nf_forward_kernel,
        out_shape=(jax.ShapeDtypeStruct((rows, LANES), jnp.float32),
                   jax.ShapeDtypeStruct((rows, LANES), jnp.float32)),
        grid=grid,
        in_specs=[
            tile_spec(),                                # x (batch-tiled, lane-dense)
            _resident_spec((num_flows, HID2, LANES)),   # fused W1 (lane-replicated)
            _resident_spec((num_flows, HID2, LANES)),   # fused b1 (lane-replicated)
            _resident_spec((num_flows, NCH, HID2)),     # fused W2 (MXU LHS layout)
            smem_spec,                                  # sb2 scalars
            smem_spec,                                  # tb2 scalars
        ],
        out_specs=(tile_spec(), tile_spec()),
        compiler_params=pltpu.CompilerParams(
            dimension_semantics=("parallel",),          # shard batch tiles across TCs (v7x)
            vmem_limit_bytes=32 * 1024 * 1024,          # raise v5e's 16 MiB scoped default
        ),
        cost_estimate=cost,
    )(xg, w1b, b1b, w2c, sb2, tb2)

    x_out = x_out.reshape(-1)[:n].reshape(n, 1)
    ldj = ldj.reshape(-1)[:n].reshape(n, 1)
    return x_out, ldj


def init_params(key, num_flows):
    """Deterministic synthetic initialization of the per-flow coupling-layer weights."""
    ks = jax.random.split(key, 8)
    scale = 0.3
    return {
        "sW1": scale * jax.random.normal(ks[0], (num_flows, 1, HID), jnp.float32),
        "sb1": scale * jax.random.normal(ks[1], (num_flows, 1, HID), jnp.float32),
        "sW2": scale * jax.random.normal(ks[2], (num_flows, HID, 1), jnp.float32),
        "sb2": scale * jax.random.normal(ks[3], (num_flows, 1, 1), jnp.float32),
        "tW1": scale * jax.random.normal(ks[4], (num_flows, 1, HID), jnp.float32),
        "tb1": scale * jax.random.normal(ks[5], (num_flows, 1, HID), jnp.float32),
        "tW2": scale * jax.random.normal(ks[6], (num_flows, HID, 1), jnp.float32),
        "tb2": scale * jax.random.normal(ks[7], (num_flows, 1, 1), jnp.float32),
    }


def reference_forward(x, params):
    """Pure-JAX reference mirroring the PyTorch NormalizingFlow.forward."""
    ldj = jnp.zeros_like(x)
    num_flows = params["sW1"].shape[0]
    for f in range(num_flows):
        h_s = jnp.maximum(x @ params["sW1"][f] + params["sb1"][f], 0.0)
        scale = jnp.tanh(h_s @ params["sW2"][f] + params["sb2"][f])
        h_t = jnp.maximum(x @ params["tW1"][f] + params["tb1"][f], 0.0)
        trans = h_t @ params["tW2"][f] + params["tb2"][f]
        x = x * jnp.exp(scale) + trans
        ldj = ldj + scale
    return x, ldj


# TODO(synk): inverse() / log_prob() / sample() (torch.distributions base dist) are not
# kernelized; only the forward pass (x -> z, log|det J|) is implemented here.

if __name__ == "__main__":
    key = jax.random.PRNGKey(0)
    k_x, k_p = jax.random.split(key)

    num_flows = 3
    batch = 200  # not a multiple of 128 -> exercises the lane-dense padding path
    x = jax.random.normal(k_x, (batch, 1), jnp.float32)
    params = init_params(k_p, num_flows)

    x_out, ldj = normalizing_flow_forward(x, params)
    jax.block_until_ready((x_out, ldj))

    x_ref, ldj_ref = reference_forward(x, params)
    assert x_out.shape == (batch, 1) and ldj.shape == (batch, 1)
    assert jnp.allclose(x_out, x_ref, atol=1e-4, rtol=1e-4)
    assert jnp.allclose(ldj, ldj_ref, atol=1e-4, rtol=1e-4)

    print("KERNEL_OK")
</pallas_src>

<mosaic_0001>
module attributes {stable_mosaic.version = 11 : i64} {
  func.func @nf_forward_kernel(%arg0: i32, %arg1: memref<8x128xf32, #tpu.memory_space<vmem>>, %arg2: memref<3x128x128xf32, #tpu.memory_space<vmem>>, %arg3: memref<3x128x128xf32, #tpu.memory_space<vmem>>, %arg4: memref<3x8x128xf32, #tpu.memory_space<vmem>>, %arg5: memref<3xf32, #tpu.memory_space<smem>>, %arg6: memref<3xf32, #tpu.memory_space<smem>>, %arg7: memref<8x128xf32, #tpu.memory_space<vmem>>, %arg8: memref<8x128xf32, #tpu.memory_space<vmem>>) attributes {dimension_semantics = [#tpu.dimension_semantics<parallel>], iteration_bounds = array<i64: 1>, scalar_prefetch = 0 : i64, scratch_operands = 0 : i64, tpu.core_type = #tpu.core_type<tc>, window_params = [{transform_indices = @transform_0, window_bounds = array<i64: 8, 128>}, {pipeline_mode = #tpu.pipeline_mode<synchronous>, transform_indices = @transform_1, window_bounds = array<i64: 3, 128, 128>}, {pipeline_mode = #tpu.pipeline_mode<synchronous>, transform_indices = @transform_2, window_bounds = array<i64: 3, 128, 128>}, {pipeline_mode = #tpu.pipeline_mode<synchronous>, transform_indices = @transform_3, window_bounds = array<i64: 3, 8, 128>}, {transform_indices = @transform_4, window_bounds = array<i64: 3>}, {transform_indices = @transform_5, window_bounds = array<i64: 3>}, {transform_indices = @transform_6, window_bounds = array<i64: 8, 128>}, {transform_indices = @transform_7, window_bounds = array<i64: 8, 128>}]} {
    %c0 = arith.constant 0 : index
    %c0_0 = arith.constant 0 : index
    %0 = vector.load %arg1[%c0, %c0_0] : memref<8x128xf32, #tpu.memory_space<vmem>>, vector<8x128xf32>
    %cst = arith.constant 0.000000e+00 : f32
    %1 = vector.broadcast %cst : f32 to vector<8x128xf32>
    %c0_1 = arith.constant 0 : index
    %c0_2 = arith.constant 0 : index
    %c0_3 = arith.constant 0 : index
    %2 = vector.load %arg2[%c0_1, %c0_2, %c0_3] : memref<3x128x128xf32, #tpu.memory_space<vmem>>, vector<1x128x128xf32>
    %3 = vector.shape_cast %2 : vector<1x128x128xf32> to vector<128x128xf32>
    %c0_4 = arith.constant 0 : index
    %c0_5 = arith.constant 0 : index
    %c0_6 = arith.constant 0 : index
    %4 = vector.load %arg3[%c0_4, %c0_5, %c0_6] : memref<3x128x128xf32, #tpu.memory_space<vmem>>, vector<1x128x128xf32>
    %5 = vector.shape_cast %4 : vector<1x128x128xf32> to vector<128x128xf32>
    %c0_7 = arith.constant 0 : index
    %c0_8 = arith.constant 0 : index
    %c0_9 = arith.constant 0 : index
    %6 = vector.load %arg4[%c0_7, %c0_8, %c0_9] : memref<3x8x128xf32, #tpu.memory_space<vmem>>, vector<1x8x128xf32>
    %7 = vector.shape_cast %6 : vector<1x8x128xf32> to vector<8x128xf32>
    %8 = vector.shape_cast %0 : vector<8x128xf32> to vector<8x1x128xf32>
    %9 = vector.shape_cast %3 : vector<128x128xf32> to vector<1x128x128xf32>
    %10 = vector.broadcast %8 : vector<8x1x128xf32> to vector<8x128x128xf32>
    %11 = vector.broadcast %9 : vector<1x128x128xf32> to vector<8x128x128xf32>
    %12 = arith.mulf %10, %11 : vector<8x128x128xf32>
    %13 = vector.shape_cast %5 : vector<128x128xf32> to vector<1x128x128xf32>
    %14 = vector.broadcast %13 : vector<1x128x128xf32> to vector<8x128x128xf32>
    %15 = arith.addf %12, %14 : vector<8x128x128xf32>
    %cst_10 = arith.constant 0.000000e+00 : f32
    %16 = vector.broadcast %cst_10 : f32 to vector<8x128x128xf32>
    %17 = arith.maximumf %15, %16 : vector<8x128x128xf32>
    %18 = vector.shape_cast %7 : vector<8x128xf32> to vector<1x8x128xf32>
    %19 = vector.shape_cast %18 : vector<1x8x128xf32> to vector<1x8x128xf32>
    %20 = vector.broadcast %19 : vector<1x8x128xf32> to vector<8x8x128xf32>
    "tpu.trace_start"() <{level = 10 : i32, message = "rch,rhl->rcl"}> : () -> ()
    %cst_11 = arith.constant dense<0.000000e+00> : vector<8x8x128xf32>
    %21 = tpu.matmul %20, %17, %cst_11 {dimension_numbers = #tpu.dot_dimension_numbers<[2], [1], [1], [2], [0, 0, 0, 1, 1, 2], [0], [0]>} : vector<8x8x128xf32>, vector<8x128x128xf32>, vector<8x8x128xf32> -> vector<8x8x128xf32>
    "tpu.trace_stop"() : () -> ()
    %22 = vector.extract_strided_slice %21 {offsets = [0, 0, 0], sizes = [8, 1, 128], strides = [1, 1, 1]} : vector<8x8x128xf32> to vector<8x1x128xf32>
    %23 = vector.shape_cast %22 : vector<8x1x128xf32> to vector<8x128xf32>
    %c0_12 = arith.constant 0 : index
    %24 = memref.load %arg5[%c0_12] : memref<3xf32, #tpu.memory_space<smem>>
    %25 = vector.broadcast %24 : f32 to vector<8x128xf32>
    %26 = arith.addf %23, %25 : vector<8x128xf32>
    %27 = math.tanh %26 : vector<8x128xf32>
    %28 = vector.extract_strided_slice %21 {offsets = [0, 1, 0], sizes = [8, 1, 128], strides = [1, 1, 1]} : vector<8x8x128xf32> to vector<8x1x128xf32>
    %29 = vector.shape_cast %28 : vector<8x1x128xf32> to vector<8x128xf32>
    %c0_13 = arith.constant 0 : index
    %30 = memref.load %arg6[%c0_13] : memref<3xf32, #tpu.memory_space<smem>>
    %31 = vector.broadcast %30 : f32 to vector<8x128xf32>
    %32 = arith.addf %29, %31 : vector<8x128xf32>
    %33 = math.exp %27 : vector<8x128xf32>
    %34 = arith.mulf %0, %33 : vector<8x128xf32>
    %35 = arith.addf %34, %32 : vector<8x128xf32>
    %36 = arith.addf %1, %27 : vector<8x128xf32>
    %c1 = arith.constant 1 : index
    %c0_14 = arith.constant 0 : index
    %c0_15 = arith.constant 0 : index
    %37 = vector.load %arg2[%c1, %c0_14, %c0_15] : memref<3x128x128xf32, #tpu.memory_space<vmem>>, vector<1x128x128xf32>
    %38 = vector.shape_cast %37 : vector<1x128x128xf32> to vector<128x128xf32>
    %c1_16 = arith.constant 1 : index
    %c0_17 = arith.constant 0 : index
    %c0_18 = arith.constant 0 : index
    %39 = vector.load %arg3[%c1_16, %c0_17, %c0_18] : memref<3x128x128xf32, #tpu.memory_space<vmem>>, vector<1x128x128xf32>
    %40 = vector.shape_cast %39 : vector<1x128x128xf32> to vector<128x128xf32>
    %c1_19 = arith.constant 1 : index
    %c0_20 = arith.constant 0 : index
    %c0_21 = arith.constant 0 : index
    %41 = vector.load %arg4[%c1_19, %c0_20, %c0_21] : memref<3x8x128xf32, #tpu.memory_space<vmem>>, vector<1x8x128xf32>
    %42 = vector.shape_cast %41 : vector<1x8x128xf32> to vector<8x128xf32>
    %43 = vector.shape_cast %35 : vector<8x128xf32> to vector<8x1x128xf32>
    %44 = vector.shape_cast %38 : vector<128x128xf32> to vector<1x128x128xf32>
    %45 = vector.broadcast %43 : vector<8x1x128xf32> to vector<8x128x128xf32>
    %46 = vector.broadcast %44 : vector<1x128x128xf32> to vector<8x128x128xf32>
    %47 = arith.mulf %45, %46 : vector<8x128x128xf32>
    %48 = vector.shape_cast %40 : vector<128x128xf32> to vector<1x128x128xf32>
    %49 = vector.broadcast %48 : vector<1x128x128xf32> to vector<8x128x128xf32>
    %50 = arith.addf %47, %49 : vector<8x128x128xf32>
    %cst_22 = arith.constant 0.000000e+00 : f32
    %51 = vector.broadcast %cst_22 : f32 to vector<8x128x128xf32>
    %52 = arith.maximumf %50, %51 : vector<8x128x128xf32>
    %53 = vector.shape_cast %42 : vector<8x128xf32> to vector<1x8x128xf32>
    %54 = vector.shape_cast %53 : vector<1x8x128xf32> to vector<1x8x128xf32>
    %55 = vector.broadcast %54 : vector<1x8x128xf32> to vector<8x8x128xf32>
    "tpu.trace_start"() <{level = 10 : i32, message = "rch,rhl->rcl"}> : () -> ()
    %cst_23 = arith.constant dense<0.000000e+00> : vector<8x8x128xf32>
    %56 = tpu.matmul %55, %52, %cst_23 {dimension_numbers = #tpu.dot_dimension_numbers<[2], [1], [1], [2], [0, 0, 0, 1, 1, 2], [0], [0]>} : vector<8x8x128xf32>, vector<8x128x128xf32>, vector<8x8x128xf32> -> vector<8x8x128xf32>
    "tpu.trace_stop"() : () -> ()
    %57 = vector.extract_strided_slice %56 {offsets = [0, 0, 0], sizes = [8, 1, 128], strides = [1, 1, 1]} : vector<8x8x128xf32> to vector<8x1x128xf32>
    %58 = vector.shape_cast %57 : vector<8x1x128xf32> to vector<8x128xf32>
    %c1_24 = arith.constant 1 : index
    %59 = memref.load %arg5[%c1_24] : memref<3xf32, #tpu.memory_space<smem>>
    %60 = vector.broadcast %59 : f32 to vector<8x128xf32>
    %61 = arith.addf %58, %60 : vector<8x128xf32>
    %62 = math.tanh %61 : vector<8x128xf32>
    %63 = vector.extract_strided_slice %56 {offsets = [0, 1, 0], sizes = [8, 1, 128], strides = [1, 1, 1]} : vector<8x8x128xf32> to vector<8x1x128xf32>
    %64 = vector.shape_cast %63 : vector<8x1x128xf32> to vector<8x128xf32>
    %c1_25 = arith.constant 1 : index
    %65 = memref.load %arg6[%c1_25] : memref<3xf32, #tpu.memory_space<smem>>
    %66 = vector.broadcast %65 : f32 to vector<8x128xf32>
    %67 = arith.addf %64, %66 : vector<8x128xf32>
    %68 = math.exp %62 : vector<8x128xf32>
    %69 = arith.mulf %35, %68 : vector<8x128xf32>
    %70 = arith.addf %69, %67 : vector<8x128xf32>
    %71 = arith.addf %36, %62 : vector<8x128xf32>
    %c2 = arith.constant 2 : index
    %c0_26 = arith.constant 0 : index
    %c0_27 = arith.constant 0 : index
    %72 = vector.load %arg2[%c2, %c0_26, %c0_27] : memref<3x128x128xf32, #tpu.memory_space<vmem>>, vector<1x128x128xf32>
    %73 = vector.shape_cast %72 : vector<1x128x128xf32> to vector<128x128xf32>
    %c2_28 = arith.constant 2 : index
    %c0_29 = arith.constant 0 : index
    %c0_30 = arith.constant 0 : index
    %74 = vector.load %arg3[%c2_28, %c0_29, %c0_30] : memref<3x128x128xf32, #tpu.memory_space<vmem>>, vector<1x128x128xf32>
    %75 = vector.shape_cast %74 : vector<1x128x128xf32> to vector<128x128xf32>
    %c2_31 = arith.constant 2 : index
    %c0_32 = arith.constant 0 : index
    %c0_33 = arith.constant 0 : index
    %76 = vector.load %arg4[%c2_31, %c0_32, %c0_33] : memref<3x8x128xf32, #tpu.memory_space<vmem>>, vector<1x8x128xf32>
    %77 = vector.shape_cast %76 : vector<1x8x128xf32> to vector<8x128xf32>
    %78 = vector.shape_cast %70 : vector<8x128xf32> to vector<8x1x128xf32>
    %79 = vector.shape_cast %73 : vector<128x128xf32> to vector<1x128x128xf32>
    %80 = vector.broadcast %78 : vector<8x1x128xf32> to vector<8x128x128xf32>
    %81 = vector.broadcast %79 : vector<1x128x128xf32> to vector<8x128x128xf32>
    %82 = arith.mulf %80, %81 : vector<8x128x128xf32>
    %83 = vector.shape_cast %75 : vector<128x128xf32> to vector<1x128x128xf32>
    %84 = vector.broadcast %83 : vector<1x128x128xf32> to vector<8x128x128xf32>
    %85 = arith.addf %82, %84 : vector<8x128x128xf32>
    %cst_34 = arith.constant 0.000000e+00 : f32
    %86 = vector.broadcast %cst_34 : f32 to vector<8x128x128xf32>
    %87 = arith.maximumf %85, %86 : vector<8x128x128xf32>
    %88 = vector.shape_cast %77 : vector<8x128xf32> to vector<1x8x128xf32>
    %89 = vector.shape_cast %88 : vector<1x8x128xf32> to vector<1x8x128xf32>
    %90 = vector.broadcast %89 : vector<1x8x128xf32> to vector<8x8x128xf32>
    "tpu.trace_start"() <{level = 10 : i32, message = "rch,rhl->rcl"}> : () -> ()
    %cst_35 = arith.constant dense<0.000000e+00> : vector<8x8x128xf32>
    %91 = tpu.matmul %90, %87, %cst_35 {dimension_numbers = #tpu.dot_dimension_numbers<[2], [1], [1], [2], [0, 0, 0, 1, 1, 2], [0], [0]>} : vector<8x8x128xf32>, vector<8x128x128xf32>, vector<8x8x128xf32> -> vector<8x8x128xf32>
    "tpu.trace_stop"() : () -> ()
    %92 = vector.extract_strided_slice %91 {offsets = [0, 0, 0], sizes = [8, 1, 128], strides = [1, 1, 1]} : vector<8x8x128xf32> to vector<8x1x128xf32>
    %93 = vector.shape_cast %92 : vector<8x1x128xf32> to vector<8x128xf32>
    %c2_36 = arith.constant 2 : index
    %94 = memref.load %arg5[%c2_36] : memref<3xf32, #tpu.memory_space<smem>>
    %95 = vector.broadcast %94 : f32 to vector<8x128xf32>
    %96 = arith.addf %93, %95 : vector<8x128xf32>
    %97 = math.tanh %96 : vector<8x128xf32>
    %98 = vector.extract_strided_slice %91 {offsets = [0, 1, 0], sizes = [8, 1, 128], strides = [1, 1, 1]} : vector<8x8x128xf32> to vector<8x1x128xf32>
    %99 = vector.shape_cast %98 : vector<8x1x128xf32> to vector<8x128xf32>
    %c2_37 = arith.constant 2 : index
    %100 = memref.load %arg6[%c2_37] : memref<3xf32, #tpu.memory_space<smem>>
    %101 = vector.broadcast %100 : f32 to vector<8x128xf32>
    %102 = arith.addf %99, %101 : vector<8x128xf32>
    %103 = math.exp %97 : vector<8x128xf32>
    %104 = arith.mulf %70, %103 : vector<8x128xf32>
    %105 = arith.addf %104, %102 : vector<8x128xf32>
    %106 = arith.addf %71, %97 : vector<8x128xf32>
    %c0_38 = arith.constant 0 : index
    %c0_39 = arith.constant 0 : index
    %107 = vector.load %arg7[%c0_38, %c0_39] : memref<8x128xf32, #tpu.memory_space<vmem>>, vector<8x128xf32>
    tpu.vector_store %arg7[%c0_38, %c0_39], %105 {strides = array<i32>} : memref<8x128xf32, #tpu.memory_space<vmem>>, vector<8x128xf32>,
    %c0_40 = arith.constant 0 : index
    %c0_41 = arith.constant 0 : index
    %108 = vector.load %arg8[%c0_40, %c0_41] : memref<8x128xf32, #tpu.memory_space<vmem>>, vector<8x128xf32>
    tpu.vector_store %arg8[%c0_40, %c0_41], %106 {strides = array<i32>} : memref<8x128xf32, #tpu.memory_space<vmem>>, vector<8x128xf32>,
    return
  }
  func.func @transform_0(%arg0: i32) -> (i32, i32) {
    %c0_i32 = arith.constant 0 : i32
    %c0_i32_0 = arith.constant 0 : i32
    return %arg0, %c0_i32 : i32, i32
  }
  func.func @transform_1(%arg0: i32) -> (i32, i32, i32) {
    %c0_i32 = arith.constant 0 : i32
    %c0_i32_0 = arith.constant 0 : i32
    %c0_i32_1 = arith.constant 0 : i32
    %c0_i32_2 = arith.constant 0 : i32
    return %c0_i32, %c0_i32_0, %c0_i32_1 : i32, i32, i32
  }
  func.func @transform_2(%arg0: i32) -> (i32, i32, i32) {
    %c0_i32 = arith.constant 0 : i32
    %c0_i32_0 = arith.constant 0 : i32
    %c0_i32_1 = arith.constant 0 : i32
    %c0_i32_2 = arith.constant 0 : i32
    return %c0_i32, %c0_i32_0, %c0_i32_1 : i32, i32, i32
  }
  func.func @transform_3(%arg0: i32) -> (i32, i32, i32) {
    %c0_i32 = arith.constant 0 : i32
    %c0_i32_0 = arith.constant 0 : i32
    %c0_i32_1 = arith.constant 0 : i32
    %c0_i32_2 = arith.constant 0 : i32
    return %c0_i32, %c0_i32_0, %c0_i32_1 : i32, i32, i32
  }
  func.func @transform_4(%arg0: i32) -> i32 {
    %c0_i32 = arith.constant 0 : i32
    %c0_i32_0 = arith.constant 0 : i32
    return %c0_i32 : i32
  }
  func.func @transform_5(%arg0: i32) -> i32 {
    %c0_i32 = arith.constant 0 : i32
    %c0_i32_0 = arith.constant 0 : i32
    return %c0_i32 : i32
  }
  func.func @transform_6(%arg0: i32) -> (i32, i32) {
    %c0_i32 = arith.constant 0 : i32
    %c0_i32_0 = arith.constant 0 : i32
    return %arg0, %c0_i32 : i32, i32
  }
  func.func @transform_7(%arg0: i32) -> (i32, i32) {
    %c0_i32 = arith.constant 0 : i32
    %c0_i32_0 = arith.constant 0 : i32
    return %arg0, %c0_i32 : i32, i32
  }
}

</mosaic_0001>

<bundles_post_ra>
// kernel: tpu_custom_call.1
= control target key start
LH: loop header
LB: loop body
LE: loop exit
PB: predicated region body
PF: predicated region fallthrough
CT: control target
= control target key end

     0   :  { %13 = vsyncpa [#allocation3], 0  ;;  %s7336_s0 = inlined_call_operand.hbm [shape: f32[8,128], index: 0, kind: input, shape index: {}]   ;;  %s7337_s1 = inlined_call_operand.hbm [shape: f32[3,128,128], index: 1, kind: input, shape index: {}]   ;;  %s7338_s2 = inlined_call_operand.hbm [shape: f32[3,128,128], index: 2, kind: input, shape index: {}]   ;;  %s7339_s3 = inlined_call_operand.hbm [shape: f32[3,8,128], index: 3, kind: input, shape index: {}]   ;;  %s7340_s4 = inlined_call_operand.vmem [shape: f32[3], index: 4, kind: input, shape index: {}]   ;;  %s7341_s5 = inlined_call_operand.vmem [shape: f32[3], index: 5, kind: input, shape index: {}]   ;;  %s7342_s6 = inlined_call_operand.hbm [shape: f32[8,128], index: 6, kind: output, shape index: {0}]   ;;  %s7343_s7 = inlined_call_operand.hbm [shape: f32[8,128], index: 7, kind: output, shape index: {1}]  }
   0x1   :  { %14 = vsyncpa [#allocation7], 0 }
   0x2   :  { %15 = vsyncpa [#allocation10], 0 }
   0x3   :  { %16 = vsyncpa [#allocation5], 0 }
   0x4   :  { %17 = vsyncpa [#allocation13], 0 }
   0x5   :  { %18 = vsyncpa [#allocation4], 0 }
   0x6   :  { %19 = vsyncpa [#allocation16], 0  ;;  %s5295_s24 = smov [#allocation6]  }
   0x7   :  { %s35_s25 = sshll.u32 %s5295_s24, 4  ;;  %s36_s25 = int_to_ptr.vmem [resolvable:$true] %s35_s25 }
   0x8   :  { %s5145_s26 = scalar_lea.vmem %s36_s25, 6144  ;;  %p5150_p1 = scmp.lt.s32.totalorder %s36_s25, %s36_s25 }
   0x9   :  { %p5146_p0 = scmp.ne.s32.totalorder %s36_s25, %s5145_s26  ;;  %p5151_p2 = scmp.lt.s32.totalorder %s5145_s26, %s5145_s26 }
   0xb   :  { %p5152_p3 = por %p5151_p2, %p5150_p1 }
   0xd   :  { %p5153_p4 = pnand %p5152_p3, %p5146_p0 }
   0xf   :  { %5156 = shalt.err (!%p5153_p4)
}
  0x10   :  { %s5296_s27 = smov 128   ;;  %s5297_s28 = smov 8  }
  0x11   :  { %41 = dma.hbm_to_vmem [thread:$0]  %s7337_s1, 6144, %s36_s25, [#allocation7], %s5296_s27, %s5296_s27, %s5297_s28  }
  0x12   :  { %s5298_s8 = smov [#allocation2]   ;;  %s5299_s10 = smov [#allocation8]  }
  0x13   :  { %s26_s9 = sshll.u32 %s5298_s8, 4  ;;  %s47_s11 = sshll.u32 %s5299_s10, 4  ;;  %s27_s9 = int_to_ptr.vmem [resolvable:$true] %s26_s9  ;;  %s48_s11 = int_to_ptr.vmem [resolvable:$true] %s47_s11 }
  0x14   :  { %s5165_s12 = scalar_lea.vmem %s27_s9, 128  ;;  %p5170_p6 = scmp.lt.s32.totalorder %s27_s9, %s27_s9 }
  0x15   :  { %p5166_p5 = scmp.ne.s32.totalorder %s27_s9, %s5165_s12  ;;  %p5171_p7 = scmp.lt.s32.totalorder %s5165_s12, %s5165_s12 }
  0x17   :  { %p5172_p8 = por %p5171_p7, %p5170_p6 }
  0x19   :  { %p5173_p9 = pnand %p5172_p8, %p5166_p5 }
  0x1b   :  { %5176 = shalt.err (!%p5173_p9)
}
  0x1c   :  { %29 = dma.hbm_to_vmem [thread:$0]  %s7336_s0, 128, %s27_s9, [#allocation3]  }
  0x1d   :  { %s5185_s15 = scalar_lea.vmem %s48_s11, 6144  ;;  %p5190_p11 = scmp.lt.s32.totalorder %s48_s11, %s48_s11 }
  0x1e   :  { %p5186_p10 = scmp.ne.s32.totalorder %s48_s11, %s5185_s15  ;;  %p5191_p12 = scmp.lt.s32.totalorder %s5185_s15, %s5185_s15 }
  0x20   :  { %p5192_p13 = por %p5191_p12, %p5190_p11 }
  0x22   :  { %p5193_p0 = pnand %p5192_p13, %p5186_p10 }
  0x24   :  { %5196 = shalt.err (!%p5193_p0)
}
  0x25   :  { %53 = dma.hbm_to_vmem [thread:$0]  %s7338_s2, 6144, %s48_s11, [#allocation7], %s5296_s27, %s5296_s27, %s5297_s28  }
  0x26   :  { %s5300_s17 = smov [#allocation9]   ;;  %s72_s0 = sshll.u32 %s7340_s4, 4  ;;  %s73_s0 = int_to_ptr.vmem [resolvable:$true] %s72_s0 }
  0x27   :  { %s59_s18 = sshll.u32 %s5300_s17, 4  ;;  %s60_s18 = int_to_ptr.vmem [resolvable:$true] %s59_s18 }
  0x28   :  { %s5205_s21 = scalar_lea.vmem %s60_s18, 384  ;;  %p5210_p2 = scmp.lt.s32.totalorder %s60_s18, %s60_s18 }
  0x29   :  { %p5206_p1 = scmp.ne.s32.totalorder %s60_s18, %s5205_s21  ;;  %p5211_p3 = scmp.lt.s32.totalorder %s5205_s21, %s5205_s21 }
  0x2b   :  { %p5212_p4 = por %p5211_p3, %p5210_p2 }
  0x2d   :  { %p5213_p5 = pnand %p5212_p4, %p5206_p1 }
  0x2f   :  { %5216 = shalt.err (!%p5213_p5)
}
  0x30   :  { %65 = dma.hbm_to_vmem [thread:$0]  %s7339_s3, 384, %s60_s18, [#allocation10], %s5296_s27, %s5296_s27, %s5297_s28  }
  0x31   :  { %s82_s4 = sshll.u32 %s7341_s5, 4  ;;  %s5217_s25 = scalar_lea.vmem %s73_s0, 16  ;;  %s83_s4 = int_to_ptr.vmem [resolvable:$true] %s82_s4 }
  0x32   :  { %p5218_p6 = scmp.ne.s32.totalorder %s73_s0, %s5217_s25  ;;  %p5222_p7 = scmp.lt.s32.totalorder %s73_s0, %s73_s0 }
  0x33   :  { %p5223_p8 = scmp.lt.s32.totalorder %s5217_s25, %s5217_s25 }
  0x35   :  { %p5224_p9 = por %p5223_p8, %p5222_p7 }
  0x37   :  { %p5225_p10 = pnand %p5224_p9, %p5218_p6 }
  0x39   :  { %5228 = shalt.err (!%p5225_p10)
}
  0x3a   :  { %s5301_s26 = smov [#allocation11]   ;;  %s5229_s29 = scalar_lea.vmem %s83_s4, 16 }
  0x3b   :  { %75 = dma.vmem_to_smem %s73_s0, 16, %s5301_s26, [#allocation5]  }
  0x3c   :  { %p5230_p11 = scmp.ne.s32.totalorder %s83_s4, %s5229_s29  ;;  %p5234_p12 = scmp.lt.s32.totalorder %s83_s4, %s83_s4 }
  0x3d   :  { %p5235_p13 = scmp.lt.s32.totalorder %s5229_s29, %s5229_s29 }
  0x3f   :  { %p5236_p0 = por %p5235_p13, %p5234_p12 }
  0x41   :  { %p5237_p1 = pnand %p5236_p0, %p5230_p11 }
  0x43   :  { %5240 = shalt.err (!%p5237_p1)
}
  0x44   :  { %s5302_s3 = smov [#allocation12]  }
  0x45   :  { %85 = dma.vmem_to_smem %s83_s4, 16, %s5302_s3, [#allocation13]  }
  0x46   :  { %5281 = dma.done.wait [#allocation3], 128  }
  0x47   :  { %5282 = vsyncadd [#allocation3], 4294967168 }
  0x48   :  { %5283 = dma.done.wait [#allocation7], 12288  }
  0x49   :  { %5284 = vsyncadd [#allocation7], 4294955008 }
  0x4a   :  { %5285 = dma.done.wait [#allocation10], 384  }
  0x4b   :  { %5286 = vsyncadd [#allocation10], 4294966912 }
  0x4c   :  { %5287 = dma.done.wait [#allocation5], 16  }
  0x4d   :  { %5288 = vsyncadd [#allocation5], 4294967280 }
  0x4e   :  { %5289 = dma.done.wait [#allocation13], 16  }
  0x4f   :  { %5290 = vsyncadd [#allocation13], 4294967280 }
  0x50   :  { %104 = sfence }
  0x51   :  { %v144_v0 = vlaneseq  ;;  %v7349_v1 = vmov 0.0   ;;  %v5304_v2 = vmov 1966171168   ;;  %vm5305_vm0 = vmmov 0   ;;  %v5381_v6 = vld [vmem:[#allocation2] sm:$0xff]  ;;  %v5394_v13 = vld [vmem:[#allocation6 + $0x70] sm:$0xff] }
  0x52   :  { %4090 = vmatprep.subr.mxu0 %v7349_v1  ;;  %v142_v3 = vunpack.c.l.s4 %v5304_v2  ;;  %4125 = vmatprep.subr.mxu1 %v7349_v1  ;;  %v5392_v12 = vld [vmem:[#allocation6 + $0x78] sm:$0xff]  ;;  %v5403_v16 = vld [vmem:[#allocation6 + $0x68] sm:$0xff]  ;;  %v5405_v17 = vld [vmem:[#allocation6 + $0x60] sm:$0xff]  ;;  %s1191_s5 = sld [smem:[#allocation12]]  ;;  %vm1226_vm1 = vcmask 1041409   ;;  %vm1229_vm2 = vcmask 1042434  }
  0x53   :  { %v145_v4 = vshrl.u32 %v144_v0, 7  ;;  %4122 = vmatprep.mubr.msk.f32.mxu0 %vm5305_vm0, %v7349_v1  ;;  %4157 = vmatprep.mubr.msk.f32.mxu1 %vm5305_vm0, %v7349_v1  ;;  %v5407_v18 = vld [vmem:[#allocation6 + $0x58] sm:$0xff]  ;;  %v5411_v20 = vld [vmem:[#allocation8 + $0x70] sm:$0xff]  ;;  %v5421_v24 = vld [vmem:[#allocation8 + $0x68] sm:$0xff]  ;;  %vm1232_vm3 = vcmask 1043459   ;;  %vm1235_vm4 = vcmask 1044484  }
  0x54   :  { %v143_v5 = vunpack.c.0.s8 %v142_v3  ;;  %v5409_v19 = vld [vmem:[#allocation8 + $0x78] sm:$0xff]  ;;  %v5423_v25 = vld [vmem:[#allocation8 + $0x60] sm:$0xff]  ;;  %v5425_v26 = vld [vmem:[#allocation6 + $0x50] sm:$0xff]  ;;  %s1173_s27 = sld [smem:[#allocation11]]  ;;  %vm1238_vm5 = vcmask 1045509   ;;  %vm1241_vm6 = vcmask 1046534  }
  0x55   :  { %v5387_v9 = vsub.s32 0, %v145_v4  ;;  %v5439_v34 = vld [vmem:[#allocation8 + $0x58] sm:$0xff]  ;;  %v5449_v43 = vld [vmem:[#allocation8 + $0x50] sm:$0xff]  ;;  %v5451_v44 = vld [vmem:[#allocation6 + $0x48] sm:$0xff]  ;;  %vm1244_vm7 = vcmask 1047559   ;;  %s3678_s28 = sld [smem:[#allocation11 + $0x1]] }
  0x56   :  { %v5383_v7 = vsub.s32 %v143_v5, %v145_v4  ;;  %v5455_v48 = vld [vmem:[#allocation6 + $0x40] sm:$0xff]  ;;  %v5459_v53 = vld [vmem:[#allocation8 + $0x48] sm:$0xff]  ;;  %v5469_v58 = vld [vmem:[#allocation6 + $0x38] sm:$0xff]  ;;  %s3679_s30 = sld [smem:[#allocation12 + $0x1]]  ;;  %s5306_s10 = smov [#allocation15]  }
  0x57   :  { %v5472_v61 = vld [vmem:[#allocation8 + $0x40] sm:$0xff]  ;;  %v5482_v3 = vld [vmem:[#allocation6 + $0x30] sm:$0xff]  ;;  %s3680_s8 = sld [smem:[#allocation11 + $0x2]]  ;;  %s3661_s11 = sshll.u32 %s5306_s10, 4  ;;  %s3662_s11 = int_to_ptr.vmem [resolvable:$true] %s3661_s11 }
  0x58   :  { %v147_v8 = vrot.slane %v5381_v6, %v5383_v7  ;;  %s3681_s9 = sld [smem:[#allocation12 + $0x2]]  ;;  %s5241_s12 = scalar_lea.vmem %s3662_s11, 128 }
  0x59   :  { %p5242_p2 = scmp.ne.s32.totalorder %s3662_s11, %s5241_s12  ;;  %p5246_p3 = scmp.lt.s32.totalorder %s3662_s11, %s3662_s11 }
  0x5a   :  { %v5390_v10 = vrot.slane %v147_v8, %v5383_v7  ;;  %v155_v11 = vcombine.high %v147_v8, %v147_v8  ;;  %p5247_p4 = scmp.lt.s32.totalorder %s5241_s12, %s5241_s12 }
  0x5c   :  { %v5398_v14 = vrot.slane %v5390_v10, %v5387_v9  ;;  %v5401_v15 = vrot.slane %v155_v11, %v5383_v7  ;;  %p5248_p5 = por %p5247_p4, %p5246_p3 }
  0x5e   :  { %v244_v21 = vmul.f32 %v5398_v14, %v5392_v12  ;;  %v243_v22 = vmul.f32 %v5398_v14, %v5394_v13  ;;  %v5419_v23 = vrot.slane %v5401_v15, %v5387_v9  ;;  %v242_v27 = vmul.f32 %v5398_v14, %v5403_v16  ;;  %p5249_p6 = pnand %p5248_p5, %p5242_p2 }
  0x5f   :  { %v241_v28 = vmul.f32 %v5398_v14, %v5405_v17  ;;  %v240_v29 = vmul.f32 %v5398_v14, %v5407_v18  ;;  %v239_v38 = vmul.f32 %v5398_v14, %v5425_v26  ;;  %v238_v56 = vmul.f32 %v5398_v14, %v5451_v44 }
  0x60   :  { %v372_v30 = vadd.f32 %v244_v21, %v5409_v19  ;;  %v371_v31 = vadd.f32 %v243_v22, %v5411_v20  ;;  %v260_v32 = vmul.f32 %v5419_v23, %v5392_v12  ;;  %v259_v33 = vmul.f32 %v5419_v23, %v5394_v13  ;;  %v5487_v21 = vld [vmem:[#allocation6 + $0x28] sm:$0xff] }
  0x61   :  { %v370_v35 = vadd.f32 %v242_v27, %v5421_v24  ;;  %v369_v36 = vadd.f32 %v241_v28, %v5423_v25  ;;  %v258_v37 = vmul.f32 %v5419_v23, %v5403_v16  ;;  %v368_v47 = vadd.f32 %v240_v29, %v5439_v34  ;;  %v5492_v27 = vld [vmem:[#allocation8 + $0x38] sm:$0xff] }
  0x62   :  { %v500_v39 = vmax.f32 %v372_v30, 0.0  ;;  %v499_v40 = vmax.f32 %v371_v31, 0.0  ;;  %v388_v41 = vadd.f32 %v260_v32, %v5409_v19  ;;  %v387_v42 = vadd.f32 %v259_v33, %v5411_v20  ;;  %v5499_v33 = vld [vmem:[#allocation6 + $0x20] sm:$0xff] }
  0x63   :  { %v498_v45 = vmax.f32 %v370_v35, 0.0  ;;  %v386_v46 = vadd.f32 %v258_v37, %v5421_v24  ;;  %v497_v51 = vmax.f32 %v369_v36, 0.0  ;;  %v257_v52 = vmul.f32 %v5419_v23, %v5405_v17  ;;  %v5503_v36 = vld [vmem:[#allocation8 + $0x30] sm:$0xff] }
  0x64   :  { %4091 = vmatpush3.msra.mxu0 %v500_v39  ;;  %v516_v49 = vmax.f32 %v388_v41, 0.0  ;;  %v515_v50 = vmax.f32 %v387_v42, 0.0  ;;  %v367_v54 = vadd.f32 %v239_v38, %v5449_v43  ;;  %v256_v55 = vmul.f32 %v5419_v23, %v5407_v18  ;;  %v5511_v42 = vld [vmem:[#allocation8 + $0x28] sm:$0xff] }
  0x65   :  { %4092 = vmatprep.subr.mxu0 %v7349_v1  ;;  %v255_v57 = vmul.f32 %v5419_v23, %v5425_v26  ;;  %v514_v59 = vmax.f32 %v386_v46, 0.0  ;;  %v385_v60 = vadd.f32 %v257_v52, %v5423_v25  ;;  %v237_v62 = vmul.f32 %v5398_v14, %v5455_v48  ;;  %v5515_v46 = vld [vmem:[#allocation6 + $0x18] sm:$0xff] }
  0x66   :  { %4093 = vmatpush3.msra.mxu0 %v499_v40  ;;  %4126 = vmatpush3.msra.mxu1 %v516_v49  ;;  %v254_v63 = vmul.f32 %v5419_v23, %v5451_v44  ;;  %v384_v0 = vadd.f32 %v256_v55, %v5439_v34  ;;  %v366_v2 = vadd.f32 %v238_v56, %v5459_v53  ;;  %v496_v4 = vmax.f32 %v368_v47, 0.0  ;;  %v5527_v56 = vld [vmem:[#allocation6 + $0x10] sm:$0xff] }
  0x67   :  { %4094 = vmatprep.subr.mxu0 %v7349_v1  ;;  %4127 = vmatprep.subr.mxu1 %v7349_v1  ;;  %v513_v5 = vmax.f32 %v385_v60, 0.0  ;;  %v383_v8 = vadd.f32 %v255_v57, %v5449_v43  ;;  %v236_v11 = vmul.f32 %v5398_v14, %v5469_v58  ;;  %v365_v22 = vadd.f32 %v237_v62, %v5472_v61 }
  0x68   :  { %4095 = vmatpush3.msra.mxu0 %v498_v45  ;;  %4128 = vmatpush3.msra.mxu1 %v515_v50  ;;  %v253_v28 = vmul.f32 %v5419_v23, %v5455_v48  ;;  %v495_v29 = vmax.f32 %v367_v54, 0.0  ;;  %v512_v30 = vmax.f32 %v384_v0, 0.0  ;;  %v382_v31 = vadd.f32 %v254_v63, %v5459_v53  ;;  %v5523_v54 = vld [vmem:[#allocation8 + $0x20] sm:$0xff]  ;;  %v5535_v0 = vld [vmem:[#allocation8 + $0x18] sm:$0xff] }
  0x69   :  { %4096 = vmatprep.subr.mxu0 %v7349_v1  ;;  %4129 = vmatprep.subr.mxu1 %v7349_v1  ;;  %v235_v32 = vmul.f32 %v5398_v14, %v5482_v3  ;;  %v494_v35 = vmax.f32 %v366_v2, 0.0  ;;  %v252_v37 = vmul.f32 %v5419_v23, %v5469_v58  ;;  %v234_v38 = vmul.f32 %v5398_v14, %v5487_v21 }
  0x6a   :  { %4097 = vmatpush3.msra.mxu0 %v497_v51  ;;  %4130 = vmatpush3.msra.mxu1 %v514_v59  ;;  %v511_v39 = vmax.f32 %v383_v8, 0.0  ;;  %v364_v40 = vadd.f32 %v236_v11, %v5492_v27  ;;  %v381_v41 = vadd.f32 %v253_v28, %v5472_v61  ;;  %v251_v45 = vmul.f32 %v5419_v23, %v5482_v3  ;;  %v5546_v11 = vld [vmem:[#allocation6 + $0x8] sm:$0xff] }
  0x6b   :  { %4098 = vmatprep.subr.mxu0 %v7349_v1  ;;  %4131 = vmatprep.subr.mxu1 %v7349_v1  ;;  %v493_v47 = vmax.f32 %v365_v22, 0.0  ;;  %v233_v49 = vmul.f32 %v5398_v14, %v5499_v33  ;;  %v510_v50 = vmax.f32 %v382_v31, 0.0  ;;  %v363_v51 = vadd.f32 %v235_v32, %v5503_v36 }
  0x6c   :  { %4099 = vmatpush3.msra.mxu0 %v496_v4  ;;  %4132 = vmatpush3.msra.mxu1 %v513_v5  ;;  %v380_v52 = vadd.f32 %v252_v37, %v5492_v27  ;;  %v250_v55 = vmul.f32 %v5419_v23, %v5487_v21  ;;  %v362_v57 = vadd.f32 %v234_v38, %v5511_v42  ;;  %v492_v60 = vmax.f32 %v364_v40, 0.0  ;;  %v5558_v37 = vld [vmem:[#allocation6] sm:$0xff] }
  0x6d   :  { %4100 = vmatprep.subr.mxu0 %v7349_v1  ;;  %4133 = vmatprep.subr.mxu1 %v7349_v1  ;;  %v232_v59 = vmul.f32 %v5398_v14, %v5515_v46  ;;  %v509_v62 = vmax.f32 %v381_v41, 0.0  ;;  %v379_v63 = vadd.f32 %v251_v45, %v5503_v36  ;;  %v249_v2 = vmul.f32 %v5419_v23, %v5499_v33 }
  0x6e   :  { %4101 = vmatpush3.msra.mxu0 %v495_v29  ;;  %4134 = vmatpush3.msra.mxu1 %v512_v30  ;;  %v185_v4 = vcombine.high %v5390_v10, %v5390_v10  ;;  %v361_v5 = vadd.f32 %v233_v49, %v5523_v54  ;;  %v231_v8 = vmul.f32 %v5398_v14, %v5527_v56  ;;  %v491_v22 = vmax.f32 %v363_v51, 0.0  ;;  %v5549_v30 = vld [vmem:[#allocation8 + $0x10] sm:$0xff] }
  0x6f   :  { %4102 = vmatprep.subr.mxu0 %v7349_v1  ;;  %4135 = vmatprep.subr.mxu1 %v7349_v1  ;;  %v508_v28 = vmax.f32 %v380_v52, 0.0  ;;  %v378_v29 = vadd.f32 %v250_v55, %v5511_v42  ;;  %v248_v10 = vmul.f32 %v5419_v23, %v5515_v46  ;;  %v187_v31 = vcombine.high %v5401_v15, %v5401_v15 }
  0x70   :  { %4103 = vmatpush3.msra.mxu0 %v494_v35  ;;  %4136 = vmatpush3.msra.mxu1 %v511_v39  ;;  %v490_v32 = vmax.f32 %v362_v57, 0.0  ;;  %v360_v35 = vadd.f32 %v232_v59, %v5535_v0  ;;  %v507_v38 = vmax.f32 %v379_v63, 0.0  ;;  %v377_v39 = vadd.f32 %v249_v2, %v5523_v54  ;;  %v5580_v59 = vld [vmem:[#allocation8] sm:$0xff] }
  0x71   :  { %4104 = vmatprep.subr.mxu0 %v7349_v1  ;;  %4137 = vmatprep.subr.mxu1 %v7349_v1  ;;  %v230_v40 = vmul.f32 %v5398_v14, %v5546_v11  ;;  %v247_v15 = vmul.f32 %v5419_v23, %v5527_v56  ;;  %v489_v41 = vmax.f32 %v361_v5, 0.0  ;;  %v359_v45 = vadd.f32 %v231_v8, %v5549_v30 }
  0x72   :  { %4105 = vmatpush3.msra.mxu0 %v493_v47  ;;  %4138 = vmatpush3.msra.mxu1 %v510_v50  ;;  %v5568_v47 = vld [vmem:[#allocation8 + $0x8] sm:$0xff]  ;;  %v5571_v49 = vrot.slane %v185_v4, %v5387_v9  ;;  %v506_v50 = vmax.f32 %v378_v29, 0.0  ;;  %v376_v51 = vadd.f32 %v248_v10, %v5535_v0  ;;  %v229_v52 = vmul.f32 %v5398_v14, %v5558_v37 }
  0x73   :  { %4106 = vmatprep.subr.mxu0 %v7349_v1  ;;  %4139 = vmatprep.subr.mxu1 %v7349_v1  ;;  %v246_v55 = vmul.f32 %v5419_v23, %v5546_v11  ;;  %v488_v57 = vmax.f32 %v360_v35, 0.0  ;;  %v358_v63 = vadd.f32 %v230_v40, %v5568_v47  ;;  %v375_v14 = vadd.f32 %v247_v15, %v5549_v30 }
  0x74   :  { %4107 = vmatpush3.msra.mxu0 %v492_v60  ;;  %4140 = vmatpush3.msra.mxu1 %v509_v62  ;;  %v5583_v60 = vrot.slane %v187_v31, %v5387_v9  ;;  %v505_v62 = vmax.f32 %v377_v39, 0.0  ;;  %v245_v2 = vmul.f32 %v5419_v23, %v5558_v37  ;;  %v276_v4 = vmul.f32 %v5571_v49, %v5392_v12 }
  0x75   :  { %4108 = vmatprep.subr.mxu0 %v7349_v1  ;;  %4141 = vmatprep.subr.mxu1 %v7349_v1  ;;  %v487_v5 = vmax.f32 %v359_v45, 0.0  ;;  %v504_v8 = vmax.f32 %v376_v51, 0.0  ;;  %v275_v23 = vmul.f32 %v5571_v49, %v5394_v13  ;;  %v486_v10 = vmax.f32 %v358_v63, 0.0 }
  0x76   :  { %4109 = vmatpush3.msra.mxu0 %v491_v22  ;;  %4142 = vmatpush3.msra.mxu1 %v508_v28  ;;  %v357_v22 = vadd.f32 %v229_v52, %v5580_v59  ;;  %v374_v28 = vadd.f32 %v246_v55, %v5568_v47  ;;  %v292_v29 = vmul.f32 %v5583_v60, %v5392_v12  ;;  %v503_v31 = vmax.f32 %v375_v14, 0.0  ;;  %v5617_v52 = vld [vmem:[#allocation9] sm:$0xff] }
  0x77   :  { %4110 = vmatprep.subr.mxu0 %v7349_v1  ;;  %4143 = vmatprep.subr.mxu1 %v7349_v1  ;;  %v404_v35 = vadd.f32 %v276_v4, %v5409_v19  ;;  %v291_v39 = vmul.f32 %v5583_v60, %v5394_v13  ;;  %v403_v45 = vadd.f32 %v275_v23, %v5411_v20 }
  0x78   :  { %4111 = vmatpush3.msra.mxu0 %v490_v32  ;;  %4144 = vmatpush3.msra.mxu1 %v507_v38  ;;  %v373_v32 = vadd.f32 %v245_v2, %v5580_v59  ;;  %v274_v38 = vmul.f32 %v5571_v49, %v5403_v16  ;;  %v485_v40 = vmax.f32 %v357_v22, 0.0  ;;  %v502_v15 = vmax.f32 %v374_v28, 0.0 }
  0x79   :  { %4112 = vmatprep.subr.mxu0 %v7349_v1  ;;  %4145 = vmatprep.subr.mxu1 %v7349_v1  ;;  %v290_v51 = vmul.f32 %v5583_v60, %v5403_v16  ;;  %v419_v14 = vadd.f32 %v291_v39, %v5411_v20  ;;  %v289_v2 = vmul.f32 %v5583_v60, %v5405_v17 }
  0x7a   :  { %4113 = vmatpush3.msra.mxu0 %v489_v41  ;;  %4146 = vmatpush3.msra.mxu1 %v506_v50  ;;  %v273_v41 = vmul.f32 %v5571_v49, %v5405_v17  ;;  %v420_v50 = vadd.f32 %v292_v29, %v5409_v19  ;;  %v501_v55 = vmax.f32 %v373_v32, 0.0  ;;  %v402_v63 = vadd.f32 %v274_v38, %v5421_v24 }
  0x7b   :  { %4114 = vmatprep.subr.mxu0 %v7349_v1  ;;  %4147 = vmatprep.subr.mxu1 %v7349_v1  ;;  %v418_v28 = vadd.f32 %v290_v51, %v5421_v24  ;;  %v288_v23 = vmul.f32 %v5583_v60, %v5407_v18  ;;  %v547_v32 = vmax.f32 %v419_v14, 0.0  ;;  %v287_v38 = vmul.f32 %v5583_v60, %v5425_v26 }
  0x7c   :  { %4115 = vmatpush3.msra.mxu0 %v488_v57  ;;  %4148 = vmatpush3.msra.mxu1 %v505_v62  ;;  %v272_v57 = vmul.f32 %v5571_v49, %v5407_v18  ;;  %v532_v62 = vmax.f32 %v404_v35, 0.0  ;;  %v401_v4 = vadd.f32 %v273_v41, %v5423_v25  ;;  %v548_v22 = vmax.f32 %v420_v50, 0.0 }
  0x7d   :  { %4116 = vmatprep.subr.mxu0 %v7349_v1  ;;  %4149 = vmatprep.subr.mxu1 %v7349_v1  ;;  %v417_v35 = vadd.f32 %v289_v2, %v5423_v25  ;;  %v416_v41 = vadd.f32 %v288_v23, %v5439_v34  ;;  %v286_v50 = vmul.f32 %v5583_v60, %v5451_v44 }
  0x7e   :  { %4117 = vmatpush3.msra.mxu0 %v487_v5  ;;  %4150 = vmatpush3.msra.mxu1 %v504_v8  ;;  %v271_v5 = vmul.f32 %v5571_v49, %v5425_v26  ;;  %v531_v8 = vmax.f32 %v403_v45, 0.0  ;;  %v400_v29 = vadd.f32 %v272_v57, %v5439_v34  ;;  %v529_v39 = vmax.f32 %v401_v4, 0.0 }
  0x7f   :  { %4118 = vmatprep.subr.mxu0 %v7349_v1  ;;  %4151 = vmatprep.subr.mxu1 %v7349_v1  ;;  %v269_v45 = vmul.f32 %v5571_v49, %v5455_v48  ;;  %v140_v51 = vcombine.high %v5381_v6, %v5381_v6  ;;  %v268_v14 = vmul.f32 %v5571_v49, %v5469_v58 }
  0x80   :  { %4119 = vmatpush3.msra.mxu0 %v486_v10  ;;  %4152 = vmatpush3.msra.mxu1 %v503_v31  ;;  %v270_v10 = vmul.f32 %v5571_v49, %v5451_v44  ;;  %v530_v31 = vmax.f32 %v402_v63, 0.0  ;;  %v415_v63 = vadd.f32 %v287_v38, %v5449_v43  ;;  %v285_v2 = vmul.f32 %v5583_v60, %v5455_v48 }
  0x81   :  { %4120 = vmatprep.subr.mxu0 %v7349_v1  ;;  %4153 = vmatprep.subr.mxu1 %v7349_v1  ;;  %v267_v4 = vmul.f32 %v5571_v49, %v5482_v3  ;;  %v283_v38 = vmul.f32 %v5583_v60, %v5482_v3 }
  0x82   :  { %4121 = vmatpush3.msra.mxu0 %v485_v40  ;;  %4154 = vmatpush3.msra.mxu1 %v502_v15  ;;  %v399_v40 = vadd.f32 %v271_v5, %v5449_v43  ;;  %v546_v15 = vmax.f32 %v418_v28, 0.0  ;;  %v398_v57 = vadd.f32 %v270_v10, %v5459_v53  ;;  %v544_v5 = vmax.f32 %v416_v41, 0.0 }
  0x83   :  { %4123 = vmatmul.mubr.f32.vlgmr.msra.gmra.mxu0 %v5617_v52  ;;  %4155 = vmatprep.subr.mxu1 %v7349_v1  ;;  %v284_v28 = vmul.f32 %v5583_v60, %v5469_v58  ;;  %v154_v10 = vrot.slane %v140_v51, %v5383_v7 }
  0x84   :  { %4160 = vmatprep.subr.mxu0 %v7349_v1  ;;  %4156 = vmatpush3.msra.mxu1 %v501_v55  ;;  %v528_v55 = vmax.f32 %v400_v29, 0.0  ;;  %v527_v6 = vmax.f32 %v399_v40, 0.0  ;;  %v526_v23 = vmax.f32 %v398_v57, 0.0  ;;  %v266_v29 = vmul.f32 %v5571_v49, %v5487_v21 }
  0x85   :  { %4161 = vmatpush3.msra.mxu0 %v532_v62  ;;  %4158 = vmatmul.mubr.f32.vlgmr.msra.gmra.mxu1 %v5617_v52  ;;  %v545_v62 = vmax.f32 %v417_v35, 0.0  ;;  %v413_v35 = vadd.f32 %v285_v2, %v5472_v61  ;;  %v265_v40 = vmul.f32 %v5571_v49, %v5499_v33  ;;  %v156_v57 = vcombine.high %v154_v10, %v154_v10 }
  0x86   :  { %4162 = vmatprep.subr.mxu0 %v7349_v1  ;;  %4195 = vmatprep.subr.mxu1 %v7349_v1  ;;  %v394_v51 = vadd.f32 %v266_v29, %v5511_v42  ;;  %v281_v2 = vmul.f32 %v5583_v60, %v5499_v33 }
  0x87   :  { %4163 = vmatpush3.msra.mxu0 %v531_v8  ;;  %4196 = vmatpush3.msra.mxu1 %v548_v22  ;;  %v397_v8 = vadd.f32 %v269_v45, %v5472_v61  ;;  %v414_v22 = vadd.f32 %v286_v50, %v5459_v53  ;;  %v412_v45 = vadd.f32 %v284_v28, %v5492_v27 }
  0x88   :  { %4164 = vmatprep.subr.mxu0 %v7349_v1  ;;  %4197 = vmatprep.subr.mxu1 %v7349_v1  ;;  %v282_v50 = vmul.f32 %v5583_v60, %v5487_v21  ;;  %v263_v28 = vmul.f32 %v5571_v49, %v5527_v56  ;;  %v522_v29 = vmax.f32 %v394_v51, 0.0  ;;  %v261_v51 = vmul.f32 %v5571_v49, %v5558_v37 }
  0x89   :  { %4165 = vmatpush3.msra.mxu0 %v530_v31  ;;  %4198 = vmatpush3.msra.mxu1 %v547_v32  ;;  %v543_v31 = vmax.f32 %v415_v63, 0.0  ;;  %v396_v32 = vadd.f32 %v268_v14, %v5492_v27  ;;  %v542_v41 = vmax.f32 %v414_v22, 0.0  ;;  %v541_v63 = vmax.f32 %v413_v35, 0.0 }
  0x8a   :  { %4166 = vmatprep.subr.mxu0 %v7349_v1  ;;  %4199 = vmatprep.subr.mxu1 %v7349_v1  ;;  %v411_v14 = vadd.f32 %v283_v38, %v5503_v36  ;;  %v410_v22 = vadd.f32 %v282_v50, %v5511_v42  ;;  %v409_v35 = vadd.f32 %v281_v2, %v5523_v54 }
  0x8b   :  { %4167 = vmatpush3.msra.mxu0 %v529_v39  ;;  %4200 = vmatpush3.msra.mxu1 %v546_v15  ;;  %v395_v39 = vadd.f32 %v267_v4, %v5503_v36  ;;  %v525_v15 = vmax.f32 %v397_v8, 0.0  ;;  %v393_v4 = vadd.f32 %v265_v40, %v5523_v54  ;;  %v540_v8 = vmax.f32 %v412_v45, 0.0 }
  0x8c   :  { %4168 = vmatprep.subr.mxu0 %v7349_v1  ;;  %4201 = vmatprep.subr.mxu1 %v7349_v1  ;;  %v262_v38 = vmul.f32 %v5571_v49, %v5546_v11  ;;  %v391_v45 = vadd.f32 %v263_v28, %v5549_v30 }
  0x8d   :  { %4169 = vmatpush3.msra.mxu0 %v528_v55  ;;  %4202 = vmatpush3.msra.mxu1 %v545_v62  ;;  %v264_v55 = vmul.f32 %v5571_v49, %v5515_v46  ;;  %v524_v62 = vmax.f32 %v396_v32, 0.0  ;;  %v539_v32 = vmax.f32 %v411_v14, 0.0  ;;  %v521_v40 = vmax.f32 %v393_v4, 0.0 }
  0x8e   :  { %4170 = vmatprep.subr.mxu0 %v7349_v1  ;;  %4203 = vmatprep.subr.mxu1 %v7349_v1  ;;  %v277_v49 = vmul.f32 %v5583_v60, %v5558_v37 }
  0x8f   :  { %4171 = vmatpush3.msra.mxu0 %v527_v6  ;;  %4204 = vmatpush3.msra.mxu1 %v544_v5  ;;  %v523_v6 = vmax.f32 %v395_v39, 0.0  ;;  %v5698_v5 = vrot.slane %v154_v10, %v5383_v7  ;;  %v5709_v10 = vrot.slane %v156_v57, %v5383_v7  ;;  %v279_v39 = vmul.f32 %v5583_v60, %v5527_v56 }
  0x90   :  { %4172 = vmatprep.subr.mxu0 %v7349_v1  ;;  %4205 = vmatprep.subr.mxu1 %v7349_v1  ;;  %v278_v57 = vmul.f32 %v5583_v60, %v5546_v11 }
  0x91   :  { %4173 = vmatpush3.msra.mxu0 %v526_v23  ;;  %4206 = vmatpush3.msra.mxu1 %v543_v31  ;;  %v280_v23 = vmul.f32 %v5583_v60, %v5515_v46  ;;  %v392_v31 = vadd.f32 %v264_v55, %v5535_v0  ;;  %v407_v14 = vadd.f32 %v279_v39, %v5549_v30 }
  0x92   :  { %4174 = vmatprep.subr.mxu0 %v7349_v1  ;;  %4207 = vmatprep.subr.mxu1 %v7349_v1  ;;  %v5734_v2 = vrot.slane %v5709_v10, %v5387_v9  ;;  %v406_v28 = vadd.f32 %v278_v57, %v5568_v47 }
  0x93   :  { %4175 = vmatpush3.msra.mxu0 %v525_v15  ;;  %4208 = vmatpush3.msra.mxu1 %v542_v41  ;;  %v5720_v15 = vrot.slane %v5698_v5, %v5387_v9  ;;  %v538_v41 = vmax.f32 %v410_v22, 0.0  ;;  %v408_v50 = vadd.f32 %v280_v23, %v5535_v0  ;;  %v520_v55 = vmax.f32 %v392_v31, 0.0 }
  0x94   :  { %4176 = vmatprep.subr.mxu0 %v7349_v1  ;;  %4209 = vmatprep.subr.mxu1 %v7349_v1  ;;  %v324_v31 = vmul.f32 %v5734_v2, %v5392_v12 }
  0x95   :  { %4177 = vmatpush3.msra.mxu0 %v524_v62  ;;  %4210 = vmatpush3.msra.mxu1 %v541_v63  ;;  %v537_v62 = vmax.f32 %v409_v35, 0.0  ;;  %v390_v63 = vadd.f32 %v262_v38, %v5568_v47  ;;  %v536_v4 = vmax.f32 %v408_v50, 0.0  ;;  %v308_v22 = vmul.f32 %v5720_v15, %v5392_v12 }
  0x96   :  { %4178 = vmatprep.subr.mxu0 %v7349_v1  ;;  %4211 = vmatprep.subr.mxu1 %v7349_v1  ;;  %v307_v23 = vmul.f32 %v5720_v15, %v5394_v13  ;;  %v306_v39 = vmul.f32 %v5720_v15, %v5403_v16  ;;  %v452_v50 = vadd.f32 %v324_v31, %v5409_v19 }
  0x97   :  { %4179 = vmatpush3.msra.mxu0 %v523_v6  ;;  %4212 = vmatpush3.msra.mxu1 %v540_v8  ;;  %v519_v6 = vmax.f32 %v391_v45, 0.0  ;;  %v389_v8 = vadd.f32 %v261_v51, %v5580_v59  ;;  %v518_v60 = vmax.f32 %v390_v63, 0.0  ;;  %v436_v38 = vadd.f32 %v308_v22, %v5409_v19 }
  0x98   :  { %4180 = vmatprep.subr.mxu0 %v7349_v1  ;;  %4213 = vmatprep.subr.mxu1 %v7349_v1  ;;  %v435_v45 = vadd.f32 %v307_v23, %v5411_v20  ;;  %v305_v51 = vmul.f32 %v5720_v15, %v5405_v17  ;;  %v304_v57 = vmul.f32 %v5720_v15, %v5407_v18 }
  0x99   :  { %4181 = vmatpush3.msra.mxu0 %v522_v29  ;;  %4214 = vmatpush3.msra.mxu1 %v539_v32  ;;  %v535_v29 = vmax.f32 %v407_v14, 0.0  ;;  %v405_v32 = vadd.f32 %v277_v49, %v5580_v59  ;;  %v517_v35 = vmax.f32 %v389_v8, 0.0  ;;  %v434_v19 = vadd.f32 %v306_v39, %v5421_v24 }
  0x9a   :  { %4182 = vmatprep.subr.mxu0 %v7349_v1  ;;  %4215 = vmatprep.subr.mxu1 %v7349_v1  ;;  %v563_v14 = vmax.f32 %v435_v45, 0.0  ;;  %v303_v49 = vmul.f32 %v5720_v15, %v5425_v26  ;;  %v302_v22 = vmul.f32 %v5720_v15, %v5451_v44 }
  0x9b   :  { %4183 = vmatpush3.msra.mxu0 %v521_v40  ;;  %4216 = vmatpush3.msra.mxu1 %v538_v41  ;;  %v323_v40 = vmul.f32 %v5734_v2, %v5394_v13  ;;  %v534_v41 = vmax.f32 %v406_v28, 0.0  ;;  %v533_v13 = vmax.f32 %v405_v32, 0.0  ;;  %v562_v28 = vmax.f32 %v434_v19, 0.0 }
  0x9c   :  { %4184 = vmatprep.subr.mxu0 %v7349_v1  ;;  %4217 = vmatprep.subr.mxu1 %v7349_v1  ;;  %v315_v19 = vmul.f32 %v5734_v2, %v5482_v3 }
  0x9d   :  { %4185 = vmatpush3.msra.mxu0 %v520_v55  ;;  %4218 = vmatpush3.msra.mxu1 %v537_v62  ;;  %v322_v55 = vmul.f32 %v5734_v2, %v5403_v16  ;;  %v564_v62 = vmax.f32 %v436_v38, 0.0  ;;  %v451_v63 = vadd.f32 %v323_v40, %v5411_v20  ;;  %v321_v16 = vmul.f32 %v5734_v2, %v5405_v17 }
  0x9e   :  { %4186 = vmatprep.subr.mxu0 %v7349_v1  ;;  %4219 = vmatprep.subr.mxu1 %v7349_v1  ;;  %v320_v20 = vmul.f32 %v5734_v2, %v5407_v18  ;;  %v432_v17 = vadd.f32 %v304_v57, %v5439_v34  ;;  %v431_v18 = vadd.f32 %v303_v49, %v5449_v43 }
  0x9f   :  { %4187 = vmatpush3.msra.mxu0 %v519_v6  ;;  %4220 = vmatpush3.msra.mxu1 %v536_v4  ;;  %v580_v6 = vmax.f32 %v452_v50, 0.0  ;;  %v433_v4 = vadd.f32 %v305_v51, %v5423_v25  ;;  %v450_v8 = vadd.f32 %v322_v55, %v5421_v24  ;;  %v579_v23 = vmax.f32 %v451_v63, 0.0 }
  0xa0   :  { %4188 = vmatprep.subr.mxu0 %v7349_v1  ;;  %4221 = vmatprep.subr.mxu1 %v7349_v1  ;;  %v319_v24 = vmul.f32 %v5734_v2, %v5425_v26  ;;  %v560_v26 = vmax.f32 %v432_v17, 0.0  ;;  %v430_v38 = vadd.f32 %v302_v22, %v5459_v53  ;;  %v316_v55 = vmul.f32 %v5734_v2, %v5469_v58 }
  0xa1   :  { %4189 = vmatpush3.msra.mxu0 %v518_v60  ;;  %4222 = vmatpush3.msra.mxu1 %v535_v29  ;;  %v449_v60 = vadd.f32 %v321_v16, %v5423_v25  ;;  %v301_v29 = vmul.f32 %v5720_v15, %v5455_v48  ;;  %v561_v31 = vmax.f32 %v433_v4, 0.0  ;;  %v578_v32 = vmax.f32 %v450_v8, 0.0 }
  0xa2   :  { %4190 = vmatprep.subr.mxu0 %v7349_v1  ;;  %4223 = vmatprep.subr.mxu1 %v7349_v1  ;;  %v318_v25 = vmul.f32 %v5734_v2, %v5451_v44  ;;  %v447_v40 = vadd.f32 %v319_v24, %v5449_v43  ;;  %v559_v44 = vmax.f32 %v431_v18, 0.0  ;;  %v299_v43 = vmul.f32 %v5720_v15, %v5482_v3 }
  0xa3   :  { %4191 = vmatpush3.msra.mxu0 %v517_v35  ;;  %4192 = vmatprep.mubr.msk.f32.mxu0 %vm5305_vm0, %v7349_v1  ;;  %v448_v35 = vadd.f32 %v320_v20, %v5439_v34  ;;  %v577_v39 = vmax.f32 %v449_v60, 0.0  ;;  %v317_v34 = vmul.f32 %v5734_v2, %v5455_v48  ;;  %v429_v45 = vadd.f32 %v301_v29, %v5472_v61 }
  0xa4   :  { %4224 = vmatpush3.msra.mxu1 %v534_v41  ;;  %4193 = vmatmul.mubr.f32.vlgmr.msra.gmra.mxu0 %v5617_v52  ;;  %v300_v41 = vmul.f32 %v5720_v15, %v5469_v58  ;;  %v446_v51 = vadd.f32 %v318_v25, %v5459_v53  ;;  %v558_v48 = vmax.f32 %v430_v38, 0.0  ;;  %v575_v57 = vmax.f32 %v447_v40, 0.0 }
  0xa5   :  { %4225 = vmatprep.subr.mxu1 %v7349_v1  ;;  %4230 = vmatprep.subr.mxu0 %v7349_v1  ;;  %v576_v50 = vmax.f32 %v448_v35, 0.0  ;;  %v445_v53 = vadd.f32 %v317_v34, %v5472_v61  ;;  %v557_v58 = vmax.f32 %v429_v45, 0.0  ;;  %v297_v63 = vmul.f32 %v5720_v15, %v5499_v33 }
  0xa6   :  { %4226 = vmatpush3.msra.mxu1 %v533_v13  ;;  %4227 = vmatprep.mubr.msk.f32.mxu1 %vm5305_vm0, %v7349_v1  ;;  %v298_v13 = vmul.f32 %v5720_v15, %v5487_v21  ;;  %v574_v16 = vmax.f32 %v446_v51, 0.0  ;;  %v444_v49 = vadd.f32 %v316_v55, %v5492_v27  ;;  %v314_v61 = vmul.f32 %v5734_v2, %v5487_v21  ;;  %v5041_v51 = vld [vmem:[#allocation6 + $0x78] sm:$0xff] }
  0xa7   :  { %4231 = vmatpush3.msra.mxu0 %v564_v62  ;;  %4228 = vmatmul.mubr.f32.vlgmr.msra.gmra.mxu1 %v5617_v52  ;;  %v428_v62 = vadd.f32 %v300_v41, %v5492_v27  ;;  %v313_v4 = vmul.f32 %v5734_v2, %v5499_v33  ;;  %v573_v20 = vmax.f32 %v445_v53, 0.0  ;;  %v443_v27 = vadd.f32 %v315_v19, %v5503_v36  ;;  %v5044_v19 = vld [vmem:[#allocation6 + $0x60] sm:$0xff] }
  0xa8   :  { %4232 = vmatprep.subr.mxu0 %v7349_v1  ;;  %4265 = vmatprep.subr.mxu1 %v7349_v1  ;;  %v426_v3 = vadd.f32 %v298_v13, %v5511_v42  ;;  %v425_v21 = vadd.f32 %v297_v63, %v5523_v54  ;;  %v295_v17 = vmul.f32 %v5720_v15, %v5527_v56  ;;  %v5043_v13 = vld [vmem:[#allocation6 + $0x68] sm:$0xff] }
  0xa9   :  { %4233 = vmatpush3.msra.mxu0 %v563_v14  ;;  %4266 = vmatpush3.msra.mxu1 %v580_v6  ;;  %v427_v14 = vadd.f32 %v299_v43, %v5503_v36  ;;  %v296_v6 = vmul.f32 %v5720_v15, %v5515_v46  ;;  %v556_v8 = vmax.f32 %v428_v62, 0.0  ;;  %v186_v22 = vcombine.high %v5698_v5, %v5698_v5 }
  0xaa   :  { %4234 = vmatprep.subr.mxu0 %v7349_v1  ;;  %4267 = vmatprep.subr.mxu1 %v7349_v1  ;;  %v312_v36 = vmul.f32 %v5734_v2, %v5515_v46  ;;  %v554_v60 = vmax.f32 %v426_v3, 0.0  ;;  %v441_v18 = vadd.f32 %v313_v4, %v5523_v54  ;;  %v571_v5 = vmax.f32 %v443_v27, 0.0  ;;  %v5047_v4 = vld [vmem:[#allocation8 + $0x68] sm:$0xff] }
  0xab   :  { %4235 = vmatpush3.msra.mxu0 %v562_v28  ;;  %4268 = vmatpush3.msra.mxu1 %v579_v23  ;;  %v555_v33 = vmax.f32 %v427_v14, 0.0  ;;  %v572_v28 = vmax.f32 %v444_v49, 0.0  ;;  %v442_v23 = vadd.f32 %v314_v61, %v5511_v42  ;;  %v424_v24 = vadd.f32 %v296_v6, %v5535_v0  ;;  %v5046_v61 = vld [vmem:[#allocation6 + $0x58] sm:$0xff] }
  0xac   :  { %4236 = vmatprep.subr.mxu0 %v7349_v1  ;;  %4269 = vmatprep.subr.mxu1 %v7349_v1  ;;  %v294_v29 = vmul.f32 %v5720_v15, %v5546_v11  ;;  %v311_v42 = vmul.f32 %v5734_v2, %v5527_v56  ;;  %v188_v46 = vcombine.high %v5709_v10, %v5709_v10  ;;  %v569_v38 = vmax.f32 %v441_v18, 0.0 }
  0xad   :  { %4237 = vmatpush3.msra.mxu0 %v561_v31  ;;  %4270 = vmatpush3.msra.mxu1 %v578_v32  ;;  %v553_v31 = vmax.f32 %v425_v21, 0.0  ;;  %v423_v32 = vadd.f32 %v295_v17, %v5549_v30  ;;  %v570_v54 = vmax.f32 %v442_v23, 0.0  ;;  %v440_v35 = vadd.f32 %v312_v36, %v5535_v0  ;;  %v5048_v21 = vld [vmem:[#allocation8 + $0x60] sm:$0xff] }
  0xae   :  { %4238 = vmatprep.subr.mxu0 %v7349_v1  ;;  %4271 = vmatprep.subr.mxu1 %v7349_v1  ;;  %v293_v25 = vmul.f32 %v5720_v15, %v5558_v37  ;;  %v5869_v56 = vrot.slane %v186_v22, %v5387_v9  ;;  %v552_v10 = vmax.f32 %v424_v24, 0.0  ;;  %v439_v0 = vadd.f32 %v311_v42, %v5549_v30  ;;  %v5049_v22 = vld [vmem:[#allocation6 + $0x50] sm:$0xff]  ;;  %v5050_v24 = vld [vmem:[#allocation8 + $0x58] sm:$0xff] }
  0xaf   :  { %4239 = vmatpush3.msra.mxu0 %v560_v26  ;;  %4272 = vmatpush3.msra.mxu1 %v577_v39  ;;  %v310_v26 = vmul.f32 %v5734_v2, %v5546_v11  ;;  %v422_v39 = vadd.f32 %v294_v29, %v5568_v47  ;;  %v5878_v15 = vrot.slane %v188_v46, %v5387_v9  ;;  %v551_v11 = vmax.f32 %v423_v32, 0.0 }
  0xb0   :  { %4240 = vmatprep.subr.mxu0 %v7349_v1  ;;  %4273 = vmatprep.subr.mxu1 %v7349_v1  ;;  %v309_v40 = vmul.f32 %v5734_v2, %v5558_v37  ;;  %v568_v41 = vmax.f32 %v440_v35, 0.0  ;;  %v421_v34 = vadd.f32 %v293_v25, %v5580_v59  ;;  %v5040_v37 = vld [vmem:[#allocation6 + $0x70] sm:$0xff]  ;;  %v336_v3 = vmul.f32 %v5046_v61, %v5869_v56 }
  0xb1   :  { %4241 = vmatpush3.msra.mxu0 %v559_v44  ;;  %4274 = vmatpush3.msra.mxu1 %v576_v50  ;;  %v340_v44 = vmul.f32 %v5869_v56, %v5392_v12  ;;  %v438_v30 = vadd.f32 %v310_v26, %v5568_v47  ;;  %v550_v45 = vmax.f32 %v422_v39, 0.0  ;;  %v567_v50 = vmax.f32 %v439_v0, 0.0  ;;  %v5042_v47 = vld [vmem:[#allocation8 + $0x78] sm:$0xff]  ;;  %v5052_v35 = vld [vmem:[#allocation8 + $0x50] sm:$0xff] }
  0xb2   :  { %4242 = vmatprep.subr.mxu0 %v7349_v1  ;;  %4275 = vmatprep.subr.mxu1 %v7349_v1  ;;  %v339_v2 = vmul.f32 %v5040_v37, %v5869_v56  ;;  %v356_v43 = vmul.f32 %v5041_v51, %v5878_v15  ;;  %v437_v12 = vadd.f32 %v309_v40, %v5580_v59  ;;  %v549_v55 = vmax.f32 %v421_v34, 0.0  ;;  %v5045_v59 = vld [vmem:[#allocation8 + $0x70] sm:$0xff] }
  0xb3   :  { %4243 = vmatpush3.msra.mxu0 %v558_v48  ;;  %4276 = vmatpush3.msra.mxu1 %v575_v57  ;;  %v468_v48 = vadd.f32 %v5042_v47, %v340_v44  ;;  %v338_v57 = vmul.f32 %v5043_v13, %v5869_v56  ;;  %v355_v62 = vmul.f32 %v5040_v37, %v5878_v15  ;;  %v566_v53 = vmax.f32 %v438_v30, 0.0  ;;  %v5055_v30 = vld [vmem:[#allocation6 + $0x38] sm:$0xff] }
  0xb4   :  { %4244 = vmatprep.subr.mxu0 %v7349_v1  ;;  %4277 = vmatprep.subr.mxu1 %v7349_v1  ;;  %v467_v63 = vadd.f32 %v5045_v59, %v339_v2  ;;  %v354_v14 = vmul.f32 %v5043_v13, %v5878_v15  ;;  %v565_v49 = vmax.f32 %v437_v12, 0.0  ;;  %v353_v27 = vmul.f32 %v5044_v19, %v5878_v15  ;;  %v5056_v2 = vld [vmem:[#allocation6 + $0x30] sm:$0xff]  ;;  %v5057_v12 = vld [vmem:[#allocation8 + $0x40] sm:$0xff] }
  0xb5   :  { %4245 = vmatpush3.msra.mxu0 %v557_v58  ;;  %4278 = vmatpush3.msra.mxu1 %v574_v16  ;;  %v337_v58 = vmul.f32 %v5044_v19, %v5869_v56  ;;  %v484_v16 = vadd.f32 %v5042_v47, %v356_v43  ;;  %v596_v6 = vmax.f32 %v468_v48, 0.0  ;;  %v464_v18 = vadd.f32 %v5050_v24, %v336_v3  ;;  %v5059_v19 = vld [vmem:[#allocation8 + $0x38] sm:$0xff] }
  0xb6   :  { %4246 = vmatprep.subr.mxu0 %v7349_v1  ;;  %4279 = vmatprep.subr.mxu1 %v7349_v1  ;;  %v482_v36 = vadd.f32 %v5047_v4, %v354_v14  ;;  %v351_v32 = vmul.f32 %v5049_v22, %v5878_v15  ;;  %v331_v51 = vmul.f32 %v5056_v2, %v5869_v56 }
  0xb7   :  { %4247 = vmatpush3.msra.mxu0 %v556_v8  ;;  %4280 = vmatpush3.msra.mxu1 %v573_v20  ;;  %v466_v8 = vadd.f32 %v5047_v4, %v338_v57  ;;  %v483_v20 = vadd.f32 %v5045_v59, %v355_v62  ;;  %v465_v17 = vadd.f32 %v5048_v21, %v337_v58  ;;  %v612_v23 = vmax.f32 %v484_v16, 0.0  ;;  %v5058_v57 = vld [vmem:[#allocation6 + $0x28] sm:$0xff]  ;;  %v5060_v16 = vld [vmem:[#allocation8 + $0x30] sm:$0xff] }
  0xb8   :  { %4248 = vmatprep.subr.mxu0 %v7349_v1  ;;  %4281 = vmatprep.subr.mxu1 %v7349_v1  ;;  %v592_v40 = vmax.f32 %v464_v18, 0.0  ;;  %v479_v44 = vadd.f32 %v5052_v35, %v351_v32  ;;  %v348_v48 = vmul.f32 %v5055_v30, %v5878_v15  ;;  %v330_v62 = vmul.f32 %v5058_v57, %v5869_v56  ;;  %v5066_v32 = vld [vmem:[#allocation8 + $0x18] sm:$0xff] }
  0xb9   :  { %4249 = vmatpush3.msra.mxu0 %v555_v33  ;;  %4282 = vmatpush3.msra.mxu1 %v572_v28  ;;  %v335_v33 = vmul.f32 %v5049_v22, %v5869_v56  ;;  %v595_v28 = vmax.f32 %v467_v63, 0.0  ;;  %v594_v42 = vmax.f32 %v466_v8, 0.0  ;;  %v611_v46 = vmax.f32 %v483_v20, 0.0  ;;  %v5062_v20 = vld [vmem:[#allocation8 + $0x28] sm:$0xff] }
  0xba   :  { %4250 = vmatprep.subr.mxu0 %v7349_v1  ;;  %4283 = vmatprep.subr.mxu1 %v7349_v1  ;;  %v347_v63 = vmul.f32 %v5056_v2, %v5878_v15  ;;  %v459_v14 = vadd.f32 %v5060_v16, %v331_v51  ;;  %v476_v4 = vadd.f32 %v5059_v19, %v348_v48 }
  0xbb   :  { %4251 = vmatpush3.msra.mxu0 %v554_v60  ;;  %4284 = vmatpush3.msra.mxu1 %v571_v5  ;;  %v352_v60 = vmul.f32 %v5046_v61, %v5878_v15  ;;  %v5051_v5 = vld [vmem:[#allocation6 + $0x48] sm:$0xff]  ;;  %v463_v25 = vadd.f32 %v5052_v35, %v335_v33  ;;  %v346_v8 = vmul.f32 %v5058_v57, %v5878_v15 }
  0xbc   :  { %4252 = vmatprep.subr.mxu0 %v7349_v1  ;;  %4285 = vmatprep.subr.mxu1 %v7349_v1  ;;  %v334_v29 = vmul.f32 %v5051_v5, %v5869_v56  ;;  %v350_v0 = vmul.f32 %v5051_v5, %v5878_v15  ;;  %v604_v18 = vmax.f32 %v476_v4, 0.0 }
  0xbd   :  { %4253 = vmatpush3.msra.mxu0 %v553_v31  ;;  %4286 = vmatpush3.msra.mxu1 %v570_v54  ;;  %v481_v31 = vadd.f32 %v5048_v21, %v353_v27  ;;  %v593_v54 = vmax.f32 %v465_v17, 0.0  ;;  %v480_v26 = vadd.f32 %v5050_v24, %v352_v60  ;;  %v591_v37 = vmax.f32 %v463_v25, 0.0  ;;  %v5063_v21 = vld [vmem:[#allocation6 + $0x18] sm:$0xff]  ;;  %v5064_v60 = vld [vmem:[#allocation8 + $0x20] sm:$0xff] }
  0xbe   :  { %4254 = vmatprep.subr.mxu0 %v7349_v1  ;;  %4287 = vmatprep.subr.mxu1 %v7349_v1  ;;  %v458_v27 = vadd.f32 %v5062_v20, %v330_v62  ;;  %v328_v17 = vmul.f32 %v5063_v21, %v5869_v56  ;;  %v474_v5 = vadd.f32 %v5062_v20, %v346_v8 }
  0xbf   :  { %4255 = vmatpush3.msra.mxu0 %v552_v10  ;;  %4288 = vmatpush3.msra.mxu1 %v569_v38  ;;  %v610_v10 = vmax.f32 %v482_v36, 0.0  ;;  %v5053_v38 = vld [vmem:[#allocation6 + $0x40] sm:$0xff]  ;;  %v609_v34 = vmax.f32 %v481_v31, 0.0  ;;  %v608_v43 = vmax.f32 %v480_v26, 0.0  ;;  %v587_v36 = vmax.f32 %v459_v14, 0.0 }
  0xc0   :  { %4256 = vmatprep.subr.mxu0 %v7349_v1  ;;  %4289 = vmatprep.subr.mxu1 %v7349_v1  ;;  %v333_v39 = vmul.f32 %v5053_v38, %v5869_v56  ;;  %v586_v31 = vmax.f32 %v458_v27, 0.0 }
  0xc1   :  { %4257 = vmatpush3.msra.mxu0 %v551_v11  ;;  %4290 = vmatpush3.msra.mxu1 %v568_v41  ;;  %v5054_v11 = vld [vmem:[#allocation8 + $0x48] sm:$0xff] }
  0xc2   :  { %4258 = vmatprep.subr.mxu0 %v7349_v1  ;;  %4291 = vmatprep.subr.mxu1 %v7349_v1  ;;  %v462_v41 = vadd.f32 %v5054_v11, %v334_v29  ;;  %v478_v47 = vadd.f32 %v5054_v11, %v350_v0  ;;  %v5065_v29 = vld [vmem:[#allocation6 + $0x10] sm:$0xff]  ;;  %v602_v0 = vmax.f32 %v474_v5, 0.0 }
  0xc3   :  { %4259 = vmatpush3.msra.mxu0 %v550_v45  ;;  %4292 = vmatpush3.msra.mxu1 %v567_v50  ;;  %v332_v45 = vmul.f32 %v5055_v30, %v5869_v56  ;;  %v349_v50 = vmul.f32 %v5053_v38, %v5878_v15  ;;  %v343_v38 = vmul.f32 %v5065_v29, %v5878_v15 }
  0xc4   :  { %4260 = vmatprep.subr.mxu0 %v7349_v1  ;;  %4293 = vmatprep.subr.mxu1 %v7349_v1  ;;  %v590_v13 = vmax.f32 %v462_v41, 0.0 }
  0xc5   :  { %4261 = vmatpush3.msra.mxu0 %v549_v55  ;;  %4262 = vmatprep.mubr.msk.f32.mxu0 %vm5305_vm0, %v7349_v1  ;;  %v461_v55 = vadd.f32 %v5057_v12, %v333_v39  ;;  %v460_v58 = vadd.f32 %v5059_v19, %v332_v45  ;;  %v477_v59 = vadd.f32 %v5057_v12, %v349_v50 }
  0xc6   :  { %4294 = vmatpush3.msra.mxu1 %v566_v53  ;;  %4263 = vmatmul.mubr.f32.vlgmr.msra.gmra.mxu0 %v5617_v52  ;;  %v607_v53 = vmax.f32 %v479_v44, 0.0 }
  0xc7   :  { %4295 = vmatprep.subr.mxu1 %v7349_v1  ;;  %4300 = vmatprep.subr.mxu0 %v7349_v1  ;;  %v589_v3 = vmax.f32 %v461_v55, 0.0  ;;  %v588_v22 = vmax.f32 %v460_v58, 0.0  ;;  %v605_v33 = vmax.f32 %v477_v59, 0.0  ;;  %v5071_v55 = vld [vmem:[#allocation8] sm:$0xff]  ;;  %v5979_v58 = vstv %s1191_s5 }
  0xc8   :  { %4296 = vmatpush3.msra.mxu1 %v565_v49  ;;  %4297 = vmatprep.mubr.msk.f32.mxu1 %vm5305_vm0, %v7349_v1  ;;  %v5061_v49 = vld [vmem:[#allocation6 + $0x20] sm:$0xff] }
  0xc9   :  { %4301 = vmatpush3.msra.mxu0 %v596_v6  ;;  %4298 = vmatmul.mubr.f32.vlgmr.msra.gmra.mxu1 %v5617_v52  ;;  %v329_v61 = vmul.f32 %v5061_v49, %v5869_v56  ;;  %v606_v6 = vmax.f32 %v478_v47, 0.0 }
  0xca   :  { %4302 = vmatprep.subr.mxu0 %v7349_v1  ;;  %4335 = vmatprep.subr.mxu1 %v7349_v1 }
  0xcb   :  { %4303 = vmatpush3.msra.mxu0 %v595_v28  ;;  %4336 = vmatpush3.msra.mxu1 %v612_v23  ;;  %v475_v28 = vadd.f32 %v5060_v16, %v347_v63  ;;  %v345_v23 = vmul.f32 %v5061_v49, %v5878_v15  ;;  %v457_v24 = vadd.f32 %v5064_v60, %v329_v61 }
  0xcc   :  { %4304 = vmatprep.subr.mxu0 %v7349_v1  ;;  %4337 = vmatprep.subr.mxu1 %v7349_v1 }
  0xcd   :  { %4305 = vmatpush3.msra.mxu0 %v594_v42  ;;  %4338 = vmatpush3.msra.mxu1 %v611_v46  ;;  %v327_v42 = vmul.f32 %v5065_v29, %v5869_v56  ;;  %v344_v46 = vmul.f32 %v5063_v21, %v5878_v15  ;;  %v603_v35 = vmax.f32 %v475_v28, 0.0  ;;  %v473_v25 = vadd.f32 %v5064_v60, %v345_v23 }
  0xce   :  { %4306 = vmatprep.subr.mxu0 %v7349_v1  ;;  %4339 = vmatprep.subr.mxu1 %v7349_v1  ;;  %v585_v39 = vmax.f32 %v457_v24, 0.0 }
  0xcf   :  { %4307 = vmatpush3.msra.mxu0 %v593_v54  ;;  %4340 = vmatpush3.msra.mxu1 %v610_v10  ;;  %v456_v54 = vadd.f32 %v5066_v32, %v328_v17  ;;  %v5067_v10 = vld [vmem:[#allocation6 + $0x8] sm:$0xff]  ;;  %v472_v41 = vadd.f32 %v5066_v32, %v344_v46  ;;  %v601_v50 = vmax.f32 %v473_v25, 0.0  ;;  %v1174_v32 = vstv %s1173_s27 }
  0xd0   :  { %4308 = vmatprep.subr.mxu0 %v7349_v1  ;;  %4341 = vmatprep.subr.mxu1 %v7349_v1  ;;  %v326_v26 = vmul.f32 %v5067_v10, %v5869_v56  ;;  %v342_v30 = vmul.f32 %v5067_v10, %v5878_v15 }
  0xd1   :  { %4309 = vmatpush3.msra.mxu0 %v592_v40  ;;  %4342 = vmatpush3.msra.mxu1 %v609_v34  ;;  %v5068_v40 = vld [vmem:[#allocation8 + $0x10] sm:$0xff]  ;;  %v5069_v34 = vld [vmem:[#allocation6] sm:$0xff]  ;;  %v584_v45 = vmax.f32 %v456_v54, 0.0  ;;  %v600_v12 = vmax.f32 %v472_v41, 0.0 }
  0xd2   :  { %4310 = vmatprep.subr.mxu0 %v7349_v1  ;;  %4343 = vmatprep.subr.mxu1 %v7349_v1  ;;  %v455_v11 = vadd.f32 %v5068_v40, %v327_v42  ;;  %v325_v44 = vmul.f32 %v5069_v34, %v5869_v56  ;;  %v471_v51 = vadd.f32 %v5068_v40, %v343_v38 }
  0xd3   :  { %4311 = vmatpush3.msra.mxu0 %v591_v37  ;;  %4344 = vmatpush3.msra.mxu1 %v608_v43  ;;  %v5070_v37 = vld [vmem:[#allocation8 + $0x8] sm:$0xff]  ;;  %v341_v43 = vmul.f32 %v5069_v34, %v5878_v15 }
  0xd4   :  { %4312 = vmatprep.subr.mxu0 %v7349_v1  ;;  %4345 = vmatprep.subr.mxu1 %v7349_v1  ;;  %v454_v2 = vadd.f32 %v5070_v37, %v326_v26  ;;  %v583_v56 = vmax.f32 %v455_v11, 0.0  ;;  %v453_v47 = vadd.f32 %v5071_v55, %v325_v44  ;;  %v470_v48 = vadd.f32 %v5070_v37, %v342_v30 }
  0xd5   :  { %4313 = vmatpush3.msra.mxu0 %v590_v13  ;;  %4346 = vmatpush3.msra.mxu1 %v607_v53  ;;  %v599_v57 = vmax.f32 %v471_v51, 0.0  ;;  %v469_v15 = vadd.f32 %v5071_v55, %v341_v43 }
  0xd6   :  { %4314 = vmatprep.subr.mxu0 %v7349_v1  ;;  %4347 = vmatprep.subr.mxu1 %v7349_v1  ;;  %v582_v13 = vmax.f32 %v454_v2, 0.0  ;;  %v581_v62 = vmax.f32 %v453_v47, 0.0  ;;  %v598_v53 = vmax.f32 %v470_v48, 0.0 }
  0xd7   :  { %4315 = vmatpush3.msra.mxu0 %v589_v3  ;;  %4348 = vmatpush3.msra.mxu1 %v606_v6  ;;  %v597_v19 = vmax.f32 %v469_v15, 0.0 }
  0xd8   :  { %4316 = vmatprep.subr.mxu0 %v7349_v1  ;;  %4349 = vmatprep.subr.mxu1 %v7349_v1 }
  0xd9   :  { %4317 = vmatpush3.msra.mxu0 %v588_v22  ;;  %4350 = vmatpush3.msra.mxu1 %v605_v33 }
  0xda   :  { %4318 = vmatprep.subr.mxu0 %v7349_v1  ;;  %4351 = vmatprep.subr.mxu1 %v7349_v1 }
  0xdb   :  { %4319 = vmatpush3.msra.mxu0 %v587_v36  ;;  %4352 = vmatpush3.msra.mxu1 %v604_v18 }
  0xdc   :  { %4320 = vmatprep.subr.mxu0 %v7349_v1  ;;  %4353 = vmatprep.subr.mxu1 %v7349_v1 }
  0xdd   :  { %4321 = vmatpush3.msra.mxu0 %v586_v31  ;;  %4354 = vmatpush3.msra.mxu1 %v603_v35 }
  0xde   :  { %4322 = vmatprep.subr.mxu0 %v7349_v1  ;;  %4355 = vmatprep.subr.mxu1 %v7349_v1 }
  0xdf   :  { %4323 = vmatpush3.msra.mxu0 %v585_v39  ;;  %4356 = vmatpush3.msra.mxu1 %v602_v0 }
  0xe0   :  { %4324 = vmatprep.subr.mxu0 %v7349_v1  ;;  %4357 = vmatprep.subr.mxu1 %v7349_v1 }
  0xe1   :  { %4325 = vmatpush3.msra.mxu0 %v584_v45  ;;  %4358 = vmatpush3.msra.mxu1 %v601_v50 }
  0xe2   :  { %4326 = vmatprep.subr.mxu0 %v7349_v1  ;;  %4359 = vmatprep.subr.mxu1 %v7349_v1 }
  0xe3   :  { %4327 = vmatpush3.msra.mxu0 %v583_v56  ;;  %4360 = vmatpush3.msra.mxu1 %v600_v12 }
  0xe4   :  { %4328 = vmatprep.subr.mxu0 %v7349_v1  ;;  %4361 = vmatprep.subr.mxu1 %v7349_v1 }
  0xe5   :  { %4329 = vmatpush3.msra.mxu0 %v582_v13  ;;  %4362 = vmatpush3.msra.mxu1 %v599_v57 }
  0xe6   :  { %4330 = vmatprep.subr.mxu0 %v7349_v1  ;;  %4363 = vmatprep.subr.mxu1 %v7349_v1 }
  0xe7   :  { %4331 = vmatpush3.msra.mxu0 %v581_v62  ;;  %4332 = vmatprep.mubr.msk.f32.mxu0 %vm5305_vm0, %v7349_v1 }
  0xe8   :  { %4364 = vmatpush3.msra.mxu1 %v598_v53  ;;  %4333 = vmatmul.mubr.f32.vlgmr.msra.gmra.mxu0 %v5617_v52 }
  0xe9   :  { %4365 = vmatprep.subr.mxu1 %v7349_v1  ;;  %4367 = vmatprep.mubr.msk.f32.mxu1 %vm5305_vm0, %v7349_v1 }
  0xea   :  { %4366 = vmatpush3.msra.mxu1 %v597_v19  ;;  %4370 = vmatprep.subr.mxu0 %v7349_v1 }
  0xeb   :  { %4368 = vmatmul.mubr.f32.vlgmr.msra.gmra.mxu1 %v5617_v52  ;;  %4405 = vmatprep.subr.mxu1 %v7349_v1 }
  0xec   :  { %4402 = vmatprep.mubr.msk.f32.mxu0 %vm5305_vm0, %v7349_v1  ;;  %4437 = vmatprep.mubr.msk.f32.mxu1 %vm5305_vm0, %v7349_v1 }
 0x143   :  { %v679_v59 = vpop.f32.mrf.mxu0 }
 0x144   :  { %v1193_v63 = vadd.f32 %v5979_v58, %v679_v59  ;;  %v1175_v26 = vadd.f32 %v1174_v32, %v679_v59 }
 0x145   :  { %v4124_v16 = vpop.f32.mrf.mxu0  ;;  %v749_v14 = vpop.f32.mrf.mxu1 }
 0x146   :  { %v1256_v49 = vrot.slane %v1193_v63, 1  ;;  %v1194_v52 = vadd.f32 %v5979_v58, %v749_v14  ;;  %v1176_v54 = vadd.f32 %v1174_v32, %v749_v14 }
 0x147   :  { %v4159_v61 = vpop.f32.mrf.mxu1 }
 0x148   :  { %v1257_v3 = vsel %vm1226_vm1, %v1194_v52, %v1256_v49  ;;  %4944 = vtanh.f32 %v1176_v54 }
 0x155   :  { %v5994_v39 = vpop.eup %4944 }
 0x156   :  { %v1203_v11 = vmul.f32 1.442695, %v5994_v39 }
 0x164   :  { %v819_v6 = vpop.f32.mrf.mxu0 }
 0x165   :  { %v1195_v4 = vadd.f32 %v5979_v58, %v819_v6  ;;  %v1177_v35 = vadd.f32 %v1174_v32, %v819_v6 }
 0x166   :  { %v4194_v8 = vpop.f32.mrf.mxu0 }
 0x167   :  { %v1258_v20 = vrot.slane %v1195_v4, 7  ;;  %v889_v27 = vpop.f32.mrf.mxu1  ;;  %4946 = vtanh.f32 %v1177_v35 }
 0x168   :  { %v1196_v21 = vadd.f32 %v5979_v58, %v889_v27  ;;  %v1178_v25 = vadd.f32 %v1174_v32, %v889_v27 }
 0x169   :  { %v1259_v17 = vsel %vm1229_vm2, %v1258_v20, %v1257_v3  ;;  %v4229_v22 = vpop.f32.mrf.mxu1 }
 0x16a   :  { %v1260_v33 = vrot.slane %v1196_v21, 6  ;;  %4948 = vtanh.f32 %v1178_v25 }
 0x16c   :  { %v1261_v28 = vsel %vm1232_vm3, %v1260_v33, %v1259_v17 }
 0x174   :  { %v5996_v0 = vpop.eup %4946 }
 0x175   :  { %v1205_v30 = vmul.f32 1.442695, %v5996_v0 }
 0x177   :  { %v5999_v44 = vpop.eup %4948 }
 0x178   :  { %7357 = vst [vmem:[#allocation24_spill] sm:$0xff] %v5999_v44  ;;  %v1207_v43 = vmul.f32 1.442695, %v5999_v44 }
 0x186   :  { %v959_v23 = vpop.f32.mrf.mxu0 }
 0x187   :  { %v1197_v36 = vadd.f32 %v5979_v58, %v959_v23  ;;  %v1179_v10 = vadd.f32 %v1174_v32, %v959_v23 }
 0x188   :  { %v4264_v60 = vpop.f32.mrf.mxu0 }
 0x189   :  { %v1262_v24 = vrot.slane %v1197_v36, 5  ;;  %v1029_v18 = vpop.f32.mrf.mxu1  ;;  %4950 = vtanh.f32 %v1179_v10  ;;  %v6042_v10 = vld [vmem:[#allocation6 + $0xf0] sm:$0xff] }
 0x18a   :  { %v1198_v5 = vadd.f32 %v5979_v58, %v1029_v18  ;;  %v1180_v38 = vadd.f32 %v1174_v32, %v1029_v18  ;;  %4952 = vtanh.f32 %v1175_v26 }
 0x18b   :  { %v1263_v29 = vsel %vm1235_vm4, %v1262_v24, %v1261_v28  ;;  %v4299_v42 = vpop.f32.mrf.mxu1 }
 0x18c   :  { %v1264_v46 = vrot.slane %v1198_v5, 4  ;;  %4954 = vtanh.f32 %v1180_v38 }
 0x18e   :  { %v5992_v31 = vsel %vm1238_vm5, %v1264_v46, %v1263_v29  ;;  %v5072_v29 = vld [vmem:[#allocation2] sm:$0xff] }
 0x196   :  { %v6002_v50 = vpop.eup %4950 }
 0x197   :  { %7358 = vst [vmem:[#allocation25_spill] sm:$0xff] %v6002_v50  ;;  %v6004_v2 = vpop.eup %4952  ;;  %v1209_v12 = vmul.f32 1.442695, %v6002_v50 }
 0x198   :  { %v1201_v55 = vmul.f32 1.442695, %v6004_v2 }
 0x199   :  { %v6007_v56 = vpop.eup %4954 }
 0x19a   :  { %7359 = vst [vmem:[#allocation26_spill] sm:$0xff] %v6007_v56  ;;  %v1211_v47 = vmul.f32 1.442695, %v6007_v56 }
 0x1a8   :  { %v1099_v40 = vpop.f32.mrf.mxu0 }
 0x1a9   :  { %v1181_v41 = vadd.f32 %v1174_v32, %v1099_v40  ;;  %v1199_v4 = vadd.f32 %v5979_v58, %v1099_v40  ;;  %v6052_v40 = vld [vmem:[#allocation8 + $0xf8] sm:$0xff] }
 0x1aa   :  { %v4334_v34 = vpop.f32.mrf.mxu0 }
 0x1ab   :  { %4956 = vtanh.f32 %v1181_v41  ;;  %v1169_v45 = vpop.f32.mrf.mxu1  ;;  %v1266_v22 = vrot.slane %v1199_v4, 3  ;;  %v6056_v41 = vld [vmem:[#allocation6 + $0xe8] sm:$0xff] }
 0x1ac   :  { %v1182_v37 = vadd.f32 %v1174_v32, %v1169_v45  ;;  %4958 = vpow2.f32 %v1203_v11  ;;  %v1200_v17 = vadd.f32 %v5979_v58, %v1169_v45  ;;  %v6054_v11 = vld [vmem:[#allocation8 + $0xf0] sm:$0xff]  ;;  %v6062_v45 = vld [vmem:[#allocation6 + $0xe0] sm:$0xff] }
 0x1ad   :  { %v4369_v51 = vpop.f32.mrf.mxu1  ;;  %v1267_v18 = vsel %vm1241_vm6, %v1266_v22, %v5992_v31  ;;  %v6040_v31 = vld [vmem:[#allocation6 + $0xf8] sm:$0xff] }
 0x1ae   :  { %4960 = vtanh.f32 %v1182_v37  ;;  %v1268_v24 = vrot.slane %v1200_v17, 2  ;;  %v6064_v37 = vld [vmem:[#allocation8 + $0xe8] sm:$0xff]  ;;  %v6101_v17 = vld [vmem:[#allocation6 + $0xc0] sm:$0xff] }
 0x1af   :  { %4962 = vpow2.f32 %v1205_v30 }
 0x1b0   :  { %4964 = vpow2.f32 %v1207_v43  ;;  %v1269_v58 = vsel %vm1244_vm7, %v1268_v24, %v1267_v18  ;;  %v6109_v24 = vld [vmem:[#allocation8 + $0xc8] sm:$0xff] }
 0x1b1   :  { %4966 = vpow2.f32 %v1209_v12 }
 0x1b2   :  { %4968 = vpow2.f32 %v1201_v55 }
 0x1b3   :  { %4970 = vpow2.f32 %v1211_v47  ;;  %v6072_v47 = vld [vmem:[#allocation8 + $0xe0] sm:$0xff] }
 0x1b8   :  { %v6012_v48 = vpop.eup %4956 }
 0x1b9   :  { %7360 = vst [vmem:[#allocation27_spill] sm:$0xff] %v6012_v48  ;;  %v1213_v13 = vmul.f32 1.442695, %v6012_v48  ;;  %v4959_v57 = vpop.eup %4958 }
 0x1ba   :  { %v1225_v19 = vrot.slane %v4959_v57, 7 }
 0x1bb   :  { %v6015_v15 = vpop.eup %4960  ;;  %4972 = vpow2.f32 %v1213_v13  ;;  %v6074_v13 = vld [vmem:[#allocation6 + $0xd8] sm:$0xff] }
 0x1bc   :  { %7361 = vst [vmem:[#allocation28_spill] sm:$0xff] %v6015_v15  ;;  %v4963_v62 = vpop.eup %4962  ;;  %v1215_v53 = vmul.f32 1.442695, %v6015_v15 }
 0x1bd   :  { %v4965_v59 = vpop.eup %4964  ;;  %v1228_v63 = vrot.slane %v4963_v62, 6 }
 0x1be   :  { %4974 = vpow2.f32 %v1215_v53  ;;  %v4967_v16 = vpop.eup %4966  ;;  %v1231_v49 = vrot.slane %v4965_v59, 5 }
 0x1bf   :  { %v4969_v14 = vpop.eup %4968  ;;  %v1234_v3 = vrot.slane %v4967_v16, 4 }
 0x1c0   :  { %v1227_v52 = vsel %vm1226_vm1, %v1225_v19, %v4969_v14  ;;  %v4971_v61 = vpop.eup %4970  ;;  %v6082_v19 = vld [vmem:[#allocation6 + $0xd0] sm:$0xff]  ;;  %v6086_v14 = vld [vmem:[#allocation8 + $0xd8] sm:$0xff] }
 0x1c1   :  { %v1230_v6 = vsel %vm1229_vm2, %v1228_v63, %v1227_v52  ;;  %v1237_v20 = vrot.slane %v4971_v61, 3 }
 0x1c2   :  { %v1233_v8 = vsel %vm1232_vm3, %v1231_v49, %v1230_v6  ;;  %v6092_v6 = vld [vmem:[#allocation8 + $0xd0] sm:$0xff] }
 0x1c3   :  { %v1236_v27 = vsel %vm1235_vm4, %v1234_v3, %v1233_v8 }
 0x1c4   :  { %v1239_v28 = vsel %vm1238_vm5, %v1237_v20, %v1236_v27 }
 0x1c8   :  { %v4973_v21 = vpop.eup %4972 }
 0x1c9   :  { %v1240_v33 = vrot.slane %v4973_v21, 2  ;;  %v6099_v21 = vld [vmem:[#allocation6 + $0xc8] sm:$0xff] }
 0x1cb   :  { %v4975_v23 = vpop.eup %4974  ;;  %v1242_v36 = vsel %vm1241_vm6, %v1240_v33, %v1239_v28 }
 0x1cc   :  { %v1243_v60 = vrot.slane %v4975_v23, 1 }
 0x1ce   :  { %v1245_v5 = vsel %vm1244_vm7, %v1243_v60, %v1242_v36 }
 0x1cf   :  { %v1247_v42 = vmul.f32 %v5072_v29, %v1245_v5 }
 0x1d1   :  { %v6030_v46 = vadd.f32 %v1269_v58, %v1247_v42  ;;  %v6119_v42 = vld [vmem:[#allocation6 + $0xb8] sm:$0xff] }
 0x1d3   :  { %v1324_v32 = vrot.slane %v6030_v46, %v5383_v7 }
 0x1d5   :  { %v1332_v54 = vcombine.high %v1324_v32, %v1324_v32  ;;  %v6035_v35 = vrot.slane %v1324_v32, %v5383_v7 }
 0x1d7   :  { %v6038_v25 = vrot.slane %v1332_v54, %v5383_v7  ;;  %v6046_v26 = vrot.slane %v6035_v35, %v5387_v9 }
 0x1d9   :  { %v6050_v38 = vrot.slane %v6038_v25, %v5387_v9  ;;  %v1421_v34 = vmul.f32 %v6046_v26, %v6040_v31  ;;  %v1420_v30 = vmul.f32 %v6046_v26, %v6042_v10  ;;  %v1419_v55 = vmul.f32 %v6046_v26, %v6056_v41 }
 0x1da   :  { %v1418_v62 = vmul.f32 %v6046_v26, %v6062_v45  ;;  %v1417_v3 = vmul.f32 %v6046_v26, %v6074_v13  ;;  %v1416_v27 = vmul.f32 %v6046_v26, %v6082_v19  ;;  %v1415_v18 = vmul.f32 %v6046_v26, %v6099_v21 }
 0x1db   :  { %v1549_v51 = vadd.f32 %v1421_v34, %v6052_v40  ;;  %v1548_v43 = vadd.f32 %v1420_v30, %v6054_v11  ;;  %v1437_v12 = vmul.f32 %v6050_v38, %v6040_v31  ;;  %v1436_v57 = vmul.f32 %v6050_v38, %v6042_v10  ;;  %v6122_v34 = vld [vmem:[#allocation8 + $0xc0] sm:$0xff] }
 0x1dc   :  { %v1435_v53 = vmul.f32 %v6050_v38, %v6056_v41  ;;  %v1547_v16 = vadd.f32 %v1419_v55, %v6064_v37  ;;  %v1546_v61 = vadd.f32 %v1418_v62, %v6072_v47  ;;  %v1434_v20 = vmul.f32 %v6050_v38, %v6062_v45 }
 0x1dd   :  { %v1677_v59 = vmax.f32 %v1549_v51, 0.0  ;;  %v1565_v63 = vadd.f32 %v1437_v12, %v6052_v40  ;;  %v1676_v49 = vmax.f32 %v1548_v43, 0.0  ;;  %v1564_v52 = vadd.f32 %v1436_v57, %v6054_v11  ;;  %v6129_v12 = vld [vmem:[#allocation6 + $0xb0] sm:$0xff] }
 0x1de   :  { %v1563_v8 = vadd.f32 %v1435_v53, %v6064_v37  ;;  %v1675_v22 = vmax.f32 %v1547_v16, 0.0  ;;  %v1545_v33 = vadd.f32 %v1417_v3, %v6086_v14  ;;  %v1562_v23 = vadd.f32 %v1434_v20, %v6072_v47 }
 0x1df   :  { %4371 = vmatpush3.msra.mxu0 %v1677_v59  ;;  %v1693_v4 = vmax.f32 %v1565_v63, 0.0  ;;  %v1692_v28 = vmax.f32 %v1564_v52, 0.0  ;;  %v1544_v36 = vadd.f32 %v1416_v27, %v6092_v6  ;;  %v1433_v60 = vmul.f32 %v6050_v38, %v6074_v13  ;;  %v6136_v59 = vld [vmem:[#allocation6 + $0xa8] sm:$0xff]  ;;  %v6152_v27 = vld [vmem:[#allocation8 + $0xb0] sm:$0xff] }
 0x1e0   :  { %4372 = vmatprep.subr.mxu0 %v7349_v1  ;;  %v1432_v5 = vmul.f32 %v6050_v38, %v6082_v19  ;;  %v1414_v29 = vmul.f32 %v6046_v26, %v6101_v17  ;;  %v1674_v58 = vmax.f32 %v1546_v61, 0.0  ;;  %v1691_v32 = vmax.f32 %v1563_v8, 0.0  ;;  %v6148_v8 = vld [vmem:[#allocation6 + $0xa0] sm:$0xff] }
 0x1e1   :  { %4373 = vmatpush3.msra.mxu0 %v1676_v49  ;;  %4406 = vmatpush3.msra.mxu1 %v1693_v4  ;;  %v1561_v54 = vadd.f32 %v1433_v60, %v6086_v14  ;;  %v1431_v30 = vmul.f32 %v6050_v38, %v6099_v21  ;;  %v1673_v51 = vmax.f32 %v1545_v33, 0.0  ;;  %v1543_v43 = vadd.f32 %v1415_v18, %v6109_v24  ;;  %v6141_v49 = vld [vmem:[#allocation8 + $0xb8] sm:$0xff] }
 0x1e2   :  { %4374 = vmatprep.subr.mxu0 %v7349_v1  ;;  %4407 = vmatprep.subr.mxu1 %v7349_v1  ;;  %v1690_v55 = vmax.f32 %v1562_v23, 0.0  ;;  %v1560_v57 = vadd.f32 %v1432_v5, %v6092_v6  ;;  %v1413_v62 = vmul.f32 %v6046_v26, %v6119_v42  ;;  %v1430_v53 = vmul.f32 %v6050_v38, %v6101_v17  ;;  %v6162_v18 = vld [vmem:[#allocation6 + $0x98] sm:$0xff] }
 0x1e3   :  { %4375 = vmatpush3.msra.mxu0 %v1675_v22  ;;  %4408 = vmatpush3.msra.mxu1 %v1692_v28  ;;  %v1672_v63 = vmax.f32 %v1544_v36, 0.0  ;;  %v1542_v16 = vadd.f32 %v1414_v29, %v6122_v34  ;;  %v1689_v52 = vmax.f32 %v1561_v54, 0.0  ;;  %v1559_v61 = vadd.f32 %v1431_v30, %v6109_v24  ;;  %v6158_v36 = vld [vmem:[#allocation8 + $0xa8] sm:$0xff]  ;;  %v6170_v30 = vld [vmem:[#allocation8 + $0xa0] sm:$0xff] }
 0x1e4   :  { %4376 = vmatprep.subr.mxu0 %v7349_v1  ;;  %4409 = vmatprep.subr.mxu1 %v7349_v1  ;;  %v1412_v3 = vmul.f32 %v6046_v26, %v6129_v12  ;;  %v1429_v4 = vmul.f32 %v6050_v38, %v6119_v42  ;;  %v1671_v20 = vmax.f32 %v1543_v43, 0.0  ;;  %v1411_v22 = vmul.f32 %v6046_v26, %v6136_v59  ;;  %v6174_v43 = vld [vmem:[#allocation6 + $0x90] sm:$0xff] }
 0x1e5   :  { %4377 = vmatpush3.msra.mxu0 %v1674_v58  ;;  %4410 = vmatpush3.msra.mxu1 %v1691_v32  ;;  %v1688_v33 = vmax.f32 %v1560_v57, 0.0  ;;  %v1541_v28 = vadd.f32 %v1413_v62, %v6141_v49  ;;  %v1558_v23 = vadd.f32 %v1430_v53, %v6122_v34  ;;  %v1428_v60 = vmul.f32 %v6050_v38, %v6129_v12 }
 0x1e6   :  { %4378 = vmatprep.subr.mxu0 %v7349_v1  ;;  %4411 = vmatprep.subr.mxu1 %v7349_v1  ;;  %v1670_v5 = vmax.f32 %v1542_v16, 0.0  ;;  %v1410_v29 = vmul.f32 %v6046_v26, %v6148_v8  ;;  %v1687_v58 = vmax.f32 %v1559_v61, 0.0  ;;  %v1540_v32 = vadd.f32 %v1412_v3, %v6152_v27  ;;  %v6182_v16 = vld [vmem:[#allocation8 + $0x98] sm:$0xff] }
 0x1e7   :  { %4379 = vmatpush3.msra.mxu0 %v1673_v51  ;;  %4412 = vmatpush3.msra.mxu1 %v1690_v55  ;;  %v1557_v54 = vadd.f32 %v1429_v4, %v6141_v49  ;;  %v1427_v51 = vmul.f32 %v6050_v38, %v6136_v59  ;;  %v1539_v55 = vadd.f32 %v1411_v22, %v6158_v36  ;;  %v1669_v62 = vmax.f32 %v1541_v28, 0.0 }
 0x1e8   :  { %4380 = vmatprep.subr.mxu0 %v7349_v1  ;;  %4413 = vmatprep.subr.mxu1 %v7349_v1  ;;  %v1409_v57 = vmul.f32 %v6046_v26, %v6162_v18  ;;  %v1686_v53 = vmax.f32 %v1558_v23, 0.0  ;;  %v1362_v61 = vcombine.high %v6035_v35, %v6035_v35  ;;  %v1538_v3 = vadd.f32 %v1410_v29, %v6170_v30  ;;  %v6196_v23 = vld [vmem:[#allocation8 + $0x90] sm:$0xff] }
 0x1e9   :  { %4381 = vmatpush3.msra.mxu0 %v1672_v63  ;;  %4414 = vmatpush3.msra.mxu1 %v1689_v52  ;;  %v1556_v63 = vadd.f32 %v1428_v60, %v6152_v27  ;;  %v1426_v52 = vmul.f32 %v6050_v38, %v6148_v8  ;;  %v1408_v4 = vmul.f32 %v6046_v26, %v6174_v43  ;;  %v1668_v22 = vmax.f32 %v1540_v32, 0.0 }
 0x1ea   :  { %4382 = vmatprep.subr.mxu0 %v7349_v1  ;;  %4415 = vmatprep.subr.mxu1 %v7349_v1  ;;  %v1555_v28 = vadd.f32 %v1427_v51, %v6158_v36  ;;  %v1425_v35 = vmul.f32 %v6050_v38, %v6162_v18  ;;  %v1364_v60 = vcombine.high %v6038_v25, %v6038_v25 }
 0x1eb   :  { %4383 = vmatpush3.msra.mxu0 %v1671_v20  ;;  %4416 = vmatpush3.msra.mxu1 %v1688_v33  ;;  %v6193_v20 = vld [vmem:[#allocation6 + $0x88] sm:$0xff]  ;;  %v1685_v33 = vmax.f32 %v1557_v54, 0.0  ;;  %v1537_v29 = vadd.f32 %v1409_v57, %v6182_v16  ;;  %v1684_v32 = vmax.f32 %v1556_v63, 0.0  ;;  %v1554_v54 = vadd.f32 %v1426_v52, %v6170_v30 }
 0x1ec   :  { %4384 = vmatprep.subr.mxu0 %v7349_v1  ;;  %4417 = vmatprep.subr.mxu1 %v7349_v1  ;;  %v1407_v51 = vmul.f32 %v6046_v26, %v6193_v20  ;;  %v1424_v25 = vmul.f32 %v6050_v38, %v6174_v43  ;;  %v1536_v57 = vadd.f32 %v1408_v4, %v6196_v23  ;;  %v1683_v63 = vmax.f32 %v1555_v28, 0.0  ;;  %v6230_v4 = vld [vmem:[#allocation8 + $0x80] sm:$0xff] }
 0x1ed   :  { %4385 = vmatpush3.msra.mxu0 %v1670_v5  ;;  %4418 = vmatpush3.msra.mxu1 %v1687_v58  ;;  %v1667_v5 = vmax.f32 %v1539_v55, 0.0  ;;  %v6205_v58 = vld [vmem:[#allocation6 + $0x80] sm:$0xff]  ;;  %v1666_v55 = vmax.f32 %v1538_v3, 0.0  ;;  %v1553_v52 = vadd.f32 %v1425_v35, %v6182_v16  ;;  %v1665_v3 = vmax.f32 %v1537_v29, 0.0 }
 0x1ee   :  { %4386 = vmatprep.subr.mxu0 %v7349_v1  ;;  %4419 = vmatprep.subr.mxu1 %v7349_v1  ;;  %v1682_v28 = vmax.f32 %v1554_v54, 0.0  ;;  %v1664_v29 = vmax.f32 %v1536_v57, 0.0 }
 0x1ef   :  { %4387 = vmatpush3.msra.mxu0 %v1669_v62  ;;  %4420 = vmatpush3.msra.mxu1 %v1686_v53  ;;  %v6213_v62 = vrot.slane %v1362_v61, %v5387_v9  ;;  %v6218_v53 = vld [vmem:[#allocation8 + $0x88] sm:$0xff]  ;;  %v1423_v61 = vmul.f32 %v6050_v38, %v6193_v20 }
 0x1f0   :  { %4388 = vmatprep.subr.mxu0 %v7349_v1  ;;  %4421 = vmatprep.subr.mxu1 %v7349_v1  ;;  %v1535_v35 = vadd.f32 %v1407_v51, %v6218_v53 }
 0x1f1   :  { %4389 = vmatpush3.msra.mxu0 %v1668_v22  ;;  %4422 = vmatpush3.msra.mxu1 %v1685_v33  ;;  %v1406_v22 = vmul.f32 %v6046_v26, %v6205_v58  ;;  %v6226_v33 = vrot.slane %v1364_v60, %v5387_v9  ;;  %v1552_v26 = vadd.f32 %v1424_v25, %v6196_v23 }
 0x1f2   :  { %4390 = vmatprep.subr.mxu0 %v7349_v1  ;;  %4423 = vmatprep.subr.mxu1 %v7349_v1  ;;  %v1453_v60 = vmul.f32 %v6213_v62, %v6040_v31  ;;  %v1551_v51 = vadd.f32 %v1423_v61, %v6218_v53  ;;  %v1443_v48 = vmul.f32 %v6213_v62, %v6136_v59 }
 0x1f3   :  { %4391 = vmatpush3.msra.mxu0 %v1667_v5  ;;  %4424 = vmatpush3.msra.mxu1 %v1684_v32  ;;  %v1422_v5 = vmul.f32 %v6050_v38, %v6205_v58  ;;  %v1681_v32 = vmax.f32 %v1553_v52, 0.0  ;;  %v1534_v54 = vadd.f32 %v1406_v22, %v6230_v4  ;;  %v1452_v38 = vmul.f32 %v6213_v62, %v6042_v10 }
 0x1f4   :  { %4392 = vmatprep.subr.mxu0 %v7349_v1  ;;  %4425 = vmatprep.subr.mxu1 %v7349_v1  ;;  %v1469_v25 = vmul.f32 %v6226_v33, %v6040_v31  ;;  %v1581_v52 = vadd.f32 %v1453_v60, %v6052_v40  ;;  %v1451_v22 = vmul.f32 %v6213_v62, %v6056_v41 }
 0x1f5   :  { %4393 = vmatpush3.msra.mxu0 %v1666_v55  ;;  %4426 = vmatpush3.msra.mxu1 %v1683_v63  ;;  %v1663_v55 = vmax.f32 %v1535_v35, 0.0  ;;  %v1680_v63 = vmax.f32 %v1552_v26, 0.0  ;;  %v1550_v57 = vadd.f32 %v1422_v5, %v6230_v4  ;;  %v1468_v61 = vmul.f32 %v6226_v33, %v6042_v10  ;;  %v6256_v35 = vld [vmem:[#allocation9 + $0x8] sm:$0xff] }
 0x1f6   :  { %4394 = vmatprep.subr.mxu0 %v7349_v1  ;;  %4427 = vmatprep.subr.mxu1 %v7349_v1  ;;  %v1450_v26 = vmul.f32 %v6213_v62, %v6062_v45  ;;  %v1580_v5 = vadd.f32 %v1452_v38, %v6054_v11  ;;  %v1597_v60 = vadd.f32 %v1469_v25, %v6052_v40 }
 0x1f7   :  { %4395 = vmatpush3.msra.mxu0 %v1665_v3  ;;  %4428 = vmatpush3.msra.mxu1 %v1682_v28  ;;  %v1662_v3 = vmax.f32 %v1534_v54, 0.0  ;;  %v1679_v28 = vmax.f32 %v1551_v51, 0.0  ;;  %v1449_v54 = vmul.f32 %v6213_v62, %v6074_v13  ;;  %v1709_v51 = vmax.f32 %v1581_v52, 0.0 }
 0x1f8   :  { %4396 = vmatprep.subr.mxu0 %v7349_v1  ;;  %4429 = vmatprep.subr.mxu1 %v7349_v1  ;;  %v1596_v38 = vadd.f32 %v1468_v61, %v6054_v11  ;;  %v1466_v25 = vmul.f32 %v6226_v33, %v6062_v45  ;;  %v1725_v52 = vmax.f32 %v1597_v60, 0.0  ;;  %v1465_v61 = vmul.f32 %v6226_v33, %v6074_v13 }
 0x1f9   :  { %4397 = vmatpush3.msra.mxu0 %v1664_v29  ;;  %4430 = vmatpush3.msra.mxu1 %v1681_v32  ;;  %v1467_v29 = vmul.f32 %v6226_v33, %v6056_v41  ;;  %v1678_v32 = vmax.f32 %v1550_v57, 0.0  ;;  %v1448_v57 = vmul.f32 %v6213_v62, %v6082_v19  ;;  %v1464_v60 = vmul.f32 %v6226_v33, %v6082_v19 }
 0x1fa   :  { %4398 = vmatprep.subr.mxu0 %v7349_v1  ;;  %4431 = vmatprep.subr.mxu1 %v7349_v1 }
 0x1fb   :  { %4399 = vmatpush3.msra.mxu0 %v1663_v55  ;;  %4432 = vmatpush3.msra.mxu1 %v1680_v63  ;;  %v1579_v55 = vadd.f32 %v1451_v22, %v6064_v37  ;;  %v1578_v63 = vadd.f32 %v1450_v26, %v6072_v47  ;;  %v1595_v22 = vadd.f32 %v1467_v29, %v6064_v37 }
 0x1fc   :  { %4400 = vmatprep.subr.mxu0 %v7349_v1  ;;  %4433 = vmatprep.subr.mxu1 %v7349_v1  ;;  %v1447_v26 = vmul.f32 %v6213_v62, %v6099_v21  ;;  %v1576_v15 = vadd.f32 %v1448_v57, %v6092_v6 }
 0x1fd   :  { %4401 = vmatpush3.msra.mxu0 %v1662_v3  ;;  %4434 = vmatpush3.msra.mxu1 %v1679_v28  ;;  %v1708_v3 = vmax.f32 %v1580_v5, 0.0  ;;  %v1577_v28 = vadd.f32 %v1449_v54, %v6086_v14  ;;  %v1594_v5 = vadd.f32 %v1466_v25, %v6072_v47  ;;  %v1706_v29 = vmax.f32 %v1578_v63, 0.0 }
 0x1fe   :  { %4403 = vmatmul.mubr.f32.vlgmr.msra.gmra.mxu0 %v6256_v35  ;;  %4435 = vmatprep.subr.mxu1 %v7349_v1  ;;  %v1723_v54 = vmax.f32 %v1595_v22, 0.0  ;;  %v1317_v25 = vcombine.high %v6030_v46, %v6030_v46  ;;  %v1575_v57 = vadd.f32 %v1447_v26, %v6109_v24  ;;  %v1592_v22 = vadd.f32 %v1464_v60, %v6092_v6 }
 0x1ff   :  { %4440 = vmatprep.subr.mxu0 %v7349_v1  ;;  %4436 = vmatpush3.msra.mxu1 %v1678_v32  ;;  %v1707_v32 = vmax.f32 %v1579_v55, 0.0  ;;  %v1446_v55 = vmul.f32 %v6213_v62, %v6101_v17  ;;  %v1705_v63 = vmax.f32 %v1577_v28, 0.0  ;;  %v1444_v28 = vmul.f32 %v6213_v62, %v6129_v12 }
 0x200   :  { %4441 = vmatpush3.msra.mxu0 %v1709_v51  ;;  %4438 = vmatmul.mubr.f32.vlgmr.msra.gmra.mxu1 %v6256_v35  ;;  %v1724_v51 = vmax.f32 %v1596_v38, 0.0  ;;  %v1463_v38 = vmul.f32 %v6226_v33, %v6099_v21 }
 0x201   :  { %4442 = vmatprep.subr.mxu0 %v7349_v1  ;;  %4475 = vmatprep.subr.mxu1 %v7349_v1 }
 0x202   :  { %4443 = vmatpush3.msra.mxu0 %v1708_v3  ;;  %4476 = vmatpush3.msra.mxu1 %v1725_v52  ;;  %v1593_v3 = vadd.f32 %v1465_v61, %v6086_v14  ;;  %v1722_v52 = vmax.f32 %v1594_v5, 0.0  ;;  %v1445_v61 = vmul.f32 %v6213_v62, %v6119_v42  ;;  %v1574_v5 = vadd.f32 %v1446_v55, %v6122_v34 }
 0x203   :  { %4444 = vmatprep.subr.mxu0 %v7349_v1  ;;  %4477 = vmatprep.subr.mxu1 %v7349_v1  ;;  %v1591_v60 = vadd.f32 %v1463_v38, %v6109_v24 }
 0x204   :  { %4445 = vmatpush3.msra.mxu0 %v1707_v32  ;;  %4478 = vmatpush3.msra.mxu1 %v1724_v51  ;;  %v1462_v32 = vmul.f32 %v6226_v33, %v6101_v17  ;;  %v1704_v51 = vmax.f32 %v1576_v15, 0.0  ;;  %v1721_v26 = vmax.f32 %v1593_v3, 0.0  ;;  %v1703_v15 = vmax.f32 %v1575_v57, 0.0 }
 0x205   :  { %4446 = vmatprep.subr.mxu0 %v7349_v1  ;;  %4479 = vmatprep.subr.mxu1 %v7349_v1  ;;  %v1720_v3 = vmax.f32 %v1592_v22, 0.0  ;;  %v1573_v55 = vadd.f32 %v1445_v61, %v6141_v49  ;;  %v1442_v57 = vmul.f32 %v6213_v62, %v6148_v8  ;;  %v1719_v22 = vmax.f32 %v1591_v60, 0.0 }
 0x206   :  { %4447 = vmatpush3.msra.mxu0 %v1706_v29  ;;  %4480 = vmatpush3.msra.mxu1 %v1723_v54  ;;  %v1461_v29 = vmul.f32 %v6226_v33, %v6119_v42  ;;  %v1331_v54 = vrot.slane %v1317_v25, %v5383_v7  ;;  %v1590_v38 = vadd.f32 %v1462_v32, %v6122_v34 }
 0x207   :  { %4448 = vmatprep.subr.mxu0 %v7349_v1  ;;  %4481 = vmatprep.subr.mxu1 %v7349_v1  ;;  %v1572_v25 = vadd.f32 %v1444_v28, %v6152_v27  ;;  %v1459_v32 = vmul.f32 %v6226_v33, %v6136_v59  ;;  %v1441_v28 = vmul.f32 %v6213_v62, %v6162_v18 }
 0x208   :  { %4449 = vmatpush3.msra.mxu0 %v1705_v63  ;;  %4482 = vmatpush3.msra.mxu1 %v1722_v52  ;;  %v1460_v63 = vmul.f32 %v6226_v33, %v6129_v12  ;;  %v1702_v52 = vmax.f32 %v1574_v5, 0.0  ;;  %v1589_v61 = vadd.f32 %v1461_v29, %v6141_v49  ;;  %v1718_v5 = vmax.f32 %v1590_v38, 0.0 }
 0x209   :  { %4450 = vmatprep.subr.mxu0 %v7349_v1  ;;  %4483 = vmatprep.subr.mxu1 %v7349_v1  ;;  %v1458_v29 = vmul.f32 %v6226_v33, %v6148_v8  ;;  %v1570_v56 = vadd.f32 %v1442_v57, %v6170_v30  ;;  %v1440_v38 = vmul.f32 %v6213_v62, %v6174_v43 }
 0x20a   :  { %4451 = vmatpush3.msra.mxu0 %v1704_v51  ;;  %4484 = vmatpush3.msra.mxu1 %v1721_v26  ;;  %v1333_v51 = vcombine.high %v1331_v54, %v1331_v54  ;;  %v1571_v26 = vadd.f32 %v1443_v48, %v6158_v36  ;;  %v1588_v60 = vadd.f32 %v1460_v63, %v6152_v27  ;;  %v1700_v48 = vmax.f32 %v1572_v25, 0.0 }
 0x20b   :  { %4452 = vmatprep.subr.mxu0 %v7349_v1  ;;  %4485 = vmatprep.subr.mxu1 %v7349_v1  ;;  %v1457_v63 = vmul.f32 %v6226_v33, %v6162_v18  ;;  %v1569_v57 = vadd.f32 %v1441_v28, %v6182_v16 }
 0x20c   :  { %4453 = vmatpush3.msra.mxu0 %v1703_v15  ;;  %4486 = vmatpush3.msra.mxu1 %v1720_v3  ;;  %v1701_v15 = vmax.f32 %v1573_v55, 0.0  ;;  %v6342_v3 = vrot.slane %v1331_v54, %v5383_v7  ;;  %v1587_v55 = vadd.f32 %v1459_v32, %v6158_v36  ;;  %v6353_v54 = vrot.slane %v1333_v51, %v5383_v7 }
 0x20d   :  { %4454 = vmatprep.subr.mxu0 %v7349_v1  ;;  %4487 = vmatprep.subr.mxu1 %v7349_v1  ;;  %v1699_v25 = vmax.f32 %v1571_v26, 0.0  ;;  %v1439_v32 = vmul.f32 %v6213_v62, %v6193_v20  ;;  %v1698_v26 = vmax.f32 %v1570_v56, 0.0  ;;  %v1455_v56 = vmul.f32 %v6226_v33, %v6193_v20 }
 0x20e   :  { %4455 = vmatpush3.msra.mxu0 %v1702_v52  ;;  %4488 = vmatpush3.msra.mxu1 %v1719_v22  ;;  %v1717_v52 = vmax.f32 %v1589_v61, 0.0  ;;  %v1716_v22 = vmax.f32 %v1588_v60, 0.0  ;;  %v1586_v61 = vadd.f32 %v1458_v29, %v6170_v30  ;;  %v6365_v51 = vrot.slane %v6342_v3, %v5387_v9 }
 0x20f   :  { %4456 = vmatprep.subr.mxu0 %v7349_v1  ;;  %4489 = vmatprep.subr.mxu1 %v7349_v1  ;;  %v1715_v28 = vmax.f32 %v1587_v55, 0.0  ;;  %v1585_v60 = vadd.f32 %v1457_v63, %v6182_v16  ;;  %v1438_v29 = vmul.f32 %v6213_v62, %v6205_v58  ;;  %v1454_v62 = vmul.f32 %v6226_v33, %v6205_v58 }
 0x210   :  { %4457 = vmatpush3.msra.mxu0 %v1701_v15  ;;  %4490 = vmatpush3.msra.mxu1 %v1718_v5  ;;  %v1456_v15 = vmul.f32 %v6226_v33, %v6174_v43  ;;  %v1568_v5 = vadd.f32 %v1440_v38, %v6196_v23  ;;  %v1714_v55 = vmax.f32 %v1586_v61, 0.0  ;;  %v1567_v38 = vadd.f32 %v1439_v32, %v6218_v53 }
 0x211   :  { %4458 = vmatprep.subr.mxu0 %v7349_v1  ;;  %4491 = vmatprep.subr.mxu1 %v7349_v1  ;;  %v1583_v61 = vadd.f32 %v1455_v56, %v6218_v53  ;;  %v1484_v33 = vmul.f32 %v6365_v51, %v6042_v10  ;;  %v1483_v56 = vmul.f32 %v6365_v51, %v6056_v41 }
 0x212   :  { %4459 = vmatpush3.msra.mxu0 %v1700_v48  ;;  %4492 = vmatpush3.msra.mxu1 %v1717_v52  ;;  %v6375_v48 = vrot.slane %v6353_v54, %v5387_v9  ;;  %v1697_v52 = vmax.f32 %v1569_v57, 0.0  ;;  %v1584_v63 = vadd.f32 %v1456_v15, %v6196_v23  ;;  %v1485_v57 = vmul.f32 %v6365_v51, %v6040_v31 }
 0x213   :  { %4460 = vmatprep.subr.mxu0 %v7349_v1  ;;  %4493 = vmatprep.subr.mxu1 %v7349_v1  ;;  %v1695_v32 = vmax.f32 %v1567_v38, 0.0  ;;  %v1612_v38 = vadd.f32 %v1484_v33, %v6054_v11 }
 0x214   :  { %4461 = vmatpush3.msra.mxu0 %v1699_v25  ;;  %4494 = vmatpush3.msra.mxu1 %v1716_v22  ;;  %v1696_v25 = vmax.f32 %v1568_v5, 0.0  ;;  %v1713_v22 = vmax.f32 %v1585_v60, 0.0  ;;  %v1712_v15 = vmax.f32 %v1584_v63, 0.0  ;;  %v1582_v5 = vadd.f32 %v1454_v62, %v6230_v4 }
 0x215   :  { %4462 = vmatprep.subr.mxu0 %v7349_v1  ;;  %4495 = vmatprep.subr.mxu1 %v7349_v1  ;;  %v1499_v62 = vmul.f32 %v6375_v48, %v6056_v41 }
 0x216   :  { %4463 = vmatpush3.msra.mxu0 %v1698_v26  ;;  %4496 = vmatpush3.msra.mxu1 %v1715_v28  ;;  %v1566_v26 = vadd.f32 %v1438_v29, %v6230_v4  ;;  %v1501_v28 = vmul.f32 %v6375_v48, %v6040_v31  ;;  %v1613_v29 = vadd.f32 %v1485_v57, %v6052_v40  ;;  %v1711_v31 = vmax.f32 %v1583_v61, 0.0 }
 0x217   :  { %4464 = vmatprep.subr.mxu0 %v7349_v1  ;;  %4497 = vmatprep.subr.mxu1 %v7349_v1  ;;  %v1480_v61 = vmul.f32 %v6365_v51, %v6082_v19  ;;  %v1627_v33 = vadd.f32 %v1499_v62, %v6064_v37 }
 0x218   :  { %4465 = vmatpush3.msra.mxu0 %v1697_v52  ;;  %4498 = vmatpush3.msra.mxu1 %v1714_v55  ;;  %v1694_v60 = vmax.f32 %v1566_v26, 0.0  ;;  %v1500_v52 = vmul.f32 %v6375_v48, %v6042_v10  ;;  %v1482_v55 = vmul.f32 %v6365_v51, %v6062_v45  ;;  %v1629_v63 = vadd.f32 %v1501_v28, %v6052_v40 }
 0x219   :  { %4466 = vmatprep.subr.mxu0 %v7349_v1  ;;  %4499 = vmatprep.subr.mxu1 %v7349_v1  ;;  %v1710_v10 = vmax.f32 %v1582_v5, 0.0  ;;  %v1611_v26 = vadd.f32 %v1483_v56, %v6064_v37  ;;  %v1498_v40 = vmul.f32 %v6375_v48, %v6062_v45  ;;  %v1479_v28 = vmul.f32 %v6365_v51, %v6099_v21 }
 0x21a   :  { %4467 = vmatpush3.msra.mxu0 %v1696_v25  ;;  %4500 = vmatpush3.msra.mxu1 %v1713_v22  ;;  %v1481_v25 = vmul.f32 %v6365_v51, %v6074_v13  ;;  %v1741_v22 = vmax.f32 %v1613_v29, 0.0  ;;  %v1628_v57 = vadd.f32 %v1500_v52, %v6054_v11  ;;  %v1610_v41 = vadd.f32 %v1482_v55, %v6072_v47 }
 0x21b   :  { %4468 = vmatprep.subr.mxu0 %v7349_v1  ;;  %4501 = vmatprep.subr.mxu1 %v7349_v1  ;;  %v1497_v11 = vmul.f32 %v6375_v48, %v6074_v13  ;;  %v1739_v5 = vmax.f32 %v1611_v26, 0.0  ;;  %v1626_v29 = vadd.f32 %v1498_v40, %v6072_v47  ;;  %v1496_v37 = vmul.f32 %v6375_v48, %v6082_v19 }
 0x21c   :  { %4469 = vmatpush3.msra.mxu0 %v1695_v32  ;;  %4502 = vmatpush3.msra.mxu1 %v1712_v15  ;;  %v1740_v32 = vmax.f32 %v1612_v38, 0.0  ;;  %v1757_v15 = vmax.f32 %v1629_v63, 0.0  ;;  %v1609_v45 = vadd.f32 %v1481_v25, %v6086_v14  ;;  %v1738_v13 = vmax.f32 %v1610_v41, 0.0 }
 0x21d   :  { %4470 = vmatprep.subr.mxu0 %v7349_v1  ;;  %4503 = vmatprep.subr.mxu1 %v7349_v1  ;;  %v1608_v56 = vadd.f32 %v1480_v61, %v6092_v6  ;;  %v1755_v52 = vmax.f32 %v1627_v33, 0.0  ;;  %v1478_v55 = vmul.f32 %v6365_v51, %v6101_v17  ;;  %v1495_v47 = vmul.f32 %v6375_v48, %v6099_v21 }
 0x21e   :  { %4471 = vmatpush3.msra.mxu0 %v1694_v60  ;;  %4472 = vmatprep.mubr.msk.f32.mxu0 %vm5305_vm0, %v7349_v1  ;;  %v1756_v60 = vmax.f32 %v1628_v57, 0.0  ;;  %v1737_v19 = vmax.f32 %v1609_v45, 0.0  ;;  %v1607_v38 = vadd.f32 %v1479_v28, %v6109_v24  ;;  %v1754_v63 = vmax.f32 %v1626_v29, 0.0 }
 0x21f   :  { %4504 = vmatpush3.msra.mxu1 %v1711_v31  ;;  %4473 = vmatmul.mubr.f32.vlgmr.msra.gmra.mxu0 %v6256_v35  ;;  %v1625_v31 = vadd.f32 %v1497_v11, %v6086_v14  ;;  %v1624_v62 = vadd.f32 %v1496_v37, %v6092_v6  ;;  %v1477_v14 = vmul.f32 %v6365_v51, %v6119_v42  ;;  %v1736_v21 = vmax.f32 %v1608_v56, 0.0 }
 0x220   :  { %4505 = vmatprep.subr.mxu1 %v7349_v1  ;;  %4510 = vmatprep.subr.mxu0 %v7349_v1  ;;  %v1476_v25 = vmul.f32 %v6365_v51, %v6129_v12  ;;  %v1606_v26 = vadd.f32 %v1478_v55, %v6122_v34  ;;  %v1623_v6 = vadd.f32 %v1495_v47, %v6109_v24 }
 0x221   :  { %4506 = vmatpush3.msra.mxu1 %v1710_v10  ;;  %4507 = vmatprep.mubr.msk.f32.mxu1 %vm5305_vm0, %v7349_v1  ;;  %v1494_v10 = vmul.f32 %v6375_v48, %v6101_v17  ;;  %v1493_v57 = vmul.f32 %v6375_v48, %v6119_v42  ;;  %v1735_v17 = vmax.f32 %v1607_v38, 0.0  ;;  %v1475_v40 = vmul.f32 %v6365_v51, %v6136_v59 }
 0x222   :  { %4511 = vmatpush3.msra.mxu0 %v1741_v22  ;;  %4508 = vmatmul.mubr.f32.vlgmr.msra.gmra.mxu1 %v6256_v35  ;;  %v1753_v22 = vmax.f32 %v1625_v31, 0.0  ;;  %v1752_v41 = vmax.f32 %v1624_v62, 0.0  ;;  %v1605_v61 = vadd.f32 %v1477_v14, %v6141_v49  ;;  %v1492_v24 = vmul.f32 %v6375_v48, %v6129_v12 }
 0x223   :  { %4512 = vmatprep.subr.mxu0 %v7349_v1  ;;  %4545 = vmatprep.subr.mxu1 %v7349_v1  ;;  %v1604_v42 = vadd.f32 %v1476_v25, %v6152_v27  ;;  %v1734_v33 = vmax.f32 %v1606_v26, 0.0  ;;  %v1751_v11 = vmax.f32 %v1623_v6, 0.0  ;;  %v1621_v45 = vadd.f32 %v1493_v57, %v6141_v49  ;;  %v5073_v57 = vld [vmem:[#allocation6 + $0xf8] sm:$0xff] }
 0x224   :  { %4513 = vmatpush3.msra.mxu0 %v1740_v32  ;;  %4546 = vmatpush3.msra.mxu1 %v1757_v15  ;;  %v1622_v32 = vadd.f32 %v1494_v10, %v6122_v34  ;;  %v1474_v15 = vmul.f32 %v6365_v51, %v6148_v8  ;;  %v1491_v34 = vmul.f32 %v6375_v48, %v6136_v59 }
 0x225   :  { %4514 = vmatprep.subr.mxu0 %v7349_v1  ;;  %4547 = vmatprep.subr.mxu1 %v7349_v1  ;;  %v1603_v12 = vadd.f32 %v1475_v40, %v6158_v36  ;;  %v1473_v28 = vmul.f32 %v6365_v51, %v6162_v18  ;;  %v1620_v29 = vadd.f32 %v1492_v24, %v6152_v27  ;;  %v1732_v37 = vmax.f32 %v1604_v42, 0.0  ;;  %v5075_v42 = vld [vmem:[#allocation8 + $0xf8] sm:$0xff] }
 0x226   :  { %4515 = vmatpush3.msra.mxu0 %v1739_v5  ;;  %4548 = vmatpush3.msra.mxu1 %v1756_v60  ;;  %v1733_v5 = vmax.f32 %v1605_v61, 0.0  ;;  %v1750_v60 = vmax.f32 %v1622_v32, 0.0  ;;  %v1490_v49 = vmul.f32 %v6375_v48, %v6148_v8  ;;  %v1363_v59 = vcombine.high %v6342_v3, %v6342_v3 }
 0x227   :  { %4516 = vmatprep.subr.mxu0 %v7349_v1  ;;  %4549 = vmatprep.subr.mxu1 %v7349_v1  ;;  %v1749_v56 = vmax.f32 %v1621_v45, 0.0  ;;  %v1472_v27 = vmul.f32 %v6365_v51, %v6174_v43  ;;  %v1489_v8 = vmul.f32 %v6375_v48, %v6162_v18  ;;  %v1365_v3 = vcombine.high %v6353_v54, %v6353_v54 }
 0x228   :  { %4517 = vmatpush3.msra.mxu0 %v1738_v13  ;;  %4550 = vmatpush3.msra.mxu1 %v1755_v52  ;;  %v1602_v13 = vadd.f32 %v1474_v15, %v6170_v30  ;;  %v1619_v52 = vadd.f32 %v1491_v34, %v6158_v36  ;;  %v1731_v31 = vmax.f32 %v1603_v12, 0.0  ;;  %v1601_v55 = vadd.f32 %v1473_v28, %v6182_v16  ;;  %v5076_v15 = vld [vmem:[#allocation6 + $0xe8] sm:$0xff]  ;;  %v5077_v34 = vld [vmem:[#allocation6 + $0xe0] sm:$0xff] }
 0x229   :  { %4518 = vmatprep.subr.mxu0 %v7349_v1  ;;  %4551 = vmatprep.subr.mxu1 %v7349_v1  ;;  %v1748_v47 = vmax.f32 %v1620_v29, 0.0  ;;  %v1618_v36 = vadd.f32 %v1490_v49, %v6170_v30  ;;  %v1488_v18 = vmul.f32 %v6375_v48, %v6174_v43  ;;  %v6510_v54 = vrot.slane %v1363_v59, %v5387_v9  ;;  %v5079_v49 = vld [vmem:[#allocation6 + $0xd8] sm:$0xff] }
 0x22a   :  { %4519 = vmatpush3.msra.mxu0 %v1737_v19  ;;  %4552 = vmatpush3.msra.mxu1 %v1754_v63  ;;  %v1471_v19 = vmul.f32 %v6365_v51, %v6193_v20  ;;  %v1730_v38 = vmax.f32 %v1602_v13, 0.0  ;;  %v1747_v63 = vmax.f32 %v1619_v52, 0.0  ;;  %v1600_v62 = vadd.f32 %v1472_v27, %v6196_v23  ;;  %v5080_v13 = vld [vmem:[#allocation8 + $0xe8] sm:$0xff] }
 0x22b   :  { %4520 = vmatprep.subr.mxu0 %v7349_v1  ;;  %4553 = vmatprep.subr.mxu1 %v7349_v1  ;;  %v1617_v30 = vadd.f32 %v1489_v8, %v6182_v16  ;;  %v1470_v14 = vmul.f32 %v6365_v51, %v6205_v58  ;;  %v6519_v43 = vrot.slane %v1365_v3, %v5387_v9  ;;  %v1746_v25 = vmax.f32 %v1618_v36, 0.0  ;;  %v5081_v8 = vld [vmem:[#allocation8 + $0xe0] sm:$0xff] }
 0x22c   :  { %4521 = vmatpush3.msra.mxu0 %v1736_v21  ;;  %4554 = vmatpush3.msra.mxu1 %v1753_v22  ;;  %v1487_v10 = vmul.f32 %v6375_v48, %v6193_v20  ;;  %v1729_v21 = vmax.f32 %v1601_v55, 0.0  ;;  %v1599_v22 = vadd.f32 %v1471_v19, %v6218_v53  ;;  %v1616_v16 = vadd.f32 %v1488_v18, %v6196_v23 }
 0x22d   :  { %4522 = vmatprep.subr.mxu0 %v7349_v1  ;;  %4555 = vmatprep.subr.mxu1 %v7349_v1  ;;  %v1486_v51 = vmul.f32 %v6375_v48, %v6205_v58  ;;  %v1728_v26 = vmax.f32 %v1600_v62, 0.0  ;;  %v1745_v6 = vmax.f32 %v1617_v30, 0.0  ;;  %v1598_v20 = vadd.f32 %v1470_v14, %v6230_v4  ;;  %v5074_v58 = vld [vmem:[#allocation6 + $0xf0] sm:$0xff]  ;;  %v5084_v62 = vld [vmem:[#allocation6 + $0xc8] sm:$0xff] }
 0x22e   :  { %4523 = vmatpush3.msra.mxu0 %v1735_v17  ;;  %4556 = vmatpush3.msra.mxu1 %v1752_v41  ;;  %v1517_v17 = vmul.f32 %v5073_v57, %v6510_v54  ;;  %v1615_v23 = vadd.f32 %v1487_v10, %v6218_v53  ;;  %v1727_v40 = vmax.f32 %v1599_v22, 0.0  ;;  %v1744_v41 = vmax.f32 %v1616_v16, 0.0  ;;  %v5085_v16 = vld [vmem:[#allocation8 + $0xd0] sm:$0xff] }
 0x22f   :  { %4524 = vmatprep.subr.mxu0 %v7349_v1  ;;  %4557 = vmatprep.subr.mxu1 %v7349_v1  ;;  %v1516_v48 = vmul.f32 %v5074_v58, %v6510_v54  ;;  %v1533_v61 = vmul.f32 %v5073_v57, %v6519_v43  ;;  %v1614_v32 = vadd.f32 %v1486_v51, %v6230_v4  ;;  %v1726_v24 = vmax.f32 %v1598_v20, 0.0  ;;  %v5078_v4 = vld [vmem:[#allocation8 + $0xf0] sm:$0xff]  ;;  %v5086_v20 = vld [vmem:[#allocation6 + $0xc0] sm:$0xff] }
 0x230   :  { %4525 = vmatpush3.msra.mxu0 %v1734_v33  ;;  %4558 = vmatpush3.msra.mxu1 %v1751_v11  ;;  %v1645_v53 = vadd.f32 %v5075_v42, %v1517_v17  ;;  %v1515_v33 = vmul.f32 %v5076_v15, %v6510_v54  ;;  %v1532_v11 = vmul.f32 %v5074_v58, %v6519_v43  ;;  %v1743_v45 = vmax.f32 %v1615_v23, 0.0 }
 0x231   :  { %4526 = vmatprep.subr.mxu0 %v7349_v1  ;;  %4559 = vmatprep.subr.mxu1 %v7349_v1  ;;  %v1514_v12 = vmul.f32 %v5077_v34, %v6510_v54  ;;  %v1644_v28 = vadd.f32 %v5078_v4, %v1516_v48  ;;  %v1742_v29 = vmax.f32 %v1614_v32, 0.0  ;;  %v1513_v59 = vmul.f32 %v5079_v49, %v6510_v54 }
 0x232   :  { %4527 = vmatpush3.msra.mxu0 %v1733_v5  ;;  %4560 = vmatpush3.msra.mxu1 %v1750_v60  ;;  %v1661_v5 = vadd.f32 %v5075_v42, %v1533_v61  ;;  %v1531_v60 = vmul.f32 %v5076_v15, %v6519_v43  ;;  %v1660_v52 = vadd.f32 %v5078_v4, %v1532_v11  ;;  %v5088_v61 = vld [vmem:[#allocation6 + $0xb8] sm:$0xff]  ;;  %v5090_v11 = vld [vmem:[#allocation8 + $0xc0] sm:$0xff] }
 0x233   :  { %4528 = vmatprep.subr.mxu0 %v7349_v1  ;;  %4561 = vmatprep.subr.mxu1 %v7349_v1  ;;  %v1530_v27 = vmul.f32 %v5077_v34, %v6519_v43  ;;  %v1642_v3 = vadd.f32 %v5081_v8, %v1514_v12  ;;  %v1529_v18 = vmul.f32 %v5079_v49, %v6519_v43 }
 0x234   :  { %4529 = vmatpush3.msra.mxu0 %v1732_v37  ;;  %4562 = vmatpush3.msra.mxu1 %v1749_v56  ;;  %v1773_v37 = vmax.f32 %v1645_v53, 0.0  ;;  %v1643_v56 = vadd.f32 %v5080_v13, %v1515_v33  ;;  %v1789_v36 = vmax.f32 %v1661_v5, 0.0  ;;  %v1659_v19 = vadd.f32 %v5080_v13, %v1531_v60  ;;  %v5089_v53 = vld [vmem:[#allocation6 + $0xb0] sm:$0xff] }
 0x235   :  { %4530 = vmatprep.subr.mxu0 %v7349_v1  ;;  %4563 = vmatprep.subr.mxu1 %v7349_v1  ;;  %v1511_v30 = vmul.f32 %v5084_v62, %v6510_v54  ;;  %v1788_v10 = vmax.f32 %v1660_v52, 0.0  ;;  %v1770_v22 = vmax.f32 %v1642_v3, 0.0  ;;  %v1510_v57 = vmul.f32 %v5086_v20, %v6510_v54  ;;  %v5093_v13 = vld [vmem:[#allocation8 + $0xb0] sm:$0xff]  ;;  %v5094_v52 = vld [vmem:[#allocation6 + $0xa0] sm:$0xff] }
 0x236   :  { %4531 = vmatpush3.msra.mxu0 %v1731_v31  ;;  %4564 = vmatpush3.msra.mxu1 %v1748_v47  ;;  %v5082_v31 = vld [vmem:[#allocation6 + $0xd0] sm:$0xff]  ;;  %v1772_v47 = vmax.f32 %v1644_v28, 0.0  ;;  %v1771_v14 = vmax.f32 %v1643_v56, 0.0  ;;  %v1527_v17 = vmul.f32 %v5084_v62, %v6519_v43  ;;  %v1509_v32 = vmul.f32 %v5088_v61, %v6510_v54  ;;  %v5091_v28 = vld [vmem:[#allocation6 + $0xa8] sm:$0xff] }
 0x237   :  { %4532 = vmatprep.subr.mxu0 %v7349_v1  ;;  %4565 = vmatprep.subr.mxu1 %v7349_v1  ;;  %v1512_v55 = vmul.f32 %v5082_v31, %v6510_v54  ;;  %v1508_v15 = vmul.f32 %v5089_v53, %v6510_v54  ;;  %v1525_v12 = vmul.f32 %v5088_v61, %v6519_v43 }
 0x238   :  { %4533 = vmatpush3.msra.mxu0 %v1730_v38  ;;  %4566 = vmatpush3.msra.mxu1 %v1747_v63  ;;  %v5083_v38 = vld [vmem:[#allocation8 + $0xd8] sm:$0xff]  ;;  %v1507_v5 = vmul.f32 %v5091_v28, %v6510_v54 }
 0x239   :  { %4534 = vmatprep.subr.mxu0 %v7349_v1  ;;  %4567 = vmatprep.subr.mxu1 %v7349_v1  ;;  %v1641_v63 = vadd.f32 %v5083_v38, %v1513_v59  ;;  %v1640_v51 = vadd.f32 %v5085_v16, %v1512_v55  ;;  %v1636_v56 = vadd.f32 %v5093_v13, %v1508_v15 }
 0x23a   :  { %4535 = vmatpush3.msra.mxu0 %v1729_v21  ;;  %4568 = vmatpush3.msra.mxu1 %v1746_v25  ;;  %v1658_v21 = vadd.f32 %v5081_v8, %v1530_v27  ;;  %v1528_v25 = vmul.f32 %v5082_v31, %v6519_v43  ;;  %v1506_v27 = vmul.f32 %v5094_v52, %v6510_v54 }
 0x23b   :  { %4536 = vmatprep.subr.mxu0 %v7349_v1  ;;  %4569 = vmatprep.subr.mxu1 %v7349_v1  ;;  %v1769_v23 = vmax.f32 %v1641_v63, 0.0  ;;  %v1768_v42 = vmax.f32 %v1640_v51, 0.0  ;;  %v1523_v55 = vmul.f32 %v5091_v28, %v6519_v43 }
 0x23c   :  { %4537 = vmatpush3.msra.mxu0 %v1728_v26  ;;  %4570 = vmatpush3.msra.mxu1 %v1745_v6  ;;  %v1787_v26 = vmax.f32 %v1659_v19, 0.0  ;;  %v1657_v6 = vadd.f32 %v5083_v38, %v1529_v18  ;;  %v1786_v58 = vmax.f32 %v1658_v21, 0.0  ;;  %v1656_v48 = vadd.f32 %v5085_v16, %v1528_v25  ;;  %v5096_v19 = vld [vmem:[#allocation6 + $0x98] sm:$0xff]  ;;  %v5098_v16 = vld [vmem:[#allocation6 + $0x90] sm:$0xff] }
 0x23d   :  { %4538 = vmatprep.subr.mxu0 %v7349_v1  ;;  %4571 = vmatprep.subr.mxu1 %v7349_v1  ;;  %v1505_v18 = vmul.f32 %v5096_v19, %v6510_v54  ;;  %v1504_v51 = vmul.f32 %v5098_v16, %v6510_v54 }
 0x23e   :  { %4539 = vmatpush3.msra.mxu0 %v1727_v40  ;;  %4572 = vmatpush3.msra.mxu1 %v1744_v41  ;;  %v5087_v40 = vld [vmem:[#allocation8 + $0xc8] sm:$0xff]  ;;  %v1785_v33 = vmax.f32 %v1657_v6, 0.0  ;;  %v1784_v60 = vmax.f32 %v1656_v48, 0.0 }
 0x23f   :  { %4540 = vmatprep.subr.mxu0 %v7349_v1  ;;  %4573 = vmatprep.subr.mxu1 %v7349_v1  ;;  %v1639_v41 = vadd.f32 %v5087_v40, %v1511_v30  ;;  %v1655_v34 = vadd.f32 %v5087_v40, %v1527_v17  ;;  %v1522_v30 = vmul.f32 %v5094_v52, %v6519_v43  ;;  %v5100_v40 = vld [vmem:[#allocation6 + $0x88] sm:$0xff] }
 0x240   :  { %4541 = vmatpush3.msra.mxu0 %v1726_v24  ;;  %4542 = vmatprep.mubr.msk.f32.mxu0 %vm5305_vm0, %v7349_v1  ;;  %v1526_v24 = vmul.f32 %v5086_v20, %v6519_v43  ;;  %v5099_v20 = vld [vmem:[#allocation8 + $0x98] sm:$0xff] }
 0x241   :  { %4574 = vmatpush3.msra.mxu1 %v1743_v45  ;;  %4543 = vmatmul.mubr.f32.vlgmr.msra.gmra.mxu0 %v6256_v35  ;;  %v1638_v45 = vadd.f32 %v5090_v11, %v1510_v57  ;;  %v1767_v4 = vmax.f32 %v1639_v41, 0.0  ;;  %v1783_v3 = vmax.f32 %v1655_v34, 0.0  ;;  %v1633_v57 = vadd.f32 %v5099_v20, %v1505_v18  ;;  %v5103_v34 = vld [vmem:[#allocation8 + $0x88] sm:$0xff] }
 0x242   :  { %4575 = vmatprep.subr.mxu1 %v7349_v1  ;;  %4580 = vmatprep.subr.mxu0 %v7349_v1  ;;  %v1654_v59 = vadd.f32 %v5090_v11, %v1526_v24  ;;  %v1503_v41 = vmul.f32 %v5100_v40, %v6510_v54 }
 0x243   :  { %4576 = vmatpush3.msra.mxu1 %v1742_v29  ;;  %4577 = vmatprep.mubr.msk.f32.mxu1 %vm5305_vm0, %v7349_v1  ;;  %v5092_v29 = vld [vmem:[#allocation8 + $0xb8] sm:$0xff]  ;;  %v1766_v8 = vmax.f32 %v1638_v45, 0.0  ;;  %v1761_v11 = vmax.f32 %v1633_v57, 0.0 }
 0x244   :  { %4581 = vmatpush3.msra.mxu0 %v1773_v37  ;;  %4578 = vmatmul.mubr.f32.vlgmr.msra.gmra.mxu1 %v6256_v35  ;;  %v1637_v49 = vadd.f32 %v5092_v29, %v1509_v32  ;;  %v1524_v37 = vmul.f32 %v5089_v53, %v6519_v43  ;;  %v1653_v31 = vadd.f32 %v5092_v29, %v1525_v12  ;;  %v1782_v63 = vmax.f32 %v1654_v59, 0.0  ;;  %v5101_v32 = vld [vmem:[#allocation8 + $0x90] sm:$0xff]  ;;  %v5102_v53 = vld [vmem:[#allocation6 + $0x80] sm:$0xff] }
 0x245   :  { %4582 = vmatprep.subr.mxu0 %v7349_v1  ;;  %4615 = vmatprep.subr.mxu1 %v7349_v1  ;;  %v1632_v24 = vadd.f32 %v5101_v32, %v1504_v51  ;;  %v1502_v15 = vmul.f32 %v5102_v53, %v6510_v54  ;;  %v1631_v12 = vadd.f32 %v5103_v34, %v1503_v41 }
 0x246   :  { %4583 = vmatpush3.msra.mxu0 %v1772_v47  ;;  %4616 = vmatpush3.msra.mxu1 %v1789_v36  ;;  %v5095_v47 = vld [vmem:[#allocation8 + $0xa8] sm:$0xff]  ;;  %v1765_v38 = vmax.f32 %v1637_v49, 0.0  ;;  %v1652_v62 = vadd.f32 %v5093_v13, %v1524_v37  ;;  %v1781_v25 = vmax.f32 %v1653_v31, 0.0  ;;  %v1518_v28 = vmul.f32 %v5102_v53, %v6519_v43 }
 0x247   :  { %4584 = vmatprep.subr.mxu0 %v7349_v1  ;;  %4617 = vmatprep.subr.mxu1 %v7349_v1  ;;  %v1635_v36 = vadd.f32 %v5095_v47, %v1507_v5  ;;  %v1760_v54 = vmax.f32 %v1632_v24, 0.0  ;;  %v1759_v59 = vmax.f32 %v1631_v12, 0.0 }
 0x248   :  { %4585 = vmatpush3.msra.mxu0 %v1771_v14  ;;  %4618 = vmatpush3.msra.mxu1 %v1788_v10  ;;  %v1764_v14 = vmax.f32 %v1636_v56, 0.0  ;;  %v5097_v10 = vld [vmem:[#allocation8 + $0xa0] sm:$0xff]  ;;  %v1780_v17 = vmax.f32 %v1652_v62, 0.0 }
 0x249   :  { %4586 = vmatprep.subr.mxu0 %v7349_v1  ;;  %4619 = vmatprep.subr.mxu1 %v7349_v1  ;;  %v1634_v21 = vadd.f32 %v5097_v10, %v1506_v27  ;;  %v1763_v6 = vmax.f32 %v1635_v36, 0.0  ;;  %v6623_v27 = vstv %s3678_s28 }
 0x24a   :  { %4587 = vmatpush3.msra.mxu0 %v1770_v22  ;;  %4620 = vmatpush3.msra.mxu1 %v1787_v26  ;;  %v1651_v22 = vadd.f32 %v5095_v47, %v1523_v55  ;;  %v1521_v26 = vmul.f32 %v5096_v19, %v6519_v43 }
 0x24b   :  { %4588 = vmatprep.subr.mxu0 %v7349_v1  ;;  %4621 = vmatprep.subr.mxu1 %v7349_v1  ;;  %v1762_v48 = vmax.f32 %v1634_v21, 0.0 }
 0x24c   :  { %4589 = vmatpush3.msra.mxu0 %v1769_v23  ;;  %4622 = vmatpush3.msra.mxu1 %v1786_v58  ;;  %v1650_v23 = vadd.f32 %v5097_v10, %v1522_v30  ;;  %v1520_v58 = vmul.f32 %v5098_v16, %v6519_v43  ;;  %v1779_v61 = vmax.f32 %v1651_v22, 0.0 }
 0x24d   :  { %4590 = vmatprep.subr.mxu0 %v7349_v1  ;;  %4623 = vmatprep.subr.mxu1 %v7349_v1 }
 0x24e   :  { %4591 = vmatpush3.msra.mxu0 %v1768_v42  ;;  %4624 = vmatpush3.msra.mxu1 %v1785_v33  ;;  %v1649_v42 = vadd.f32 %v5099_v20, %v1521_v26  ;;  %v1519_v33 = vmul.f32 %v5100_v40, %v6519_v43  ;;  %v1778_v45 = vmax.f32 %v1650_v23, 0.0 }
 0x24f   :  { %4592 = vmatprep.subr.mxu0 %v7349_v1  ;;  %4625 = vmatprep.subr.mxu1 %v7349_v1 }
 0x250   :  { %4593 = vmatpush3.msra.mxu0 %v1767_v4  ;;  %4626 = vmatpush3.msra.mxu1 %v1784_v60  ;;  %v1648_v4 = vadd.f32 %v5101_v32, %v1520_v58  ;;  %v1777_v5 = vmax.f32 %v1649_v42, 0.0  ;;  %v5104_v60 = vld [vmem:[#allocation8 + $0x80] sm:$0xff]  ;;  %v1647_v49 = vadd.f32 %v5103_v34, %v1519_v33 }
 0x251   :  { %4594 = vmatprep.subr.mxu0 %v7349_v1  ;;  %4627 = vmatprep.subr.mxu1 %v7349_v1  ;;  %v1630_v29 = vadd.f32 %v5104_v60, %v1502_v15  ;;  %v1646_v43 = vadd.f32 %v5104_v60, %v1518_v28 }
 0x252   :  { %4595 = vmatpush3.msra.mxu0 %v1766_v8  ;;  %4628 = vmatpush3.msra.mxu1 %v1783_v3  ;;  %v1776_v37 = vmax.f32 %v1648_v4, 0.0  ;;  %v1775_v56 = vmax.f32 %v1647_v49, 0.0  ;;  %v6625_v8 = vstv %s3679_s30 }
 0x253   :  { %4596 = vmatprep.subr.mxu0 %v7349_v1  ;;  %4629 = vmatprep.subr.mxu1 %v7349_v1  ;;  %v1758_v13 = vmax.f32 %v1630_v29, 0.0  ;;  %v1774_v52 = vmax.f32 %v1646_v43, 0.0 }
 0x254   :  { %4597 = vmatpush3.msra.mxu0 %v1765_v38  ;;  %4630 = vmatpush3.msra.mxu1 %v1782_v63 }
 0x255   :  { %4598 = vmatprep.subr.mxu0 %v7349_v1  ;;  %4631 = vmatprep.subr.mxu1 %v7349_v1 }
 0x256   :  { %4599 = vmatpush3.msra.mxu0 %v1764_v14  ;;  %4632 = vmatpush3.msra.mxu1 %v1781_v25 }
 0x257   :  { %4600 = vmatprep.subr.mxu0 %v7349_v1  ;;  %4633 = vmatprep.subr.mxu1 %v7349_v1 }
 0x258   :  { %4601 = vmatpush3.msra.mxu0 %v1763_v6  ;;  %4634 = vmatpush3.msra.mxu1 %v1780_v17 }
 0x259   :  { %4602 = vmatprep.subr.mxu0 %v7349_v1  ;;  %4635 = vmatprep.subr.mxu1 %v7349_v1 }
 0x25a   :  { %4603 = vmatpush3.msra.mxu0 %v1762_v48  ;;  %4636 = vmatpush3.msra.mxu1 %v1779_v61 }
 0x25b   :  { %4604 = vmatprep.subr.mxu0 %v7349_v1  ;;  %4637 = vmatprep.subr.mxu1 %v7349_v1 }
 0x25c   :  { %4605 = vmatpush3.msra.mxu0 %v1761_v11  ;;  %4638 = vmatpush3.msra.mxu1 %v1778_v45 }
 0x25d   :  { %4606 = vmatprep.subr.mxu0 %v7349_v1  ;;  %4639 = vmatprep.subr.mxu1 %v7349_v1 }
 0x25e   :  { %4607 = vmatpush3.msra.mxu0 %v1760_v54  ;;  %4640 = vmatpush3.msra.mxu1 %v1777_v5 }
 0x25f   :  { %4608 = vmatprep.subr.mxu0 %v7349_v1  ;;  %4641 = vmatprep.subr.mxu1 %v7349_v1 }
 0x260   :  { %4609 = vmatpush3.msra.mxu0 %v1759_v59  ;;  %4642 = vmatpush3.msra.mxu1 %v1776_v37 }
 0x261   :  { %4610 = vmatprep.subr.mxu0 %v7349_v1  ;;  %4643 = vmatprep.subr.mxu1 %v7349_v1 }
 0x262   :  { %4611 = vmatpush3.msra.mxu0 %v1758_v13  ;;  %4612 = vmatprep.mubr.msk.f32.mxu0 %vm5305_vm0, %v7349_v1 }
 0x263   :  { %4644 = vmatpush3.msra.mxu1 %v1775_v56  ;;  %4613 = vmatmul.mubr.f32.vlgmr.msra.gmra.mxu0 %v6256_v35 }
 0x264   :  { %4645 = vmatprep.subr.mxu1 %v7349_v1  ;;  %4647 = vmatprep.mubr.msk.f32.mxu1 %vm5305_vm0, %v7349_v1 }
 0x265   :  { %4646 = vmatpush3.msra.mxu1 %v1774_v52  ;;  %4650 = vmatprep.subr.mxu0 %v7349_v1 }
 0x266   :  { %4648 = vmatmul.mubr.f32.vlgmr.msra.gmra.mxu1 %v6256_v35  ;;  %4685 = vmatprep.subr.mxu1 %v7349_v1 }
 0x267   :  { %4682 = vmatprep.mubr.msk.f32.mxu0 %vm5305_vm0, %v7349_v1  ;;  %4717 = vmatprep.mubr.msk.f32.mxu1 %vm5305_vm0, %v7349_v1 }
 0x2be   :  { %v1856_v3 = vpop.f32.mrf.mxu0 }
 0x2bf   :  { %v2352_v31 = vadd.f32 %v6623_v27, %v1856_v3  ;;  %v2370_v55 = vadd.f32 %v6625_v8, %v1856_v3 }
 0x2c0   :  { %v4404_v35 = vpop.f32.mrf.mxu0  ;;  %v1926_v47 = vpop.f32.mrf.mxu1 }
 0x2c1   :  { %v2426_v36 = vrot.slane %v2370_v55, 1  ;;  %v2353_v19 = vadd.f32 %v6623_v27, %v1926_v47  ;;  %v2371_v18 = vadd.f32 %v6625_v8, %v1926_v47  ;;  %4976 = vtanh.f32 %v2352_v31 }
 0x2c2   :  { %v4439_v38 = vpop.f32.mrf.mxu1 }
 0x2c3   :  { %4978 = vtanh.f32 %v2353_v19  ;;  %v2427_v63 = vsel %vm1226_vm1, %v2371_v18, %v2426_v36 }
 0x2ce   :  { %v6632_v62 = vpop.eup %4976 }
 0x2cf   :  { %v2378_v14 = vmul.f32 1.442695, %v6632_v62 }
 0x2d0   :  { %v6634_v30 = vpop.eup %4978 }
 0x2d1   :  { %v2380_v10 = vmul.f32 1.442695, %v6634_v30 }
 0x2d3   :  { %4980 = vpow2.f32 %v2380_v10 }
 0x2d4   :  { %4982 = vpow2.f32 %v2378_v14 }
 0x2df   :  { %v1996_v21 = vpop.f32.mrf.mxu0 }
 0x2e0   :  { %v4981_v25 = vpop.eup %4980  ;;  %v2354_v22 = vadd.f32 %v6623_v27, %v1996_v21  ;;  %v2372_v16 = vadd.f32 %v6625_v8, %v1996_v21 }
 0x2e1   :  { %v2402_v51 = vrot.slane %v4981_v25, 7  ;;  %v4474_v26 = vpop.f32.mrf.mxu0  ;;  %v4983_v6 = vpop.eup %4982 }
 0x2e2   :  { %4984 = vtanh.f32 %v2354_v22  ;;  %v2428_v20 = vrot.slane %v2372_v16, 7  ;;  %v2066_v57 = vpop.f32.mrf.mxu1 }
 0x2e3   :  { %v2355_v17 = vadd.f32 %v6623_v27, %v2066_v57  ;;  %v2373_v23 = vadd.f32 %v6625_v8, %v2066_v57  ;;  %v2403_v40 = vsel %vm1226_vm1, %v2402_v51, %v4983_v6 }
 0x2e4   :  { %v2429_v41 = vsel %vm1229_vm2, %v2428_v20, %v2427_v63  ;;  %v4509_v58 = vpop.f32.mrf.mxu1 }
 0x2e5   :  { %4986 = vtanh.f32 %v2355_v17  ;;  %v2430_v48 = vrot.slane %v2373_v23, 6 }
 0x2e7   :  { %v2431_v61 = vsel %vm1232_vm3, %v2430_v48, %v2429_v41 }
 0x2ef   :  { %v6645_v32 = vpop.eup %4984 }
 0x2f0   :  { %v2382_v24 = vmul.f32 1.442695, %v6645_v32 }
 0x2f2   :  { %v6648_v42 = vpop.eup %4986  ;;  %4988 = vpow2.f32 %v2382_v24 }
 0x2f3   :  { %7362 = vst [vmem:[#allocation29_spill] sm:$0xff] %v6648_v42  ;;  %v2384_v53 = vmul.f32 1.442695, %v6648_v42 }
 0x2f5   :  { %4990 = vpow2.f32 %v2384_v53 }
 0x2ff   :  { %v4989_v15 = vpop.eup %4988 }
 0x300   :  { %v2404_v33 = vrot.slane %v4989_v15, 6 }
 0x301   :  { %v2136_v11 = vpop.f32.mrf.mxu0 }
 0x302   :  { %v4991_v45 = vpop.eup %4990  ;;  %v2374_v34 = vadd.f32 %v6625_v8, %v2136_v11  ;;  %v2405_v12 = vsel %vm1229_vm2, %v2404_v33, %v2403_v40  ;;  %v2356_v13 = vadd.f32 %v6623_v27, %v2136_v11 }
 0x303   :  { %v2406_v4 = vrot.slane %v4991_v45, 5  ;;  %v4544_v28 = vpop.f32.mrf.mxu0 }
 0x304   :  { %v2432_v54 = vrot.slane %v2374_v34, 5  ;;  %v2206_v5 = vpop.f32.mrf.mxu1  ;;  %4992 = vtanh.f32 %v2356_v13 }
 0x305   :  { %v2375_v60 = vadd.f32 %v6625_v8, %v2206_v5  ;;  %v2407_v29 = vsel %vm1232_vm3, %v2406_v4, %v2405_v12  ;;  %v2357_v56 = vadd.f32 %v6623_v27, %v2206_v5  ;;  %v6692_v12 = vld [vmem:[#allocation6 + $0x178] sm:$0xff]  ;;  %v6694_v4 = vld [vmem:[#allocation6 + $0x170] sm:$0xff] }
 0x306   :  { %v2433_v49 = vsel %vm1235_vm4, %v2432_v54, %v2431_v61  ;;  %v4579_v59 = vpop.f32.mrf.mxu1  ;;  %v6704_v54 = vld [vmem:[#allocation8 + $0x178] sm:$0xff]  ;;  %v6706_v5 = vld [vmem:[#allocation8 + $0x170] sm:$0xff] }
 0x307   :  { %v2434_v37 = vrot.slane %v2375_v60, 4  ;;  %4994 = vtanh.f32 %v2357_v56  ;;  %v6708_v60 = vld [vmem:[#allocation6 + $0x168] sm:$0xff]  ;;  %v6714_v59 = vld [vmem:[#allocation6 + $0x160] sm:$0xff] }
 0x309   :  { %v2435_v43 = vsel %vm1238_vm5, %v2434_v37, %v2433_v49  ;;  %v6716_v37 = vld [vmem:[#allocation8 + $0x168] sm:$0xff] }
 0x311   :  { %v6660_v35 = vpop.eup %4992 }
 0x312   :  { %7363 = vst [vmem:[#allocation30_spill] sm:$0xff] %v6660_v35  ;;  %v2386_v18 = vmul.f32 1.442695, %v6660_v35 }
 0x314   :  { %v6663_v19 = vpop.eup %4994 }
 0x315   :  { %7364 = vst [vmem:[#allocation31_spill] sm:$0xff] %v6663_v19  ;;  %v2388_v38 = vmul.f32 1.442695, %v6663_v19 }
 0x323   :  { %v2276_v52 = vpop.f32.mrf.mxu0 }
 0x324   :  { %v2358_v3 = vadd.f32 %v6623_v27, %v2276_v52  ;;  %v2376_v16 = vadd.f32 %v6625_v8, %v2276_v52 }
 0x325   :  { %v4614_v31 = vpop.f32.mrf.mxu0 }
 0x326   :  { %4996 = vtanh.f32 %v2358_v3  ;;  %v2346_v55 = vpop.f32.mrf.mxu1  ;;  %v2436_v57 = vrot.slane %v2376_v16, 3  ;;  %v6724_v3 = vld [vmem:[#allocation8 + $0x160] sm:$0xff]  ;;  %v6726_v31 = vld [vmem:[#allocation6 + $0x158] sm:$0xff] }
 0x327   :  { %v2359_v47 = vadd.f32 %v6623_v27, %v2346_v55  ;;  %v2377_v20 = vadd.f32 %v6625_v8, %v2346_v55 }
 0x328   :  { %v4649_v36 = vpop.f32.mrf.mxu1  ;;  %v2437_v61 = vsel %vm1241_vm6, %v2436_v57, %v2435_v43 }
 0x329   :  { %4998 = vtanh.f32 %v2359_v47  ;;  %v2438_v48 = vrot.slane %v2377_v20, 2 }
 0x32a   :  { %5000 = vpow2.f32 %v2386_v18  ;;  %v6734_v18 = vld [vmem:[#allocation6 + $0x150] sm:$0xff] }
 0x32b   :  { %5002 = vpow2.f32 %v2388_v38  ;;  %v2439_v15 = vsel %vm1244_vm7, %v2438_v48, %v2437_v61 }
 0x333   :  { %v6667_v63 = vpop.eup %4996 }
 0x334   :  { %7365 = vst [vmem:[#allocation32_spill] sm:$0xff] %v6667_v63  ;;  %v2390_v14 = vmul.f32 1.442695, %v6667_v63  ;;  %v6848_v63 = vld [vmem:[#allocation8 + $0x110] sm:$0xff] }
 0x336   :  { %v6670_v10 = vpop.eup %4998  ;;  %5004 = vpow2.f32 %v2390_v14 }
 0x337   :  { %7366 = vst [vmem:[#allocation33_spill] sm:$0xff] %v6670_v10  ;;  %v2392_v21 = vmul.f32 1.442695, %v6670_v10  ;;  %v5001_v27 = vpop.eup %5000 }
 0x338   :  { %v5003_v25 = vpop.eup %5002  ;;  %v2408_v22 = vrot.slane %v5001_v27, 4  ;;  %v6738_v27 = vld [vmem:[#allocation8 + $0x158] sm:$0xff] }
 0x339   :  { %5006 = vpow2.f32 %v2392_v21  ;;  %v2410_v51 = vrot.slane %v5003_v25, 3 }
 0x33a   :  { %v2409_v26 = vsel %vm1235_vm4, %v2408_v22, %v2407_v29 }
 0x33b   :  { %v2411_v23 = vsel %vm1238_vm5, %v2410_v51, %v2409_v26  ;;  %v6744_v26 = vld [vmem:[#allocation8 + $0x150] sm:$0xff] }
 0x343   :  { %v5005_v6 = vpop.eup %5004 }
 0x344   :  { %v2412_v17 = vrot.slane %v5005_v6, 2 }
 0x346   :  { %v5007_v40 = vpop.eup %5006  ;;  %v2413_v41 = vsel %vm1241_vm6, %v2412_v17, %v2411_v23  ;;  %v6751_v23 = vld [vmem:[#allocation6 + $0x148] sm:$0xff] }
 0x347   :  { %v2414_v58 = vrot.slane %v5007_v40, 1  ;;  %v6753_v40 = vld [vmem:[#allocation6 + $0x140] sm:$0xff] }
 0x349   :  { %v2415_v24 = vsel %vm1244_vm7, %v2414_v58, %v2413_v41 }
 0x34a   :  { %v2417_v53 = vmul.f32 %v2415_v24, %v6030_v46 }
 0x34c   :  { %v6682_v33 = vadd.f32 %v2439_v15, %v2417_v53  ;;  %v6761_v15 = vld [vmem:[#allocation8 + $0x148] sm:$0xff] }
 0x34e   :  { %7367 = vst [vmem:[#allocation34_spill] sm:$0xff] %v6682_v33  ;;  %v2494_v8 = vrot.slane %v6682_v33, %v5383_v7 }
 0x350   :  { %v2502_v11 = vcombine.high %v2494_v8, %v2494_v8  ;;  %v6687_v45 = vrot.slane %v2494_v8, %v5383_v7 }
 0x352   :  { %v6690_v34 = vrot.slane %v2502_v11, %v5383_v7  ;;  %v6698_v46 = vrot.slane %v6687_v45, %v5387_v9  ;;  %v2532_v10 = vcombine.high %v6687_v45, %v6687_v45 }
 0x354   :  { %v6702_v28 = vrot.slane %v6690_v34, %v5387_v9  ;;  %v2591_v29 = vmul.f32 %v6698_v46, %v6692_v12  ;;  %v2590_v49 = vmul.f32 %v6698_v46, %v6694_v4  ;;  %v2589_v52 = vmul.f32 %v6698_v46, %v6708_v60 }
 0x355   :  { %v2588_v47 = vmul.f32 %v6698_v46, %v6714_v59  ;;  %v2587_v51 = vmul.f32 %v6698_v46, %v6726_v31  ;;  %v2586_v17 = vmul.f32 %v6698_v46, %v6734_v18  ;;  %v2585_v8 = vmul.f32 %v6698_v46, %v6751_v23 }
 0x356   :  { %v2719_v43 = vadd.f32 %v2591_v29, %v6704_v54  ;;  %v2718_v13 = vadd.f32 %v2590_v49, %v6706_v5  ;;  %v2607_v56 = vmul.f32 %v6702_v28, %v6692_v12  ;;  %v2606_v55 = vmul.f32 %v6702_v28, %v6694_v4  ;;  %v6771_v49 = vld [vmem:[#allocation6 + $0x138] sm:$0xff] }
 0x357   :  { %v2605_v36 = vmul.f32 %v6702_v28, %v6708_v60  ;;  %v2717_v21 = vadd.f32 %v2589_v52, %v6716_v37  ;;  %v2716_v16 = vadd.f32 %v2588_v47, %v6724_v3  ;;  %v2604_v57 = vmul.f32 %v6702_v28, %v6714_v59  ;;  %v6774_v52 = vld [vmem:[#allocation8 + $0x140] sm:$0xff] }
 0x358   :  { %v2847_v38 = vmax.f32 %v2719_v43, 0.0  ;;  %v2735_v14 = vadd.f32 %v2607_v56, %v6704_v54  ;;  %v2846_v25 = vmax.f32 %v2718_v13, 0.0  ;;  %v2734_v22 = vadd.f32 %v2606_v55, %v6706_v5 }
 0x359   :  { %v2733_v20 = vadd.f32 %v2605_v36, %v6716_v37  ;;  %v2845_v41 = vmax.f32 %v2717_v21, 0.0  ;;  %v2715_v58 = vadd.f32 %v2587_v51, %v6738_v27  ;;  %v2732_v61 = vadd.f32 %v2604_v57, %v6724_v3 }
 0x35a   :  { %4651 = vmatpush3.msra.mxu0 %v2847_v38  ;;  %v2863_v6 = vmax.f32 %v2735_v14, 0.0  ;;  %v2862_v48 = vmax.f32 %v2734_v22, 0.0  ;;  %v2714_v24 = vadd.f32 %v2586_v17, %v6744_v26  ;;  %v2603_v53 = vmul.f32 %v6702_v28, %v6726_v31  ;;  %v6781_v38 = vld [vmem:[#allocation6 + $0x130] sm:$0xff] }
 0x35b   :  { %4652 = vmatprep.subr.mxu0 %v7349_v1  ;;  %v2602_v11 = vmul.f32 %v6702_v28, %v6734_v18  ;;  %v2584_v29 = vmul.f32 %v6698_v46, %v6753_v40  ;;  %v2844_v43 = vmax.f32 %v2716_v16, 0.0  ;;  %v2861_v13 = vmax.f32 %v2733_v20, 0.0  ;;  %v6788_v16 = vld [vmem:[#allocation6 + $0x128] sm:$0xff]  ;;  %v6793_v20 = vld [vmem:[#allocation8 + $0x138] sm:$0xff] }
 0x35c   :  { %4653 = vmatpush3.msra.mxu0 %v2846_v25  ;;  %4686 = vmatpush3.msra.mxu1 %v2863_v6  ;;  %v2731_v56 = vadd.f32 %v2603_v53, %v6738_v27  ;;  %v2601_v55 = vmul.f32 %v6702_v28, %v6751_v23  ;;  %v2843_v47 = vmax.f32 %v2715_v58, 0.0  ;;  %v2713_v36 = vadd.f32 %v2585_v8, %v6761_v15 }
 0x35d   :  { %4654 = vmatprep.subr.mxu0 %v7349_v1  ;;  %4687 = vmatprep.subr.mxu1 %v7349_v1  ;;  %v2860_v14 = vmax.f32 %v2732_v61, 0.0  ;;  %v2730_v21 = vadd.f32 %v2602_v11, %v6744_v26  ;;  %v2583_v25 = vmul.f32 %v6698_v46, %v6771_v49  ;;  %v2600_v22 = vmul.f32 %v6702_v28, %v6753_v40 }
 0x35e   :  { %4655 = vmatpush3.msra.mxu0 %v2845_v41  ;;  %4688 = vmatpush3.msra.mxu1 %v2862_v48  ;;  %v2842_v51 = vmax.f32 %v2714_v24, 0.0  ;;  %v2712_v6 = vadd.f32 %v2584_v29, %v6774_v52  ;;  %v2859_v57 = vmax.f32 %v2731_v56, 0.0  ;;  %v2729_v17 = vadd.f32 %v2601_v55, %v6761_v15  ;;  %v6800_v48 = vld [vmem:[#allocation6 + $0x120] sm:$0xff]  ;;  %v6804_v24 = vld [vmem:[#allocation8 + $0x130] sm:$0xff]  ;;  %v6814_v56 = vld [vmem:[#allocation6 + $0x118] sm:$0xff] }
 0x35f   :  { %4656 = vmatprep.subr.mxu0 %v7349_v1  ;;  %4689 = vmatprep.subr.mxu1 %v7349_v1  ;;  %v2582_v41 = vmul.f32 %v6698_v46, %v6781_v38  ;;  %v2599_v58 = vmul.f32 %v6702_v28, %v6771_v49  ;;  %v2841_v61 = vmax.f32 %v2713_v36, 0.0  ;;  %v2581_v53 = vmul.f32 %v6698_v46, %v6788_v16 }
 0x360   :  { %4657 = vmatpush3.msra.mxu0 %v2844_v43  ;;  %4690 = vmatpush3.msra.mxu1 %v2861_v13  ;;  %v2858_v8 = vmax.f32 %v2730_v21, 0.0  ;;  %v2711_v11 = vadd.f32 %v2583_v25, %v6793_v20  ;;  %v2728_v29 = vadd.f32 %v2600_v22, %v6774_v52  ;;  %v6810_v43 = vld [vmem:[#allocation8 + $0x128] sm:$0xff]  ;;  %v2598_v13 = vmul.f32 %v6702_v28, %v6781_v38  ;;  %v6822_v25 = vld [vmem:[#allocation8 + $0x120] sm:$0xff] }
 0x361   :  { %4658 = vmatprep.subr.mxu0 %v7349_v1  ;;  %4691 = vmatprep.subr.mxu1 %v7349_v1  ;;  %v2840_v55 = vmax.f32 %v2712_v6, 0.0  ;;  %v2857_v36 = vmax.f32 %v2729_v17, 0.0  ;;  %v2727_v21 = vadd.f32 %v2599_v58, %v6793_v20  ;;  %v2597_v22 = vmul.f32 %v6702_v28, %v6788_v16 }
 0x362   :  { %4659 = vmatpush3.msra.mxu0 %v2843_v47  ;;  %4692 = vmatpush3.msra.mxu1 %v2860_v14  ;;  %v2580_v47 = vmul.f32 %v6698_v46, %v6800_v48  ;;  %v2710_v14 = vadd.f32 %v2582_v41, %v6804_v24  ;;  %v2709_v6 = vadd.f32 %v2581_v53, %v6810_v43  ;;  %v2839_v17 = vmax.f32 %v2711_v11, 0.0 }
 0x363   :  { %4660 = vmatprep.subr.mxu0 %v7349_v1  ;;  %4693 = vmatprep.subr.mxu1 %v7349_v1  ;;  %v2856_v41 = vmax.f32 %v2728_v29, 0.0  ;;  %v2726_v58 = vadd.f32 %v2598_v13, %v6804_v24  ;;  %v6845_v29 = vld [vmem:[#allocation6 + $0x108] sm:$0xff]  ;;  %v2595_v45 = vmul.f32 %v6702_v28, %v6814_v56  ;;  %v6865_v35 = vrot.slane %v2532_v10, %v5387_v9 }
 0x364   :  { %4661 = vmatpush3.msra.mxu0 %v2842_v51  ;;  %4694 = vmatpush3.msra.mxu1 %v2859_v57  ;;  %v6826_v51 = vld [vmem:[#allocation6 + $0x110] sm:$0xff]  ;;  %v2579_v57 = vmul.f32 %v6698_v46, %v6814_v56  ;;  %v2708_v53 = vadd.f32 %v2580_v47, %v6822_v25  ;;  %v2838_v13 = vmax.f32 %v2710_v14, 0.0  ;;  %v7368_v47 = vmov 0.0  }
 0x365   :  { %4662 = vmatprep.subr.mxu0 %v7349_v1  ;;  %4695 = vmatprep.subr.mxu1 %v7349_v1  ;;  %v2578_v11 = vmul.f32 %v6698_v46, %v6826_v51  ;;  %v2837_v19 = vmax.f32 %v2709_v6, 0.0  ;;  %v2854_v14 = vmax.f32 %v2726_v58, 0.0  ;;  %v2593_v10 = vmul.f32 %v6702_v28, %v6845_v29 }
 0x366   :  { %4663 = vmatpush3.msra.mxu0 %v2841_v61  ;;  %4696 = vmatpush3.msra.mxu1 %v2858_v8  ;;  %v6834_v61 = vld [vmem:[#allocation8 + $0x118] sm:$0xff]  ;;  %v2596_v8 = vmul.f32 %v6702_v28, %v6800_v48  ;;  %v2836_v6 = vmax.f32 %v2708_v53, 0.0 }
 0x367   :  { %4664 = vmatprep.subr.mxu0 %v7349_v1  ;;  %4697 = vmatprep.subr.mxu1 %v7349_v1 }
 0x368   :  { %4665 = vmatpush3.msra.mxu0 %v2840_v55  ;;  %4698 = vmatpush3.msra.mxu1 %v2857_v36  ;;  %v2855_v55 = vmax.f32 %v2727_v21, 0.0  ;;  %v2725_v36 = vadd.f32 %v2597_v22, %v6810_v43  ;;  %v2724_v21 = vadd.f32 %v2596_v8, %v6822_v25  ;;  %v2577_v22 = vmul.f32 %v6698_v46, %v6845_v29 }
 0x369   :  { %4666 = vmatprep.subr.mxu0 %v7349_v1  ;;  %4699 = vmatprep.subr.mxu1 %v7349_v1  ;;  %v2534_v1 = vcombine.high %v6690_v34, %v6690_v34  ;;  %v2594_v34 = vmul.f32 %v6702_v28, %v6826_v51  ;;  %v2723_v8 = vadd.f32 %v2595_v45, %v6834_v61 }
 0x36a   :  { %4667 = vmatpush3.msra.mxu0 %v2839_v17  ;;  %4700 = vmatpush3.msra.mxu1 %v2856_v41  ;;  %v2707_v17 = vadd.f32 %v2579_v57, %v6834_v61  ;;  %v6857_v41 = vld [vmem:[#allocation6 + $0x100] sm:$0xff]  ;;  %v2706_v57 = vadd.f32 %v2578_v11, %v6848_v63  ;;  %v2853_v58 = vmax.f32 %v2725_v36, 0.0 }
 0x36b   :  { %4668 = vmatprep.subr.mxu0 %v7368_v47  ;;  %4701 = vmatprep.subr.mxu1 %v7368_v47  ;;  %v6878_v50 = vrot.slane %v2534_v1, %v5387_v9  ;;  %v6882_v11 = vld [vmem:[#allocation8 + $0x100] sm:$0xff]  ;;  %v2592_v45 = vmul.f32 %v6702_v28, %v6857_v41  ;;  %v2623_v1 = vmul.f32 %v6865_v35, %v6692_v12 }
 0x36c   :  { %4669 = vmatpush3.msra.mxu0 %v2838_v13  ;;  %4702 = vmatpush3.msra.mxu1 %v2855_v55  ;;  %v6870_v13 = vld [vmem:[#allocation8 + $0x108] sm:$0xff]  ;;  %v2576_v55 = vmul.f32 %v6698_v46, %v6857_v41  ;;  %v2835_v53 = vmax.f32 %v2707_v17, 0.0  ;;  %v2722_v46 = vadd.f32 %v2594_v34, %v6848_v63  ;;  %v2834_v17 = vmax.f32 %v2706_v57, 0.0 }
 0x36d   :  { %4670 = vmatprep.subr.mxu0 %v7368_v47  ;;  %4703 = vmatprep.subr.mxu1 %v7368_v47  ;;  %v2705_v36 = vadd.f32 %v2577_v22, %v6870_v13  ;;  %v2721_v22 = vadd.f32 %v2593_v10, %v6870_v13  ;;  %v2622_v28 = vmul.f32 %v6865_v35, %v6694_v4 }
 0x36e   :  { %4671 = vmatpush3.msra.mxu0 %v2837_v19  ;;  %4704 = vmatpush3.msra.mxu1 %v2854_v14  ;;  %v2852_v19 = vmax.f32 %v2724_v21, 0.0  ;;  %v2851_v14 = vmax.f32 %v2723_v8, 0.0  ;;  %v2704_v21 = vadd.f32 %v2576_v55, %v6882_v11  ;;  %v2639_v34 = vmul.f32 %v6878_v50, %v6692_v12 }
 0x36f   :  { %4672 = vmatprep.subr.mxu0 %v7368_v47  ;;  %4705 = vmatprep.subr.mxu1 %v7368_v47  ;;  %v2720_v57 = vadd.f32 %v2592_v45, %v6882_v11  ;;  %v2751_v8 = vadd.f32 %v2623_v1, %v6704_v54  ;;  %v2621_v55 = vmul.f32 %v6865_v35, %v6708_v60 }
 0x370   :  { %4673 = vmatpush3.msra.mxu0 %v2836_v6  ;;  %4706 = vmatpush3.msra.mxu1 %v2853_v58  ;;  %v2833_v6 = vmax.f32 %v2705_v36, 0.0  ;;  %v2850_v58 = vmax.f32 %v2722_v46, 0.0  ;;  %v2638_v10 = vmul.f32 %v6878_v50, %v6694_v4  ;;  %v6908_v36 = vld [vmem:[#allocation9 + $0x10] sm:$0xff]  ;;  %v2620_v46 = vmul.f32 %v6865_v35, %v6714_v59 }
 0x371   :  { %4674 = vmatprep.subr.mxu0 %v7368_v47  ;;  %4707 = vmatprep.subr.mxu1 %v7368_v47  ;;  %v2750_v45 = vadd.f32 %v2622_v28, %v6706_v5  ;;  %v2767_v1 = vadd.f32 %v2639_v34, %v6704_v54  ;;  %v2636_v34 = vmul.f32 %v6878_v50, %v6714_v59 }
 0x372   :  { %4675 = vmatpush3.msra.mxu0 %v2835_v53  ;;  %4708 = vmatpush3.msra.mxu1 %v2852_v19  ;;  %v2832_v53 = vmax.f32 %v2704_v21, 0.0  ;;  %v2849_v19 = vmax.f32 %v2721_v22, 0.0  ;;  %v2619_v21 = vmul.f32 %v6865_v35, %v6726_v31  ;;  %v2879_v22 = vmax.f32 %v2751_v8, 0.0 }
 0x373   :  { %4676 = vmatprep.subr.mxu0 %v7368_v47  ;;  %4709 = vmatprep.subr.mxu1 %v7368_v47  ;;  %v2766_v28 = vadd.f32 %v2638_v10, %v6706_v5  ;;  %v2895_v8 = vmax.f32 %v2767_v1, 0.0  ;;  %v2635_v10 = vmul.f32 %v6878_v50, %v6726_v31  ;;  %v2634_v1 = vmul.f32 %v6878_v50, %v6734_v18 }
 0x374   :  { %4677 = vmatpush3.msra.mxu0 %v2834_v17  ;;  %4710 = vmatpush3.msra.mxu1 %v2851_v14  ;;  %v2637_v17 = vmul.f32 %v6878_v50, %v6708_v60  ;;  %v2848_v14 = vmax.f32 %v2720_v57, 0.0  ;;  %v2618_v57 = vmul.f32 %v6865_v35, %v6734_v18 }
 0x375   :  { %4678 = vmatprep.subr.mxu0 %v7368_v47  ;;  %4711 = vmatprep.subr.mxu1 %v7368_v47 }
 0x376   :  { %4679 = vmatpush3.msra.mxu0 %v2833_v6  ;;  %4712 = vmatpush3.msra.mxu1 %v2850_v58  ;;  %v2749_v6 = vadd.f32 %v2621_v55, %v6716_v37  ;;  %v2748_v58 = vadd.f32 %v2620_v46, %v6724_v3  ;;  %v2765_v55 = vadd.f32 %v2637_v17, %v6716_v37 }
 0x377   :  { %4680 = vmatprep.subr.mxu0 %v7368_v47  ;;  %4713 = vmatprep.subr.mxu1 %v7368_v47  ;;  %v2617_v46 = vmul.f32 %v6865_v35, %v6751_v23  ;;  %v2746_v42 = vadd.f32 %v2618_v57, %v6744_v26 }
 0x378   :  { %4681 = vmatpush3.msra.mxu0 %v2832_v53  ;;  %4714 = vmatpush3.msra.mxu1 %v2849_v19  ;;  %v2878_v53 = vmax.f32 %v2750_v45, 0.0  ;;  %v2747_v19 = vadd.f32 %v2619_v21, %v6738_v27  ;;  %v2764_v45 = vadd.f32 %v2636_v34, %v6724_v3  ;;  %v2876_v17 = vmax.f32 %v2748_v58, 0.0 }
 0x379   :  { %4683 = vmatmul.mubr.f32.vlgmr.msra.gmra.mxu0 %v6908_v36  ;;  %4715 = vmatprep.subr.mxu1 %v7368_v47  ;;  %v2893_v21 = vmax.f32 %v2765_v55, 0.0  ;;  %v2487_v34 = vcombine.high %v6682_v33, %v6682_v33  ;;  %v2745_v57 = vadd.f32 %v2617_v46, %v6761_v15  ;;  %v2762_v55 = vadd.f32 %v2634_v1, %v6744_v26 }
 0x37a   :  { %4720 = vmatprep.subr.mxu0 %v7368_v47  ;;  %4716 = vmatpush3.msra.mxu1 %v2848_v14  ;;  %v2877_v14 = vmax.f32 %v2749_v6, 0.0  ;;  %v2616_v6 = vmul.f32 %v6865_v35, %v6753_v40  ;;  %v2875_v58 = vmax.f32 %v2747_v19, 0.0  ;;  %v2614_v19 = vmul.f32 %v6865_v35, %v6781_v38 }
 0x37b   :  { %4721 = vmatpush3.msra.mxu0 %v2879_v22  ;;  %4718 = vmatmul.mubr.f32.vlgmr.msra.gmra.mxu1 %v6908_v36  ;;  %v2894_v22 = vmax.f32 %v2766_v28, 0.0  ;;  %v2633_v28 = vmul.f32 %v6878_v50, %v6751_v23  ;;  %v2613_v33 = vmul.f32 %v6865_v35, %v6788_v16 }
 0x37c   :  { %4722 = vmatprep.subr.mxu0 %v7368_v47  ;;  %4755 = vmatprep.subr.mxu1 %v7368_v47 }
 0x37d   :  { %4723 = vmatpush3.msra.mxu0 %v2878_v53  ;;  %4756 = vmatpush3.msra.mxu1 %v2895_v8  ;;  %v2763_v53 = vadd.f32 %v2635_v10, %v6738_v27  ;;  %v2892_v8 = vmax.f32 %v2764_v45, 0.0  ;;  %v2615_v10 = vmul.f32 %v6865_v35, %v6771_v49  ;;  %v2744_v45 = vadd.f32 %v2616_v6, %v6774_v52 }
 0x37e   :  { %4724 = vmatprep.subr.mxu0 %v7368_v47  ;;  %4757 = vmatprep.subr.mxu1 %v7368_v47  ;;  %v2761_v1 = vadd.f32 %v2633_v28, %v6761_v15 }
 0x37f   :  { %4725 = vmatpush3.msra.mxu0 %v2877_v14  ;;  %4758 = vmatpush3.msra.mxu1 %v2894_v22  ;;  %v2632_v14 = vmul.f32 %v6878_v50, %v6753_v40  ;;  %v2874_v22 = vmax.f32 %v2746_v42, 0.0  ;;  %v2891_v46 = vmax.f32 %v2763_v53, 0.0  ;;  %v2873_v42 = vmax.f32 %v2745_v57, 0.0 }
 0x380   :  { %4726 = vmatprep.subr.mxu0 %v7368_v47  ;;  %4759 = vmatprep.subr.mxu1 %v7368_v47  ;;  %v2890_v53 = vmax.f32 %v2762_v55, 0.0  ;;  %v2743_v6 = vadd.f32 %v2615_v10, %v6793_v20  ;;  %v2612_v57 = vmul.f32 %v6865_v35, %v6800_v48  ;;  %v2889_v55 = vmax.f32 %v2761_v1, 0.0 }
 0x381   :  { %4727 = vmatpush3.msra.mxu0 %v2876_v17  ;;  %4760 = vmatpush3.msra.mxu1 %v2893_v21  ;;  %v2631_v17 = vmul.f32 %v6878_v50, %v6771_v49  ;;  %v2501_v21 = vrot.slane %v2487_v34, %v5383_v7  ;;  %v2760_v28 = vadd.f32 %v2632_v14, %v6774_v52 }
 0x382   :  { %4728 = vmatprep.subr.mxu0 %v7368_v47  ;;  %4761 = vmatprep.subr.mxu1 %v7368_v47  ;;  %v2742_v34 = vadd.f32 %v2614_v19, %v6804_v24  ;;  %v2629_v14 = vmul.f32 %v6878_v50, %v6788_v16  ;;  %v2611_v19 = vmul.f32 %v6865_v35, %v6814_v56 }
 0x383   :  { %4729 = vmatpush3.msra.mxu0 %v2875_v58  ;;  %4762 = vmatpush3.msra.mxu1 %v2892_v8  ;;  %v2630_v58 = vmul.f32 %v6878_v50, %v6781_v38  ;;  %v2872_v8 = vmax.f32 %v2744_v45, 0.0  ;;  %v2759_v10 = vadd.f32 %v2631_v17, %v6793_v20  ;;  %v2888_v45 = vmax.f32 %v2760_v28, 0.0 }
 0x384   :  { %4730 = vmatprep.subr.mxu0 %v7368_v47  ;;  %4763 = vmatprep.subr.mxu1 %v7368_v47  ;;  %v2628_v17 = vmul.f32 %v6878_v50, %v6800_v48  ;;  %v2740_v44 = vadd.f32 %v2612_v57, %v6822_v25  ;;  %v2610_v28 = vmul.f32 %v6865_v35, %v6826_v51 }
 0x385   :  { %4731 = vmatpush3.msra.mxu0 %v2874_v22  ;;  %4764 = vmatpush3.msra.mxu1 %v2891_v46  ;;  %v2503_v22 = vcombine.high %v2501_v21, %v2501_v21  ;;  %v2741_v46 = vadd.f32 %v2613_v33, %v6810_v43  ;;  %v2758_v1 = vadd.f32 %v2630_v58, %v6804_v24  ;;  %v2870_v33 = vmax.f32 %v2742_v34, 0.0 }
 0x386   :  { %4732 = vmatprep.subr.mxu0 %v7368_v47  ;;  %4765 = vmatprep.subr.mxu1 %v7368_v47  ;;  %v2627_v58 = vmul.f32 %v6878_v50, %v6814_v56  ;;  %v2739_v57 = vadd.f32 %v2611_v19, %v6834_v61  ;;  %v2738_v19 = vadd.f32 %v2610_v28, %v6848_v63 }
 0x387   :  { %4733 = vmatpush3.msra.mxu0 %v2873_v42  ;;  %4766 = vmatpush3.msra.mxu1 %v2890_v53  ;;  %v2871_v42 = vmax.f32 %v2743_v6, 0.0  ;;  %v6994_v53 = vrot.slane %v2501_v21, %v5383_v7  ;;  %v2757_v6 = vadd.f32 %v2629_v14, %v6810_v43  ;;  %v7005_v21 = vrot.slane %v2503_v22, %v5383_v7 }
 0x388   :  { %4734 = vmatprep.subr.mxu0 %v7368_v47  ;;  %4767 = vmatprep.subr.mxu1 %v7368_v47  ;;  %v2869_v34 = vmax.f32 %v2741_v46, 0.0  ;;  %v2609_v14 = vmul.f32 %v6865_v35, %v6845_v29  ;;  %v2868_v22 = vmax.f32 %v2740_v44, 0.0  ;;  %v2625_v44 = vmul.f32 %v6878_v50, %v6845_v29 }
 0x389   :  { %4735 = vmatpush3.msra.mxu0 %v2872_v8  ;;  %4768 = vmatpush3.msra.mxu1 %v2889_v55  ;;  %v2887_v8 = vmax.f32 %v2759_v10, 0.0  ;;  %v2886_v55 = vmax.f32 %v2758_v1, 0.0  ;;  %v2756_v10 = vadd.f32 %v2628_v17, %v6822_v25  ;;  %v7017_v7 = vrot.slane %v6994_v53, %v5387_v9 }
 0x38a   :  { %4736 = vmatprep.subr.mxu0 %v7368_v47  ;;  %4769 = vmatprep.subr.mxu1 %v7368_v47  ;;  %v2885_v46 = vmax.f32 %v2757_v6, 0.0  ;;  %v2608_v1 = vmul.f32 %v6865_v35, %v6857_v41  ;;  %v7027_v17 = vrot.slane %v7005_v21, %v5387_v9  ;;  %v2737_v6 = vadd.f32 %v2609_v14, %v6870_v13 }
 0x38b   :  { %4737 = vmatpush3.msra.mxu0 %v2871_v42  ;;  %4770 = vmatpush3.msra.mxu1 %v2888_v45  ;;  %v2626_v42 = vmul.f32 %v6878_v50, %v6826_v51  ;;  %v2755_v45 = vadd.f32 %v2627_v58, %v6834_v61  ;;  %v2624_v35 = vmul.f32 %v6878_v50, %v6857_v41  ;;  %v2866_v58 = vmax.f32 %v2738_v19, 0.0 }
 0x38c   :  { %4738 = vmatprep.subr.mxu0 %v7368_v47  ;;  %4771 = vmatprep.subr.mxu1 %v7368_v47  ;;  %v2865_v14 = vmax.f32 %v2737_v6, 0.0  ;;  %v2654_v50 = vmul.f32 %v7017_v7, %v6694_v4 }
 0x38d   :  { %4739 = vmatpush3.msra.mxu0 %v2870_v33  ;;  %4772 = vmatpush3.msra.mxu1 %v2887_v8  ;;  %v2867_v33 = vmax.f32 %v2739_v57, 0.0  ;;  %v2884_v8 = vmax.f32 %v2756_v10, 0.0  ;;  %v2754_v28 = vadd.f32 %v2626_v42, %v6848_v63  ;;  %v2655_v57 = vmul.f32 %v7017_v7, %v6692_v12 }
 0x38e   :  { %4740 = vmatprep.subr.mxu0 %v7368_v47  ;;  %4773 = vmatprep.subr.mxu1 %v7368_v47  ;;  %v2753_v10 = vadd.f32 %v2625_v44, %v6870_v13  ;;  %v2670_v44 = vmul.f32 %v7027_v17, %v6694_v4 }
 0x38f   :  { %4741 = vmatpush3.msra.mxu0 %v2869_v34  ;;  %4774 = vmatpush3.msra.mxu1 %v2886_v55  ;;  %v2883_v34 = vmax.f32 %v2755_v45, 0.0  ;;  %v2736_v55 = vadd.f32 %v2608_v1, %v6882_v11  ;;  %v2882_v42 = vmax.f32 %v2754_v28, 0.0  ;;  %v2783_v45 = vadd.f32 %v2655_v57, %v6704_v54 }
 0x390   :  { %4742 = vmatprep.subr.mxu0 %v7368_v47  ;;  %4775 = vmatprep.subr.mxu1 %v7368_v47  ;;  %v2653_v1 = vmul.f32 %v7017_v7, %v6708_v60  ;;  %v2669_v28 = vmul.f32 %v7027_v17, %v6708_v60  ;;  %v2650_v57 = vmul.f32 %v7017_v7, %v6734_v18 }
 0x391   :  { %4743 = vmatpush3.msra.mxu0 %v2868_v22  ;;  %4776 = vmatpush3.msra.mxu1 %v2885_v46  ;;  %v2671_v22 = vmul.f32 %v7027_v17, %v6692_v12  ;;  %v2752_v46 = vadd.f32 %v2624_v35, %v6882_v11  ;;  %v2864_v19 = vmax.f32 %v2736_v55, 0.0  ;;  %v2881_v12 = vmax.f32 %v2753_v10, 0.0 }
 0x392   :  { %4744 = vmatprep.subr.mxu0 %v7368_v47  ;;  %4777 = vmatprep.subr.mxu1 %v7368_v47  ;;  %v2651_v35 = vmul.f32 %v7017_v7, %v6726_v31  ;;  %v2798_v55 = vadd.f32 %v2670_v44, %v6706_v5 }
 0x393   :  { %4745 = vmatpush3.msra.mxu0 %v2867_v33  ;;  %4778 = vmatpush3.msra.mxu1 %v2884_v8  ;;  %v2652_v33 = vmul.f32 %v7017_v7, %v6714_v59  ;;  %v2782_v8 = vadd.f32 %v2654_v50, %v6706_v5  ;;  %v2799_v6 = vadd.f32 %v2671_v22, %v6704_v54  ;;  %v2880_v4 = vmax.f32 %v2752_v46, 0.0 }
 0x394   :  { %4746 = vmatprep.subr.mxu0 %v7368_v47  ;;  %4779 = vmatprep.subr.mxu1 %v7368_v47  ;;  %v2668_v54 = vmul.f32 %v7027_v17, %v6714_v59  ;;  %v2667_v5 = vmul.f32 %v7027_v17, %v6726_v31  ;;  %v2779_v59 = vadd.f32 %v2651_v35, %v6738_v27  ;;  %v2926_v46 = vmax.f32 %v2798_v55, 0.0 }
 0x395   :  { %4747 = vmatpush3.msra.mxu0 %v2866_v58  ;;  %4780 = vmatpush3.msra.mxu1 %v2883_v34  ;;  %v2911_v58 = vmax.f32 %v2783_v45, 0.0  ;;  %v2781_v34 = vadd.f32 %v2653_v1, %v6716_v37  ;;  %v2780_v60 = vadd.f32 %v2652_v33, %v6724_v3  ;;  %v2910_v10 = vmax.f32 %v2782_v8, 0.0 }
 0x396   :  { %4748 = vmatprep.subr.mxu0 %v7368_v47  ;;  %4781 = vmatprep.subr.mxu1 %v7368_v47  ;;  %v2649_v50 = vmul.f32 %v7017_v7, %v6751_v23  ;;  %v2778_v45 = vadd.f32 %v2650_v57, %v6744_v26  ;;  %v2795_v44 = vadd.f32 %v2667_v5, %v6738_v27 }
 0x397   :  { %4749 = vmatpush3.msra.mxu0 %v2865_v14  ;;  %4782 = vmatpush3.msra.mxu1 %v2882_v42  ;;  %v2927_v14 = vmax.f32 %v2799_v6, 0.0  ;;  %v2797_v42 = vadd.f32 %v2669_v28, %v6716_v37  ;;  %v2909_v22 = vmax.f32 %v2781_v34, 0.0  ;;  %v2666_v37 = vmul.f32 %v7027_v17, %v6734_v18 }
 0x398   :  { %4750 = vmatprep.subr.mxu0 %v7368_v47  ;;  %4783 = vmatprep.subr.mxu1 %v7368_v47  ;;  %v2908_v31 = vmax.f32 %v2780_v60, 0.0  ;;  %v2907_v18 = vmax.f32 %v2779_v59, 0.0  ;;  %v2777_v33 = vadd.f32 %v2649_v50, %v6761_v15  ;;  %v2647_v27 = vmul.f32 %v7017_v7, %v6771_v49 }
 0x399   :  { %4751 = vmatpush3.msra.mxu0 %v2864_v19  ;;  %4752 = vmatprep.mubr.msk.f32.mxu0 %vm5305_vm0, %v7368_v47  ;;  %v2796_v19 = vadd.f32 %v2668_v54, %v6724_v3  ;;  %v2925_v1 = vmax.f32 %v2797_v42, 0.0  ;;  %v2665_v3 = vmul.f32 %v7027_v17, %v6751_v23  ;;  %v2794_v6 = vadd.f32 %v2666_v37, %v6744_v26 }
 0x39a   :  { %4784 = vmatpush3.msra.mxu1 %v2881_v12  ;;  %4753 = vmatmul.mubr.f32.vlgmr.msra.gmra.mxu0 %v6908_v36  ;;  %v2648_v12 = vmul.f32 %v7017_v7, %v6753_v40  ;;  %v2664_v28 = vmul.f32 %v7027_v17, %v6753_v40  ;;  %v2906_v23 = vmax.f32 %v2778_v45, 0.0  ;;  %v2923_v35 = vmax.f32 %v2795_v44, 0.0 }
 0x39b   :  { %4785 = vmatprep.subr.mxu1 %v7368_v47  ;;  %4790 = vmatprep.subr.mxu0 %v7368_v47  ;;  %v2924_v8 = vmax.f32 %v2796_v19, 0.0  ;;  %v2793_v26 = vadd.f32 %v2665_v3, %v6761_v15  ;;  %v2663_v34 = vmul.f32 %v7027_v17, %v6771_v49  ;;  %v2905_v40 = vmax.f32 %v2777_v33, 0.0 }
 0x39c   :  { %4786 = vmatpush3.msra.mxu1 %v2880_v4  ;;  %4787 = vmatprep.mubr.msk.f32.mxu1 %vm5305_vm0, %v7368_v47  ;;  %v2646_v4 = vmul.f32 %v7017_v7, %v6781_v38  ;;  %v2645_v55 = vmul.f32 %v7017_v7, %v6788_v16  ;;  %v2922_v54 = vmax.f32 %v2794_v6, 0.0  ;;  %v2775_v60 = vadd.f32 %v2647_v27, %v6793_v20 }
 0x39d   :  { %4791 = vmatpush3.msra.mxu0 %v2911_v58  ;;  %4788 = vmatmul.mubr.f32.vlgmr.msra.gmra.mxu1 %v6908_v36  ;;  %v2776_v58 = vadd.f32 %v2648_v12, %v6774_v52  ;;  %v2792_v57 = vadd.f32 %v2664_v28, %v6774_v52  ;;  %v2662_v15 = vmul.f32 %v7027_v17, %v6781_v38  ;;  %v2921_v42 = vmax.f32 %v2793_v26, 0.0 }
 0x39e   :  { %4792 = vmatprep.subr.mxu0 %v7368_v47  ;;  %4825 = vmatprep.subr.mxu1 %v7368_v47  ;;  %v2774_v49 = vadd.f32 %v2646_v4, %v6804_v24  ;;  %v2791_v5 = vadd.f32 %v2663_v34, %v6793_v20  ;;  %v2661_v52 = vmul.f32 %v7027_v17, %v6788_v16  ;;  %v2903_v50 = vmax.f32 %v2775_v60, 0.0 }
 0x39f   :  { %4793 = vmatpush3.msra.mxu0 %v2910_v10  ;;  %4826 = vmatpush3.msra.mxu1 %v2927_v14  ;;  %v2644_v10 = vmul.f32 %v7017_v7, %v6800_v48  ;;  %v2904_v14 = vmax.f32 %v2776_v58, 0.0  ;;  %v2773_v38 = vadd.f32 %v2645_v55, %v6810_v43  ;;  %v2643_v59 = vmul.f32 %v7017_v7, %v6814_v56  ;;  %v5105_v58 = vld [vmem:[#allocation6 + $0x178] sm:$0xff] }
 0x3a0   :  { %4794 = vmatprep.subr.mxu0 %v7368_v47  ;;  %4827 = vmatprep.subr.mxu1 %v7368_v47  ;;  %v2660_v20 = vmul.f32 %v7027_v17, %v6800_v48  ;;  %v2533_v16 = vcombine.high %v6994_v53, %v6994_v53  ;;  %v2902_v19 = vmax.f32 %v2774_v49, 0.0  ;;  %v2789_v45 = vadd.f32 %v2661_v52, %v6810_v43 }
 0x3a1   :  { %4795 = vmatpush3.msra.mxu0 %v2909_v22  ;;  %4828 = vmatpush3.msra.mxu1 %v2926_v46  ;;  %v2920_v22 = vmax.f32 %v2792_v57, 0.0  ;;  %v2790_v46 = vadd.f32 %v2662_v15, %v6804_v24  ;;  %v2772_v37 = vadd.f32 %v2644_v10, %v6822_v25  ;;  %v2642_v24 = vmul.f32 %v7017_v7, %v6826_v51  ;;  %v5107_v57 = vld [vmem:[#allocation8 + $0x178] sm:$0xff]  ;;  %v5108_v15 = vld [vmem:[#allocation6 + $0x168] sm:$0xff] }
 0x3a2   :  { %4796 = vmatprep.subr.mxu0 %v7368_v47  ;;  %4829 = vmatprep.subr.mxu1 %v7368_v47  ;;  %v2659_v48 = vmul.f32 %v7027_v17, %v6814_v56  ;;  %v2535_v53 = vcombine.high %v7005_v21, %v7005_v21  ;;  %v2771_v44 = vadd.f32 %v2643_v59, %v6834_v61  ;;  %v2917_v33 = vmax.f32 %v2789_v45, 0.0  ;;  %v5113_v45 = vld [vmem:[#allocation8 + $0x160] sm:$0xff] }
 0x3a3   :  { %4797 = vmatpush3.msra.mxu0 %v2908_v31  ;;  %4830 = vmatpush3.msra.mxu1 %v2925_v1  ;;  %v2919_v31 = vmax.f32 %v2791_v5, 0.0  ;;  %v2901_v1 = vmax.f32 %v2773_v38, 0.0  ;;  %v2918_v12 = vmax.f32 %v2790_v46, 0.0  ;;  %v2788_v43 = vadd.f32 %v2660_v20, %v6822_v25 }
 0x3a4   :  { %4798 = vmatprep.subr.mxu0 %v7368_v47  ;;  %4831 = vmatprep.subr.mxu1 %v7368_v47  ;;  %v2641_v3 = vmul.f32 %v7017_v7, %v6845_v29  ;;  %v2658_v56 = vmul.f32 %v7027_v17, %v6826_v51  ;;  %v7162_v21 = vrot.slane %v2533_v16, %v5387_v9  ;;  %v2899_v28 = vmax.f32 %v2771_v44, 0.0  ;;  %v5112_v16 = vld [vmem:[#allocation8 + $0x168] sm:$0xff] }
 0x3a5   :  { %4799 = vmatpush3.msra.mxu0 %v2907_v18  ;;  %4832 = vmatpush3.msra.mxu1 %v2924_v8  ;;  %v2900_v18 = vmax.f32 %v2772_v37, 0.0  ;;  %v2770_v8 = vadd.f32 %v2642_v24, %v6848_v63  ;;  %v2787_v25 = vadd.f32 %v2659_v48, %v6834_v61  ;;  %v2640_v6 = vmul.f32 %v7017_v7, %v6857_v41  ;;  %v5114_v48 = vld [vmem:[#allocation6 + $0x150] sm:$0xff] }
 0x3a6   :  { %4800 = vmatprep.subr.mxu0 %v7368_v47  ;;  %4833 = vmatprep.subr.mxu1 %v7368_v47  ;;  %v7171_v51 = vrot.slane %v2535_v53, %v5387_v9  ;;  %v2657_v27 = vmul.f32 %v7027_v17, %v6845_v29  ;;  %v2769_v4 = vadd.f32 %v2641_v3, %v6870_v13  ;;  %v5115_v3 = vld [vmem:[#allocation8 + $0x158] sm:$0xff] }
 0x3a7   :  { %4801 = vmatpush3.msra.mxu0 %v2906_v23  ;;  %4834 = vmatpush3.msra.mxu1 %v2923_v35  ;;  %v2916_v23 = vmax.f32 %v2788_v43, 0.0  ;;  %v2786_v61 = vadd.f32 %v2658_v56, %v6848_v63  ;;  %v2656_v9 = vmul.f32 %v7027_v17, %v6857_v41  ;;  %v2898_v7 = vmax.f32 %v2770_v8, 0.0  ;;  %v5106_v41 = vld [vmem:[#allocation6 + $0x170] sm:$0xff] }
 0x3a8   :  { %4802 = vmatprep.subr.mxu0 %v7368_v47  ;;  %4835 = vmatprep.subr.mxu1 %v7368_v47  ;;  %v2915_v35 = vmax.f32 %v2787_v25, 0.0  ;;  %v2768_v29 = vadd.f32 %v2640_v6, %v6882_v11  ;;  %v2687_v26 = vmul.f32 %v5105_v58, %v7162_v21  ;;  %v2785_v63 = vadd.f32 %v2657_v27, %v6870_v13 }
 0x3a9   :  { %4803 = vmatpush3.msra.mxu0 %v2905_v40  ;;  %4836 = vmatpush3.msra.mxu1 %v2922_v54  ;;  %v2897_v34 = vmax.f32 %v2769_v4, 0.0  ;;  %v2914_v40 = vmax.f32 %v2786_v61, 0.0  ;;  %v2686_v17 = vmul.f32 %v5106_v41, %v7162_v21  ;;  %v2703_v55 = vmul.f32 %v5105_v58, %v7171_v51 }
 0x3aa   :  { %4804 = vmatprep.subr.mxu0 %v7368_v47  ;;  %4837 = vmatprep.subr.mxu1 %v7368_v47  ;;  %v2784_v54 = vadd.f32 %v2656_v9, %v6882_v11  ;;  %v2896_v60 = vmax.f32 %v2768_v29, 0.0  ;;  %v2815_v13 = vadd.f32 %v5107_v57, %v2687_v26  ;;  %v2685_v49 = vmul.f32 %v5108_v15, %v7162_v21  ;;  %v5110_v11 = vld [vmem:[#allocation8 + $0x170] sm:$0xff]  ;;  %v5119_v26 = vld [vmem:[#allocation8 + $0x148] sm:$0xff] }
 0x3ab   :  { %4805 = vmatpush3.msra.mxu0 %v2904_v14  ;;  %4838 = vmatpush3.msra.mxu1 %v2921_v42  ;;  %v2702_v10 = vmul.f32 %v5106_v41, %v7171_v51  ;;  %v2913_v14 = vmax.f32 %v2785_v63, 0.0  ;;  %v5109_v42 = vld [vmem:[#allocation6 + $0x160] sm:$0xff]  ;;  %v2814_v52 = vadd.f32 %v5110_v11, %v2686_v17  ;;  %v2831_v38 = vadd.f32 %v5107_v57, %v2703_v55  ;;  %v5120_v41 = vld [vmem:[#allocation6 + $0x138] sm:$0xff] }
 0x3ac   :  { %4806 = vmatprep.subr.mxu0 %v7368_v47  ;;  %4839 = vmatprep.subr.mxu1 %v7368_v47  ;;  %v2684_v5 = vmul.f32 %v5109_v42, %v7162_v21  ;;  %v2701_v59 = vmul.f32 %v5108_v15, %v7171_v51  ;;  %v2943_v20 = vmax.f32 %v2815_v13, 0.0  ;;  %v2682_v53 = vmul.f32 %v5114_v48, %v7162_v21  ;;  %v5122_v15 = vld [vmem:[#allocation8 + $0x140] sm:$0xff] }
 0x3ad   :  { %4807 = vmatpush3.msra.mxu0 %v2903_v50  ;;  %4840 = vmatpush3.msra.mxu1 %v2920_v22  ;;  %v2912_v50 = vmax.f32 %v2784_v54, 0.0  ;;  %v5111_v22 = vld [vmem:[#allocation6 + $0x158] sm:$0xff]  ;;  %v2830_v37 = vadd.f32 %v5110_v11, %v2702_v10  ;;  %v2959_v44 = vmax.f32 %v2831_v38, 0.0  ;;  %v2698_v27 = vmul.f32 %v5114_v48, %v7171_v51  ;;  %v5127_v48 = vld [vmem:[#allocation8 + $0x128] sm:$0xff] }
 0x3ae   :  { %4808 = vmatprep.subr.mxu0 %v7368_v47  ;;  %4841 = vmatprep.subr.mxu1 %v7368_v47  ;;  %v2683_v46 = vmul.f32 %v5111_v22, %v7162_v21  ;;  %v2812_v24 = vadd.f32 %v5113_v45, %v2684_v5  ;;  %v2699_v43 = vmul.f32 %v5111_v22, %v7171_v51  ;;  %v5123_v5 = vld [vmem:[#allocation6 + $0x128] sm:$0xff]  ;;  %v5124_v38 = vld [vmem:[#allocation8 + $0x138] sm:$0xff] }
 0x3af   :  { %4809 = vmatpush3.msra.mxu0 %v2902_v19  ;;  %4842 = vmatpush3.msra.mxu1 %v2919_v31  ;;  %v2813_v19 = vadd.f32 %v5112_v16, %v2685_v49  ;;  %v2700_v31 = vmul.f32 %v5109_v42, %v7171_v51  ;;  %v2958_v25 = vmax.f32 %v2830_v37, 0.0  ;;  %v2679_v17 = vmul.f32 %v5120_v41, %v7162_v21 }
 0x3b0   :  { %4810 = vmatprep.subr.mxu0 %v7368_v47  ;;  %4843 = vmatprep.subr.mxu1 %v7368_v47  ;;  %v2811_v56 = vadd.f32 %v5115_v3, %v2683_v46  ;;  %v2827_v9 = vadd.f32 %v5115_v3, %v2699_v43  ;;  %v2677_v11 = vmul.f32 %v5123_v5, %v7162_v21  ;;  %v5125_v46 = vld [vmem:[#allocation8 + $0x130] sm:$0xff] }
 0x3b1   :  { %4811 = vmatpush3.msra.mxu0 %v2901_v1  ;;  %4844 = vmatpush3.msra.mxu1 %v2918_v12  ;;  %v2942_v1 = vmax.f32 %v2814_v52, 0.0  ;;  %v2829_v12 = vadd.f32 %v5112_v16, %v2701_v59  ;;  %v2941_v8 = vmax.f32 %v2813_v19, 0.0  ;;  %v2828_v6 = vadd.f32 %v5113_v45, %v2700_v31  ;;  %v5126_v16 = vld [vmem:[#allocation6 + $0x120] sm:$0xff] }
 0x3b2   :  { %4812 = vmatprep.subr.mxu0 %v7368_v47  ;;  %4845 = vmatprep.subr.mxu1 %v7368_v47  ;;  %v2939_v58 = vmax.f32 %v2811_v56, 0.0  ;;  %v2955_v13 = vmax.f32 %v2827_v9, 0.0  ;;  %v2807_v59 = vadd.f32 %v5124_v38, %v2679_v17  ;;  %v2676_v19 = vmul.f32 %v5126_v16, %v7162_v21 }
 0x3b3   :  { %4813 = vmatpush3.msra.mxu0 %v2900_v18  ;;  %4846 = vmatpush3.msra.mxu1 %v2917_v33  ;;  %v5116_v18 = vld [vmem:[#allocation6 + $0x148] sm:$0xff]  ;;  %v2957_v61 = vmax.f32 %v2829_v12, 0.0  ;;  %v2692_v56 = vmul.f32 %v5126_v16, %v7171_v51  ;;  %v7271_v16 = vstv %s3681_s9 }
 0x3b4   :  { %4814 = vmatprep.subr.mxu0 %v7368_v47  ;;  %4847 = vmatprep.subr.mxu1 %v7368_v47  ;;  %v2681_v33 = vmul.f32 %v5116_v18, %v7162_v21  ;;  %v2697_v29 = vmul.f32 %v5116_v18, %v7171_v51  ;;  %v2935_v12 = vmax.f32 %v2807_v59, 0.0 }
 0x3b5   :  { %4815 = vmatpush3.msra.mxu0 %v2899_v28  ;;  %4848 = vmatpush3.msra.mxu1 %v2916_v23  ;;  %v2940_v28 = vmax.f32 %v2812_v24, 0.0  ;;  %v5117_v23 = vld [vmem:[#allocation8 + $0x150] sm:$0xff]  ;;  %v2693_v24 = vmul.f32 %v5123_v5, %v7171_v51  ;;  %v5136_v5 = vld [vmem:[#allocation8 + $0x100] sm:$0xff] }
 0x3b6   :  { %4816 = vmatprep.subr.mxu0 %v7368_v47  ;;  %4849 = vmatprep.subr.mxu1 %v7368_v47  ;;  %v2810_v4 = vadd.f32 %v5117_v23, %v2682_v53  ;;  %v2809_v63 = vadd.f32 %v5119_v26, %v2681_v33  ;;  %v2825_v10 = vadd.f32 %v5119_v26, %v2697_v29  ;;  %v5129_v33 = vld [vmem:[#allocation8 + $0x120] sm:$0xff]  ;;  %v5132_v29 = vld [vmem:[#allocation6 + $0x108] sm:$0xff] }
 0x3b7   :  { %4817 = vmatpush3.msra.mxu0 %v2898_v7  ;;  %4850 = vmatpush3.msra.mxu1 %v2915_v35  ;;  %v5118_v7 = vld [vmem:[#allocation6 + $0x140] sm:$0xff]  ;;  %v2805_v53 = vadd.f32 %v5127_v48, %v2677_v11 }
 0x3b8   :  { %4818 = vmatprep.subr.mxu0 %v7368_v47  ;;  %4851 = vmatprep.subr.mxu1 %v7368_v47  ;;  %v2680_v35 = vmul.f32 %v5118_v7, %v7162_v21  ;;  %v2696_v55 = vmul.f32 %v5118_v7, %v7171_v51  ;;  %v2938_v54 = vmax.f32 %v2810_v4, 0.0  ;;  %v2937_v42 = vmax.f32 %v2809_v63, 0.0 }
 0x3b9   :  { %4819 = vmatpush3.msra.mxu0 %v2897_v34  ;;  %4852 = vmatpush3.msra.mxu1 %v2914_v40  ;;  %v2956_v34 = vmax.f32 %v2828_v6, 0.0  ;;  %v2826_v40 = vadd.f32 %v5117_v23, %v2698_v27  ;;  %v2953_v31 = vmax.f32 %v2825_v10, 0.0  ;;  %v2821_v6 = vadd.f32 %v5127_v48, %v2693_v24  ;;  %v5130_v27 = vld [vmem:[#allocation6 + $0x110] sm:$0xff] }
 0x3ba   :  { %4820 = vmatprep.subr.mxu0 %v7368_v47  ;;  %4853 = vmatprep.subr.mxu1 %v7368_v47  ;;  %v2808_v49 = vadd.f32 %v5122_v15, %v2680_v35  ;;  %v2933_v4 = vmax.f32 %v2805_v53, 0.0  ;;  %v2820_v35 = vadd.f32 %v5129_v33, %v2692_v56  ;;  %v2690_v26 = vmul.f32 %v5130_v27, %v7171_v51 }
 0x3bb   :  { %4821 = vmatpush3.msra.mxu0 %v2896_v60  ;;  %4822 = vmatprep.mubr.msk.f32.mxu0 %vm5305_vm0, %v7368_v47  ;;  %v5121_v60 = vld [vmem:[#allocation6 + $0x130] sm:$0xff]  ;;  %v2954_v52 = vmax.f32 %v2826_v40, 0.0 }
 0x3bc   :  { %4854 = vmatpush3.msra.mxu1 %v2913_v14  ;;  %4823 = vmatmul.mubr.f32.vlgmr.msra.gmra.mxu0 %v6908_v36  ;;  %v2678_v57 = vmul.f32 %v5121_v60, %v7162_v21  ;;  %v2695_v14 = vmul.f32 %v5120_v41, %v7171_v51  ;;  %v2694_v22 = vmul.f32 %v5121_v60, %v7171_v51  ;;  %v2936_v37 = vmax.f32 %v2808_v49, 0.0  ;;  %v5133_v40 = vld [vmem:[#allocation8 + $0x110] sm:$0xff] }
 0x3bd   :  { %4855 = vmatprep.subr.mxu1 %v7368_v47  ;;  %4860 = vmatprep.subr.mxu0 %v7368_v47  ;;  %v2689_v60 = vmul.f32 %v5132_v29, %v7171_v51  ;;  %v2818_v10 = vadd.f32 %v5133_v40, %v2690_v26 }
 0x3be   :  { %4856 = vmatpush3.msra.mxu1 %v2912_v50  ;;  %4857 = vmatprep.mubr.msk.f32.mxu1 %vm5305_vm0, %v7368_v47  ;;  %v2824_v50 = vadd.f32 %v5122_v15, %v2696_v55  ;;  %v2823_v45 = vadd.f32 %v5124_v38, %v2695_v14  ;;  %v2822_v3 = vadd.f32 %v5125_v46, %v2694_v22  ;;  %v5134_v55 = vld [vmem:[#allocation6 + $0x100] sm:$0xff]  ;;  %v5135_v15 = vld [vmem:[#allocation8 + $0x108] sm:$0xff] }
 0x3bf   :  { %4861 = vmatpush3.msra.mxu0 %v2943_v20  ;;  %4858 = vmatmul.mubr.f32.vlgmr.msra.gmra.mxu1 %v6908_v36  ;;  %v2806_v20 = vadd.f32 %v5125_v46, %v2678_v57  ;;  %v2688_v14 = vmul.f32 %v5134_v55, %v7171_v51  ;;  %v2946_v59 = vmax.f32 %v2818_v10, 0.0 }
 0x3c0   :  { %4862 = vmatprep.subr.mxu0 %v7368_v47  ;;  %4895 = vmatprep.subr.mxu1 %v7368_v47  ;;  %v2952_v43 = vmax.f32 %v2824_v50, 0.0  ;;  %v2950_v7 = vmax.f32 %v2822_v3, 0.0 }
 0x3c1   :  { %4863 = vmatpush3.msra.mxu0 %v2942_v1  ;;  %4896 = vmatpush3.msra.mxu1 %v2959_v44  ;;  %v5128_v1 = vld [vmem:[#allocation6 + $0x118] sm:$0xff]  ;;  %v2934_v18 = vmax.f32 %v2806_v20, 0.0  ;;  %v7269_v20 = vstv %s3680_s8 }
 0x3c2   :  { %4864 = vmatprep.subr.mxu0 %v7368_v47  ;;  %4897 = vmatprep.subr.mxu1 %v7368_v47  ;;  %v2675_v44 = vmul.f32 %v5128_v1, %v7162_v21  ;;  %v2691_v23 = vmul.f32 %v5128_v1, %v7171_v51  ;;  %v2816_v51 = vadd.f32 %v5136_v5, %v2688_v14 }
 0x3c3   :  { %4865 = vmatpush3.msra.mxu0 %v2941_v8  ;;  %4898 = vmatpush3.msra.mxu1 %v2958_v25  ;;  %v2804_v8 = vadd.f32 %v5129_v33, %v2676_v19  ;;  %v2951_v25 = vmax.f32 %v2823_v45, 0.0 }
 0x3c4   :  { %4866 = vmatprep.subr.mxu0 %v7368_v47  ;;  %4899 = vmatprep.subr.mxu1 %v7368_v47  ;;  %v2944_v46 = vmax.f32 %v2816_v51, 0.0 }
 0x3c5   :  { %4867 = vmatpush3.msra.mxu0 %v2940_v28  ;;  %4900 = vmatpush3.msra.mxu1 %v2957_v61  ;;  %v2674_v28 = vmul.f32 %v5130_v27, %v7162_v21  ;;  %v5131_v61 = vld [vmem:[#allocation8 + $0x118] sm:$0xff]  ;;  %v2932_v63 = vmax.f32 %v2804_v8, 0.0 }
 0x3c6   :  { %4868 = vmatprep.subr.mxu0 %v7368_v47  ;;  %4901 = vmatprep.subr.mxu1 %v7368_v47  ;;  %v2803_v9 = vadd.f32 %v5131_v61, %v2675_v44  ;;  %v2819_v17 = vadd.f32 %v5131_v61, %v2691_v23  ;;  %v2442_v44 = vadd.f32 %v6632_v62, %v6004_v2 }
 0x3c7   :  { %4869 = vmatpush3.msra.mxu0 %v2939_v58  ;;  %4902 = vmatpush3.msra.mxu1 %v2956_v34  ;;  %v2673_v58 = vmul.f32 %v5132_v29, %v7162_v21  ;;  %v2949_v34 = vmax.f32 %v2821_v6, 0.0  ;;  %v2802_v41 = vadd.f32 %v5133_v40, %v2674_v28 }
 0x3c8   :  { %4870 = vmatprep.subr.mxu0 %v7368_v47  ;;  %4903 = vmatprep.subr.mxu1 %v7368_v47  ;;  %v2931_v57 = vmax.f32 %v2803_v9, 0.0 }
 0x3c9   :  { %4871 = vmatpush3.msra.mxu0 %v2938_v54  ;;  %4904 = vmatpush3.msra.mxu1 %v2955_v13  ;;  %v2672_v54 = vmul.f32 %v5134_v55, %v7162_v21  ;;  %v2948_v13 = vmax.f32 %v2820_v35, 0.0  ;;  %v2801_v49 = vadd.f32 %v5135_v15, %v2673_v58  ;;  %v2930_v21 = vmax.f32 %v2802_v41, 0.0  ;;  %v7369_v55 = vld [vmem:[#allocation24_spill] sm:$0xff] }
 0x3ca   :  { %4872 = vmatprep.subr.mxu0 %v7368_v47  ;;  %4905 = vmatprep.subr.mxu1 %v7368_v47 }
 0x3cb   :  { %4873 = vmatpush3.msra.mxu0 %v2937_v42  ;;  %4906 = vmatpush3.msra.mxu1 %v2954_v52  ;;  %v2947_v42 = vmax.f32 %v2819_v17, 0.0  ;;  %v2800_v11 = vadd.f32 %v5136_v5, %v2672_v54  ;;  %v2817_v52 = vadd.f32 %v5135_v15, %v2689_v60  ;;  %v2929_v38 = vmax.f32 %v2801_v49, 0.0  ;;  %v7370_v54 = vld [vmem:[#allocation29_spill] sm:$0xff] }
 0x3cc   :  { %4874 = vmatprep.subr.mxu0 %v7368_v47  ;;  %4907 = vmatprep.subr.mxu1 %v7368_v47  ;;  %v2445_v60 = vadd.f32 %v7370_v54, %v7369_v55 }
 0x3cd   :  { %4875 = vmatpush3.msra.mxu0 %v2936_v37  ;;  %4908 = vmatpush3.msra.mxu1 %v2953_v31  ;;  %v2928_v50 = vmax.f32 %v2800_v11, 0.0  ;;  %v2945_v22 = vmax.f32 %v2817_v52, 0.0 }
 0x3ce   :  { %4876 = vmatprep.subr.mxu0 %v7368_v47  ;;  %4909 = vmatprep.subr.mxu1 %v7368_v47 }
 0x3cf   :  { %4877 = vmatpush3.msra.mxu0 %v2935_v12  ;;  %4910 = vmatpush3.msra.mxu1 %v2952_v43  ;;  %v2443_v43 = vadd.f32 %v6634_v30, %v5994_v39 }
 0x3d0   :  { %4878 = vmatprep.subr.mxu0 %v7368_v47  ;;  %4911 = vmatprep.subr.mxu1 %v7368_v47 }
 0x3d1   :  { %4879 = vmatpush3.msra.mxu0 %v2934_v18  ;;  %4912 = vmatpush3.msra.mxu1 %v2951_v25 }
 0x3d2   :  { %4880 = vmatprep.subr.mxu0 %v7368_v47  ;;  %4913 = vmatprep.subr.mxu1 %v7368_v47 }
 0x3d3   :  { %4881 = vmatpush3.msra.mxu0 %v2933_v4  ;;  %4914 = vmatpush3.msra.mxu1 %v2950_v7 }
 0x3d4   :  { %4882 = vmatprep.subr.mxu0 %v7368_v47  ;;  %4915 = vmatprep.subr.mxu1 %v7368_v47 }
 0x3d5   :  { %4883 = vmatpush3.msra.mxu0 %v2932_v63  ;;  %4916 = vmatpush3.msra.mxu1 %v2949_v34  ;;  %v2444_v34 = vadd.f32 %v6645_v32, %v5996_v0 }
 0x3d6   :  { %4884 = vmatprep.subr.mxu0 %v7368_v47  ;;  %4917 = vmatprep.subr.mxu1 %v7368_v47 }
 0x3d7   :  { %4885 = vmatpush3.msra.mxu0 %v2931_v57  ;;  %4918 = vmatpush3.msra.mxu1 %v2948_v13 }
 0x3d8   :  { %4886 = vmatprep.subr.mxu0 %v7368_v47  ;;  %4919 = vmatprep.subr.mxu1 %v7368_v47 }
 0x3d9   :  { %4887 = vmatpush3.msra.mxu0 %v2930_v21  ;;  %4920 = vmatpush3.msra.mxu1 %v2947_v42 }
 0x3da   :  { %4888 = vmatprep.subr.mxu0 %v7368_v47  ;;  %4921 = vmatprep.subr.mxu1 %v7368_v47 }
 0x3db   :  { %4889 = vmatpush3.msra.mxu0 %v2929_v38  ;;  %4922 = vmatpush3.msra.mxu1 %v2946_v59 }
 0x3dc   :  { %4890 = vmatprep.subr.mxu0 %v7368_v47  ;;  %4923 = vmatprep.subr.mxu1 %v7368_v47 }
 0x3dd   :  { %4891 = vmatpush3.msra.mxu0 %v2928_v50  ;;  %4892 = vmatprep.mubr.msk.f32.mxu0 %vm5305_vm0, %v7368_v47 }
 0x3de   :  { %4924 = vmatpush3.msra.mxu1 %v2945_v22  ;;  %4893 = vmatmul.mubr.f32.vlgmr.msra.gmra.mxu0 %v6908_v36 }
 0x3df   :  { %4925 = vmatprep.subr.mxu1 %v7368_v47  ;;  %4927 = vmatprep.mubr.msk.f32.mxu1 %vm5305_vm0, %v7368_v47 }
 0x3e0   :  { %4926 = vmatpush3.msra.mxu1 %v2944_v46 }
 0x3e1   :  { %4928 = vmatmul.mubr.f32.vlgmr.msra.gmra.mxu1 %v6908_v36 }
 0x439   :  { %v3026_v19 = vpop.f32.mrf.mxu0 }
 0x43a   :  { %v3522_v37 = vadd.f32 %v7269_v20, %v3026_v19  ;;  %v3540_v31 = vadd.f32 %v7271_v16, %v3026_v19 }
 0x43b   :  { %v4684_v45 = vpop.f32.mrf.mxu0  ;;  %v3096_v24 = vpop.f32.mrf.mxu1 }
 0x43c   :  { %5008 = vtanh.f32 %v3522_v37  ;;  %v3596_v48 = vrot.slane %v3540_v31, 1  ;;  %v3523_v47 = vadd.f32 %v7269_v20, %v3096_v24  ;;  %v3541_v53 = vadd.f32 %v7271_v16, %v3096_v24 }
 0x43d   :  { %v4719_v36 = vpop.f32.mrf.mxu1 }
 0x43e   :  { %5010 = vtanh.f32 %v3523_v47  ;;  %v3597_v1 = vsel %vm1226_vm1, %v3541_v53, %v3596_v48  ;;  %v7371_v47 = vld [vmem:[#allocation25_spill] sm:$0xff]  ;;  %v7372_v53 = vld [vmem:[#allocation30_spill] sm:$0xff] }
 0x43f   :  { %v2446_v36 = vadd.f32 %v7372_v53, %v7371_v47 }
 0x449   :  { %v5009_v12 = vpop.eup %5008 }
 0x44a   :  { %v3612_v3 = vadd.f32 %v5009_v12, %v2442_v44  ;;  %v3548_v18 = vmul.f32 1.442695, %v5009_v12  ;;  %v7373_v12 = vld [vmem:[#allocation26_spill] sm:$0xff] }
 0x44b   :  { %v5011_v56 = vpop.eup %5010 }
 0x44c   :  { %v3550_v33 = vmul.f32 1.442695, %v5011_v56  ;;  %v3613_v8 = vadd.f32 %v5011_v56, %v2443_v43  ;;  %v7374_v43 = vld [vmem:[#allocation31_spill] sm:$0xff] }
 0x44e   :  { %5012 = vpow2.f32 %v3550_v33  ;;  %v3629_v25 = vrot.slane %v3613_v8, 7 }
 0x44f   :  { %5014 = vpow2.f32 %v3548_v18 }
 0x450   :  { %v3630_v6 = vsel %vm1226_vm1, %v3629_v25, %v3612_v3  ;;  %v2447_v3 = vadd.f32 %v7374_v43, %v7373_v12 }
 0x45a   :  { %v3166_v27 = vpop.f32.mrf.mxu0 }
 0x45b   :  { %v5013_v28 = vpop.eup %5012  ;;  %v3524_v23 = vadd.f32 %v7269_v20, %v3166_v27  ;;  %v3542_v2 = vadd.f32 %v7271_v16, %v3166_v27 }
 0x45c   :  { %v3572_v62 = vrot.slane %v5013_v28, 7  ;;  %v4754_v4 = vpop.f32.mrf.mxu0  ;;  %v5015_v61 = vpop.eup %5014 }
 0x45d   :  { %5016 = vtanh.f32 %v3524_v23  ;;  %v3598_v39 = vrot.slane %v3542_v2, 7  ;;  %v3236_v30 = vpop.f32.mrf.mxu1 }
 0x45e   :  { %v3525_v9 = vadd.f32 %v7269_v20, %v3236_v30  ;;  %v3543_v7 = vadd.f32 %v7271_v16, %v3236_v30  ;;  %v3573_v35 = vsel %vm1226_vm1, %v3572_v62, %v5015_v61  ;;  %v7375_v30 = vld [vmem:[#allocation27_spill] sm:$0xff] }
 0x45f   :  { %v3599_v29 = vsel %vm1229_vm2, %v3598_v39, %v3597_v1  ;;  %v4789_v58 = vpop.f32.mrf.mxu1 }
 0x460   :  { %5018 = vtanh.f32 %v3525_v9  ;;  %v3600_v26 = vrot.slane %v3543_v7, 6  ;;  %v7376_v9 = vld [vmem:[#allocation32_spill] sm:$0xff] }
 0x461   :  { %v2448_v7 = vadd.f32 %v7376_v9, %v7375_v30 }
 0x462   :  { %v3601_v63 = vsel %vm1232_vm3, %v3600_v26, %v3599_v29  ;;  %v7377_v26 = vld [vmem:[#allocation28_spill] sm:$0xff] }
 0x46a   :  { %v5017_v40 = vpop.eup %5016 }
 0x46b   :  { %v3552_v41 = vmul.f32 1.442695, %v5017_v40  ;;  %v3614_v17 = vadd.f32 %v5017_v40, %v2444_v34 }
 0x46d   :  { %v5019_v57 = vpop.eup %5018  ;;  %5020 = vpow2.f32 %v3552_v41  ;;  %v3631_v13 = vrot.slane %v3614_v17, 6 }
 0x46e   :  { %v3554_v15 = vmul.f32 1.442695, %v5019_v57  ;;  %v3615_v49 = vadd.f32 %v5019_v57, %v2445_v60 }
 0x46f   :  { %v3632_v10 = vsel %vm1229_vm2, %v3631_v13, %v3630_v6 }
 0x470   :  { %5022 = vpow2.f32 %v3554_v15  ;;  %v3633_v14 = vrot.slane %v3615_v49, 5 }
 0x472   :  { %v3634_v21 = vsel %vm1232_vm3, %v3633_v14, %v3632_v10 }
 0x47a   :  { %v5021_v42 = vpop.eup %5020 }
 0x47b   :  { %v3574_v5 = vrot.slane %v5021_v42, 6 }
 0x47c   :  { %v3306_v0 = vpop.f32.mrf.mxu0 }
 0x47d   :  { %v5023_v32 = vpop.eup %5022  ;;  %v3526_v11 = vadd.f32 %v7269_v20, %v3306_v0  ;;  %v3544_v52 = vadd.f32 %v7271_v16, %v3306_v0  ;;  %v3575_v38 = vsel %vm1229_vm2, %v3574_v5, %v3573_v35 }
 0x47e   :  { %v4824_v59 = vpop.f32.mrf.mxu0  ;;  %v3576_v51 = vrot.slane %v5023_v32, 5 }
 0x47f   :  { %5024 = vtanh.f32 %v3526_v11  ;;  %v3602_v50 = vrot.slane %v3544_v52, 5  ;;  %v3376_v22 = vpop.f32.mrf.mxu1 }
 0x480   :  { %v3527_v46 = vadd.f32 %v7269_v20, %v3376_v22  ;;  %v3545_v19 = vadd.f32 %v7271_v16, %v3376_v22  ;;  %v3577_v37 = vsel %vm1232_vm3, %v3576_v51, %v3575_v38 }
 0x481   :  { %v3603_v31 = vsel %vm1235_vm4, %v3602_v50, %v3601_v63  ;;  %v4859_v45 = vpop.f32.mrf.mxu1  ;;  %v7378_v63 = vld [vmem:[#allocation33_spill] sm:$0xff] }
 0x482   :  { %5026 = vtanh.f32 %v3527_v46  ;;  %v3604_v24 = vrot.slane %v3545_v19, 4  ;;  %v2449_v34 = vadd.f32 %v7378_v63, %v7377_v26 }
 0x484   :  { %v7304_v48 = vsel %vm1238_vm5, %v3604_v24, %v3603_v31 }
 0x48c   :  { %v5025_v1 = vpop.eup %5024 }
 0x48d   :  { %v3616_v44 = vadd.f32 %v5025_v1, %v2446_v36  ;;  %v3556_v61 = vmul.f32 1.442695, %v5025_v1 }
 0x48f   :  { %v5027_v56 = vpop.eup %5026  ;;  %v3635_v18 = vrot.slane %v3616_v44, 4 }
 0x490   :  { %v3617_v33 = vadd.f32 %v5027_v56, %v2447_v3  ;;  %v3558_v39 = vmul.f32 1.442695, %v5027_v56 }
 0x491   :  { %v3636_v8 = vsel %vm1235_vm4, %v3635_v18, %v3634_v21 }
 0x492   :  { %v3637_v25 = vrot.slane %v3617_v33, 3 }
 0x494   :  { %v3638_v6 = vsel %vm1238_vm5, %v3637_v25, %v3636_v8 }
 0x49e   :  { %v3446_v27 = vpop.f32.mrf.mxu0 }
 0x49f   :  { %v3528_v28 = vadd.f32 %v7269_v20, %v3446_v27 }
 0x4a0   :  { %v4894_v23 = vpop.f32.mrf.mxu0 }
 0x4a1   :  { %5028 = vtanh.f32 %v3528_v28  ;;  %v3516_v2 = vpop.f32.mrf.mxu1 }
 0x4a2   :  { %v3529_v62 = vadd.f32 %v7269_v20, %v3516_v2 }
 0x4a3   :  { %v4929_v4 = vpop.f32.mrf.mxu1 }
 0x4a4   :  { %5030 = vtanh.f32 %v3529_v62 }
 0x4a5   :  { %5032 = vpow2.f32 %v3556_v61 }
 0x4a6   :  { %5034 = vpow2.f32 %v3558_v39 }
 0x4ae   :  { %v5029_v35 = vpop.eup %5028 }
 0x4af   :  { %v3560_v29 = vmul.f32 1.442695, %v5029_v35  ;;  %v3618_v58 = vadd.f32 %v5029_v35, %v2448_v7 }
 0x4b1   :  { %v5031_v40 = vpop.eup %5030  ;;  %5036 = vpow2.f32 %v3560_v29  ;;  %v3639_v41 = vrot.slane %v3618_v58, 2 }
 0x4b2   :  { %v3562_v17 = vmul.f32 1.442695, %v5031_v40  ;;  %v3619_v20 = vadd.f32 %v5031_v40, %v2449_v34  ;;  %v5033_v60 = vpop.eup %5032 }
 0x4b3   :  { %v3640_v55 = vsel %vm1241_vm6, %v3639_v41, %v3638_v6 }
 0x4b4   :  { %5038 = vpow2.f32 %v3562_v17  ;;  %v3641_v54 = vrot.slane %v3619_v20, 1 }
 0x4b6   :  { %v3642_v57 = vsel %vm1244_vm7, %v3641_v54, %v3640_v55 }
 0x4b7   :  { %3644 = vst [vmem:[#allocation15] sm:$0xff] %v3642_v57 }
 0x4b8   :  { %5252 = shalt.err (!%p5249_p6)
}
 0x4b9   :  { %3664 = dma.vmem_to_hbm [thread:$0]  %s3662_s11, 128, %s7343_s7, [#allocation16]   ;;  %v5035_v13 = vpop.eup %5034  ;;  %v3578_v15 = vrot.slane %v5033_v60, 4  ;;  %v3546_v49 = vadd.f32 %v7271_v16, %v3446_v27  ;;  %v3547_v42 = vadd.f32 %v7271_v16, %v3516_v2  ;;  %v7379_v22 = vld [vmem:[#allocation34_spill] sm:$0xff] }
 0x4ba   :  { %v3580_v10 = vrot.slane %v5035_v13, 3  ;;  %s5307_s7 = smov [#allocation14]  }
 0x4bb   :  { %v3579_v14 = vsel %vm1235_vm4, %v3578_v15, %v3577_v37  ;;  %v3606_v5 = vrot.slane %v3546_v49, 3  ;;  %v3608_v38 = vrot.slane %v3547_v42, 2  ;;  %s3651_s15 = sshll.u32 %s5307_s7, 4  ;;  %s3652_s15 = int_to_ptr.vmem [resolvable:$true] %s3651_s15 }
 0x4bc   :  { %v3581_v32 = vsel %vm1238_vm5, %v3580_v10, %v3579_v14  ;;  %s5261_s1 = scalar_lea.vmem %s3652_s15, 128  ;;  %p5266_p8 = scmp.lt.s32.totalorder %s3652_s15, %s3652_s15 }
 0x4bd   :  { %v3607_v51 = vsel %vm1241_vm6, %v3606_v5, %v7304_v48  ;;  %p5262_p7 = scmp.ne.s32.totalorder %s3652_s15, %s5261_s1  ;;  %p5267_p9 = scmp.lt.s32.totalorder %s5261_s1, %s5261_s1 }
 0x4be   :  { %v5037_v21 = vpop.eup %5036  ;;  %v3609_v16 = vsel %vm1244_vm7, %v3608_v38, %v3607_v51 }
 0x4bf   :  { %v3582_v0 = vrot.slane %v5037_v21, 2  ;;  %p5268_p10 = por %p5267_p9, %p5266_p8 }
 0x4c1   :  { %v5039_v11 = vpop.eup %5038  ;;  %v3583_v52 = vsel %vm1241_vm6, %v3582_v0, %v3581_v32  ;;  %p5269_p11 = pnand %p5268_p10, %p5262_p7 }
 0x4c2   :  { %v3584_v59 = vrot.slane %v5039_v11, 1 }
 0x4c4   :  { %v3585_v50 = vsel %vm1244_vm7, %v3584_v59, %v3583_v52 }
 0x4c5   :  { %v3587_v46 = vmul.f32 %v3585_v50, %v7379_v22 }
 0x4c7   :  { %v3611_v19 = vadd.f32 %v3609_v16, %v3587_v46 }
 0x4c9   :  { %3620 = vst [vmem:[#allocation14] sm:$0xff] %v3611_v19 }
 0x4ca   :  { %5272 = shalt.err (!%p5269_p11)
}
 0x4cb   :  { %3654 = dma.vmem_to_hbm [thread:$0]  %s3652_s15, 128, %s7342_s6, [#allocation4]  }
 0x4cc   :  { %5291 = dma.done.wait [#allocation4], 128  }
 0x4cd   :  { %5292 = vsyncadd [#allocation4], 4294967168 }
 0x4ce   :  { %5293 = dma.done.wait [#allocation16], 128  }
 0x4cf   :  { %5294 = vsyncadd [#allocation16], 4294967168 }
 0x4d0   :  { %3671 = vsyncpa [#allocation3], 1 }
 0x4d1   :  { %3672 = vsyncpa [#allocation7], 1 }
 0x4d2   :  { %3673 = vsyncpa [#allocation10], 1 }
 0x4d3   :  { %3674 = vsyncpa [#allocation4], 1 }
 0x4d4   :  { %3675 = vsyncpa [#allocation16], 1 }
 0x4d5   :  { %3676 = vsyncpa [#allocation5], 1 }
 0x4d6   :  { %3677 = vsyncpa [#allocation13], 1 }

</bundles_post_ra>
